<compile_context>
chip_gen: v7x
topology: tpu7x:2x2x1
jax: 0.10.0
libtpu: 0.0.40
codegen_flags: <defaults>
</compile_context>

<pallas_src>
import jax
import jax.numpy as jnp
from jax import lax
from jax.experimental import pallas as pl
from jax.experimental.pallas import tpu as pltpu

HIDDEN = 32
NUM_OP = 4
CHILD_LAYERS = 6
LSTM_LAYERS = 2
TEMPERATURE = 5.0
TANH_CONST = 2.5
SKIP_TARGET = (0.6, 0.4)   # [1 - skip_target, skip_target]


def _logit_transform(z):
    # matches the reference exactly:
    #   logit /= temperature ; logit /= tanh_constant * tanh(logit)
    z = z / TEMPERATURE
    return z / (TANH_CONST * jnp.tanh(z))


def nas_controller_kernel(
    g_emb_ref,                                  # (1, H)
    w_ref, b_ref,                               # (L, 2H, 4H) fused [w_ih; w_hh], (L, 1, 4H)
    op_fc_w_ref, op_fc_b_ref,                   # (H, NUM_OP), (1, NUM_OP)
    op_emb_ref,                                 # (NUM_OP, H)
    attn1_w_ref, attn1_b_ref,                   # (H, H), (1, H)
    attn2_w_ref, attn2_b_ref,                   # (H, H), (1, H)
    attn3_w_ref, attn3_b_ref,                   # (H, 1), (1, 1)
    u_op_ref,                                   # (1, CHILD_LAYERS) uniforms for op sampling
    u_skip_ref,                                 # (CHILD_LAYERS, CHILD_LAYERS) uniforms for skip sampling
    arc_ops_ref,                                # out: (1, CHILD_LAYERS) int32
    arc_skips_ref,                              # out: (CHILD_LAYERS, CHILD_LAYERS) int32
    sums_ref,                                   # out: (1, 3) f32 [log_probs, entropys, skip_penaltys]
):
    H = HIDDEN

    def lstm_cell(x, h, c, w, bias):
        # fused gate matmul: [x, h] @ [w_ih; w_hh] + (b_ih + b_hh)
        xh = jnp.concatenate([x, h], axis=1)                                  # (1, 2H)
        gates = jnp.dot(xh, w, preferred_element_type=jnp.float32) + bias     # (1, 4H)
        # one sigmoid + one tanh over the full gates vector, then slice
        sig = jax.nn.sigmoid(gates)
        th = jnp.tanh(gates)
        i = sig[:, 0:H]
        f = sig[:, H:2 * H]
        o = sig[:, 3 * H:4 * H]
        g = th[:, 2 * H:3 * H]
        c_new = f * c + i * g
        h_new = o * jnp.tanh(c_new)
        return h_new, c_new

    def stack_lstm(x, h, c):
        new_h, new_c = [], []
        inp = x
        for l in range(LSTM_LAYERS):
            if l != 0:
                inp = new_h[-1]
            hl, cl = lstm_cell(inp, h[l], c[l], w_ref[l], b_ref[l])
            new_h.append(hl)
            new_c.append(cl)
        return new_h, new_c

    h = [jnp.zeros((1, H), jnp.float32) for _ in range(LSTM_LAYERS)]
    c = [jnp.zeros((1, H), jnp.float32) for _ in range(LSTM_LAYERS)]
    x = g_emb_ref[...]

    sum_log_prob = jnp.zeros((1, 1), jnp.float32)
    sum_entropy = jnp.zeros((1, 1), jnp.float32)
    sum_skip_pen = jnp.zeros((1, 1), jnp.float32)

    lane_ops = lax.broadcasted_iota(jnp.int32, (1, NUM_OP), 1)
    lane_layers = lax.broadcasted_iota(jnp.int32, (1, CHILD_LAYERS), 1)

    # register accumulators -> single full store at the end (no masked width-1 stores)
    ops_row = jnp.zeros((1, CHILD_LAYERS), jnp.int32)
    skip_mat = jnp.zeros((CHILD_LAYERS, CHILD_LAYERS), jnp.float32)

    anchors = []       # list of (1, H) register values (loop is statically unrolled)
    anchors_w1 = []

    for layer in range(CHILD_LAYERS):
        # ---------------- _sample_op ----------------
        h, c = stack_lstm(x, h, c)
        logit = (jnp.dot(h[-1], op_fc_w_ref[...], preferred_element_type=jnp.float32)
                 + op_fc_b_ref[...])
        logit = _logit_transform(logit)

        m = jnp.max(logit, axis=1, keepdims=True)
        z = jnp.exp(logit - m)
        denom = jnp.sum(z, axis=1, keepdims=True)
        prob = z / denom                          # softmax, (1, NUM_OP)
        log_sm = logit - (m + jnp.log(denom))     # log_softmax

        # inverse-CDF sampling over 4 classes: 3 adds + 3 compares (no MXU round trip)
        u_op = u_op_ref[0:1, layer:layer + 1]                    # (1, 1)
        c0 = prob[:, 0:1]
        c1 = c0 + prob[:, 1:2]
        c2 = c1 + prob[:, 2:3]
        op_idx = ((u_op >= c0).astype(jnp.int32)
                  + (u_op >= c1).astype(jnp.int32)
                  + (u_op >= c2).astype(jnp.int32))              # (1, 1) in [0, NUM_OP-1]
        onehot = (lane_ops == op_idx).astype(jnp.float32)        # (1, NUM_OP)

        ops_row = ops_row + op_idx * (lane_layers == layer).astype(jnp.int32)

        x = jnp.dot(onehot, op_emb_ref[...], preferred_element_type=jnp.float32)  # (1, H)

        log_prob = -jnp.sum(onehot * log_sm, axis=1, keepdims=True)   # cross_entropy
        sum_log_prob = sum_log_prob + log_prob
        sum_entropy = sum_entropy + log_prob * jnp.exp(log_prob)

        # ---------------- _sample_skip ----------------
        h, c = stack_lstm(x, h, c)
        h2 = h[-1]

        if layer == 0:
            x = g_emb_ref[...]
            # arc_sample.append([]) -> row/column of skip_mat stays all zeros
        else:
            anchors_cat = jnp.concatenate(anchors, axis=0)        # (layer, H)
            anchors_w1_cat = jnp.concatenate(anchors_w1, axis=0)  # (layer, H)

            attn2 = (jnp.dot(h2, attn2_w_ref[...], preferred_element_type=jnp.float32)
                     + attn2_b_ref[...])                          # (1, H)
            query = jnp.tanh(attn2 + anchors_w1_cat)              # (layer, H)
            query = (jnp.dot(query, attn3_w_ref[...], preferred_element_type=jnp.float32)
                     + attn3_b_ref[...])                          # (layer, 1)

            # Reference applies the transform to cat([-q, q]); the transform is an
            # even function and IEEE sign cancellation makes f(-q) == f(q) bit-exactly,
            # so compute it once (halves the tanh/div work on this path).
            lt = _logit_transform(query)
            l0 = lt                                               # logit[:, 0]
            l1 = lt                                               # logit[:, 1]
            p0 = jax.nn.sigmoid(l0)
            p1 = jax.nn.sigmoid(l1)
            p0n = p0 / (p0 + p1)                                  # multinomial normalizes rows
            u_skip = u_skip_ref[0:layer, layer:layer + 1]         # (layer, 1)
            skip = (u_skip >= p0n).astype(jnp.float32)            # 1.0 -> class 1

            # skip_mat[i, layer] = skip decision of layer `layer` toward layer i (i < layer)
            colmask = (lane_layers == layer).astype(jnp.float32)  # (1, CHILD_LAYERS)
            skip_full = jnp.concatenate(
                [skip, jnp.zeros((CHILD_LAYERS - layer, 1), jnp.float32)], axis=0)
            skip_mat = skip_mat + skip_full * colmask             # (6, 6)

            # cross_entropy(logit, skip) with mean reduction over the `layer` rows
            mx = jnp.maximum(l0, l1)
            lse2 = mx + jnp.log(jnp.exp(l0 - mx) + jnp.exp(l1 - mx))
            picked = jnp.where(skip > 0.5, l1, l0) - lse2
            log_prob = -jnp.sum(picked, axis=0, keepdims=True) * (1.0 / float(layer))
            sum_log_prob = sum_log_prob + log_prob
            sum_entropy = sum_entropy + log_prob * jnp.exp(log_prob)

            skip_pen = jnp.sum(p0 * jnp.log(p0 * (1.0 / SKIP_TARGET[0]))
                               + p1 * jnp.log(p1 * (1.0 / SKIP_TARGET[1])),
                               axis=0, keepdims=True)             # (1, 1)
            sum_skip_pen = sum_skip_pen + skip_pen

            n_skip = jnp.sum(skip, axis=0, keepdims=True)         # (1, 1)
            x = jnp.sum(skip * anchors_cat, axis=0, keepdims=True) / (1.0 + n_skip)  # (1, H)

        anchors.append(h2)
        attn1 = (jnp.dot(h2, attn1_w_ref[...], preferred_element_type=jnp.float32)
                 + attn1_b_ref[...])
        anchors_w1.append(attn1)

    # single full stores
    arc_ops_ref[...] = ops_row
    arc_skips_ref[...] = skip_mat.astype(jnp.int32)
    sums_ref[...] = jnp.concatenate([sum_log_prob, sum_entropy, sum_skip_pen], axis=1)


def _forward_impl(params, key):
    k_op, k_skip = jax.random.split(key)
    # All per-decision uniforms drawn once, outside the kernel (no PRNG on the
    # serial critical path, and works in interpret mode / on CPU emulation too).
    u_op = jax.random.uniform(k_op, (1, CHILD_LAYERS), jnp.float32)
    u_skip = jax.random.uniform(k_skip, (CHILD_LAYERS, CHILD_LAYERS), jnp.float32)

    # Fuse the two LSTM gate matmuls: stack [w_ih; w_hh] along the K axis.
    w_fused = jnp.concatenate([params["w_ih"], params["w_hh"]], axis=1)   # (L, 2H, 4H)

    vmem = pl.BlockSpec(memory_space=pltpu.MemorySpace.VMEM)
    out_shapes = (
        jax.ShapeDtypeStruct((1, CHILD_LAYERS), jnp.int32),
        jax.ShapeDtypeStruct((CHILD_LAYERS, CHILD_LAYERS), jnp.int32),
        jax.ShapeDtypeStruct((1, 3), jnp.float32),
    )
    ops_row, arc_skips, sums = pl.pallas_call(
        nas_controller_kernel,
        out_shape=out_shapes,
        in_specs=[vmem] * 14,
        out_specs=(vmem, vmem, vmem),
        # Everything (weights + state) is <100 KiB: no grid / pipelining needed.
    )(params["g_emb"],
      w_fused, params["b"],
      params["op_fc_w"], params["op_fc_b"], params["op_emb"],
      params["attn1_w"], params["attn1_b"],
      params["attn2_w"], params["attn2_b"],
      params["attn3_w"], params["attn3_b"],
      u_op, u_skip)

    arc_ops = ops_row.reshape(CHILD_LAYERS)       # sampled op per child layer
    return arc_ops, arc_skips, sums.reshape(3)    # [sum log_probs, sum entropys, sum skip_penaltys]


nas_controller_forward = jax.jit(_forward_impl)


def init_params(key):
    ks = jax.random.split(key, 13)
    bound = 1.0 / (HIDDEN ** 0.5)

    def u(k, shape, b):
        return jax.random.uniform(k, shape, jnp.float32, -b, b)

    return dict(
        g_emb=0.2 * jax.random.uniform(ks[0], (1, HIDDEN), jnp.float32) - 0.1,
        # LSTMCell weights (gate order i, f, g, o along the 4H axis);
        # b = b_ih + b_hh folded into a single bias (additive, identical semantics).
        w_ih=u(ks[1], (LSTM_LAYERS, HIDDEN, 4 * HIDDEN), bound),
        w_hh=u(ks[2], (LSTM_LAYERS, HIDDEN, 4 * HIDDEN), bound),
        b=u(ks[3], (LSTM_LAYERS, 1, 4 * HIDDEN), bound),
        op_fc_w=u(ks[4], (HIDDEN, NUM_OP), bound),
        op_fc_b=u(ks[5], (1, NUM_OP), bound),
        op_emb=jax.random.normal(ks[6], (NUM_OP, HIDDEN), jnp.float32),
        attn1_w=u(ks[7], (HIDDEN, HIDDEN), bound),
        attn1_b=u(ks[8], (1, HIDDEN), bound),
        attn2_w=u(ks[9], (HIDDEN, HIDDEN), bound),
        attn2_b=u(ks[10], (1, HIDDEN), bound),
        attn3_w=u(ks[11], (HIDDEN, 1), bound),
        attn3_b=u(ks[12], (1, 1), bound),
    )


if __name__ == "__main__":
    params = init_params(jax.random.PRNGKey(0))
    sample_key = jax.random.PRNGKey(42)

    arc_ops, arc_skips, sums = nas_controller_forward(params, sample_key)
    jax.block_until_ready((arc_ops, arc_skips, sums))

    # Basic sanity: ops in range, skip matrix strictly upper-triangular (i < j).
    assert arc_ops.shape == (CHILD_LAYERS,)
    assert arc_skips.shape == (CHILD_LAYERS, CHILD_LAYERS)
    assert sums.shape == (3,)
    assert bool(jnp.all((arc_ops >= 0) & (arc_ops < NUM_OP)))
    assert bool(jnp.all((arc_skips == 0) | (arc_skips == 1)))
    assert bool(jnp.all(jnp.isfinite(sums)))
    print("KERNEL_OK")
</pallas_src>

<mosaic_0001>
module attributes {stable_mosaic.version = 11 : i64} {
  func.func @nas_controller_kernel(%arg0: memref<1x32xf32, #tpu.memory_space<vmem>>, %arg1: memref<2x64x128xf32, #tpu.memory_space<vmem>>, %arg2: memref<2x1x128xf32, #tpu.memory_space<vmem>>, %arg3: memref<32x4xf32, #tpu.memory_space<vmem>>, %arg4: memref<1x4xf32, #tpu.memory_space<vmem>>, %arg5: memref<4x32xf32, #tpu.memory_space<vmem>>, %arg6: memref<32x32xf32, #tpu.memory_space<vmem>>, %arg7: memref<1x32xf32, #tpu.memory_space<vmem>>, %arg8: memref<32x32xf32, #tpu.memory_space<vmem>>, %arg9: memref<1x32xf32, #tpu.memory_space<vmem>>, %arg10: memref<32x1xf32, #tpu.memory_space<vmem>>, %arg11: memref<1x1xf32, #tpu.memory_space<vmem>>, %arg12: memref<1x6xf32, #tpu.memory_space<vmem>>, %arg13: memref<6x6xf32, #tpu.memory_space<vmem>>, %arg14: memref<1x6xi32, #tpu.memory_space<vmem>>, %arg15: memref<6x6xi32, #tpu.memory_space<vmem>>, %arg16: memref<1x3xf32, #tpu.memory_space<vmem>>) attributes {dimension_semantics = [], scalar_prefetch = 0 : i64, scratch_operands = 0 : i64, tpu.core_type = #tpu.core_type<tc>} {
    %cst = arith.constant 0.000000e+00 : f32
    %0 = vector.broadcast %cst : f32 to vector<1x32xf32>
    %cst_0 = arith.constant 0.000000e+00 : f32
    %1 = vector.broadcast %cst_0 : f32 to vector<1x32xf32>
    %cst_1 = arith.constant 0.000000e+00 : f32
    %2 = vector.broadcast %cst_1 : f32 to vector<1x32xf32>
    %cst_2 = arith.constant 0.000000e+00 : f32
    %3 = vector.broadcast %cst_2 : f32 to vector<1x32xf32>
    %c0 = arith.constant 0 : index
    %c0_3 = arith.constant 0 : index
    %4 = vector.load %arg0[%c0, %c0_3] : memref<1x32xf32, #tpu.memory_space<vmem>>, vector<1x32xf32>
    %cst_4 = arith.constant 0.000000e+00 : f32
    %5 = vector.broadcast %cst_4 : f32 to vector<1x1xf32>
    %cst_5 = arith.constant 0.000000e+00 : f32
    %6 = vector.broadcast %cst_5 : f32 to vector<1x1xf32>
    %cst_6 = arith.constant 0.000000e+00 : f32
    %7 = vector.broadcast %cst_6 : f32 to vector<1x1xf32>
    %8 = tpu.iota {dimensions = array<i32: 1>} : vector<1x4xi32>
    %9 = tpu.iota {dimensions = array<i32: 1>} : vector<1x6xi32>
    %c0_i32 = arith.constant 0 : i32
    %10 = vector.broadcast %c0_i32 : i32 to vector<1x6xi32>
    %cst_7 = arith.constant 0.000000e+00 : f32
    %11 = vector.broadcast %cst_7 : f32 to vector<6x6xf32>
    %c0_8 = arith.constant 0 : index
    %c0_9 = arith.constant 0 : index
    %c0_10 = arith.constant 0 : index
    %12 = vector.load %arg1[%c0_8, %c0_9, %c0_10] : memref<2x64x128xf32, #tpu.memory_space<vmem>>, vector<1x64x128xf32>
    %13 = vector.shape_cast %12 : vector<1x64x128xf32> to vector<64x128xf32>
    %c0_11 = arith.constant 0 : index
    %c0_12 = arith.constant 0 : index
    %c0_13 = arith.constant 0 : index
    %14 = vector.load %arg2[%c0_11, %c0_12, %c0_13] : memref<2x1x128xf32, #tpu.memory_space<vmem>>, vector<1x1x128xf32>
    %15 = vector.shape_cast %14 : vector<1x1x128xf32> to vector<1x128xf32>
    %16 = tpu.concatenate %4, %0 in 1 : vector<1x32xf32>, vector<1x32xf32> -> vector<1x64xf32>
    %cst_14 = arith.constant dense<0.000000e+00> : vector<1x128xf32>
    %17 = tpu.matmul %16, %13, %cst_14 {dimension_numbers = #tpu.dot_dimension_numbers<[1], [0], [0], [1], [0, 0, 1, 1], [], []>} : vector<1x64xf32>, vector<64x128xf32>, vector<1x128xf32> -> vector<1x128xf32>
    %18 = arith.addf %17, %15 : vector<1x128xf32>
    %19 = arith.negf %18 : vector<1x128xf32>
    %20 = math.exp %19 : vector<1x128xf32>
    %cst_15 = arith.constant 1.000000e+00 : f32
    %21 = vector.broadcast %cst_15 : f32 to vector<1x128xf32>
    %22 = arith.addf %21, %20 : vector<1x128xf32>
    %23 = arith.divf %21, %22 : vector<1x128xf32>
    %24 = math.tanh %18 : vector<1x128xf32>
    %25 = vector.extract_strided_slice %23 {offsets = [0, 0], sizes = [1, 32], strides = [1, 1]} : vector<1x128xf32> to vector<1x32xf32>
    %26 = vector.extract_strided_slice %23 {offsets = [0, 32], sizes = [1, 32], strides = [1, 1]} : vector<1x128xf32> to vector<1x32xf32>
    %27 = vector.extract_strided_slice %23 {offsets = [0, 96], sizes = [1, 32], strides = [1, 1]} : vector<1x128xf32> to vector<1x32xf32>
    %28 = vector.extract_strided_slice %24 {offsets = [0, 64], sizes = [1, 32], strides = [1, 1]} : vector<1x128xf32> to vector<1x32xf32>
    %29 = arith.mulf %26, %2 : vector<1x32xf32>
    %30 = arith.mulf %25, %28 : vector<1x32xf32>
    %31 = arith.addf %29, %30 : vector<1x32xf32>
    %32 = math.tanh %31 : vector<1x32xf32>
    %33 = arith.mulf %27, %32 : vector<1x32xf32>
    %c1 = arith.constant 1 : index
    %c0_16 = arith.constant 0 : index
    %c0_17 = arith.constant 0 : index
    %34 = vector.load %arg1[%c1, %c0_16, %c0_17] : memref<2x64x128xf32, #tpu.memory_space<vmem>>, vector<1x64x128xf32>
    %35 = vector.shape_cast %34 : vector<1x64x128xf32> to vector<64x128xf32>
    %c1_18 = arith.constant 1 : index
    %c0_19 = arith.constant 0 : index
    %c0_20 = arith.constant 0 : index
    %36 = vector.load %arg2[%c1_18, %c0_19, %c0_20] : memref<2x1x128xf32, #tpu.memory_space<vmem>>, vector<1x1x128xf32>
    %37 = vector.shape_cast %36 : vector<1x1x128xf32> to vector<1x128xf32>
    %38 = tpu.concatenate %33, %1 in 1 : vector<1x32xf32>, vector<1x32xf32> -> vector<1x64xf32>
    %cst_21 = arith.constant dense<0.000000e+00> : vector<1x128xf32>
    %39 = tpu.matmul %38, %35, %cst_21 {dimension_numbers = #tpu.dot_dimension_numbers<[1], [0], [0], [1], [0, 0, 1, 1], [], []>} : vector<1x64xf32>, vector<64x128xf32>, vector<1x128xf32> -> vector<1x128xf32>
    %40 = arith.addf %39, %37 : vector<1x128xf32>
    %41 = arith.negf %40 : vector<1x128xf32>
    %42 = math.exp %41 : vector<1x128xf32>
    %cst_22 = arith.constant 1.000000e+00 : f32
    %43 = vector.broadcast %cst_22 : f32 to vector<1x128xf32>
    %44 = arith.addf %43, %42 : vector<1x128xf32>
    %45 = arith.divf %43, %44 : vector<1x128xf32>
    %46 = math.tanh %40 : vector<1x128xf32>
    %47 = vector.extract_strided_slice %45 {offsets = [0, 0], sizes = [1, 32], strides = [1, 1]} : vector<1x128xf32> to vector<1x32xf32>
    %48 = vector.extract_strided_slice %45 {offsets = [0, 32], sizes = [1, 32], strides = [1, 1]} : vector<1x128xf32> to vector<1x32xf32>
    %49 = vector.extract_strided_slice %45 {offsets = [0, 96], sizes = [1, 32], strides = [1, 1]} : vector<1x128xf32> to vector<1x32xf32>
    %50 = vector.extract_strided_slice %46 {offsets = [0, 64], sizes = [1, 32], strides = [1, 1]} : vector<1x128xf32> to vector<1x32xf32>
    %51 = arith.mulf %48, %3 : vector<1x32xf32>
    %52 = arith.mulf %47, %50 : vector<1x32xf32>
    %53 = arith.addf %51, %52 : vector<1x32xf32>
    %54 = math.tanh %53 : vector<1x32xf32>
    %55 = arith.mulf %49, %54 : vector<1x32xf32>
    %c0_23 = arith.constant 0 : index
    %c0_24 = arith.constant 0 : index
    %56 = vector.load %arg3[%c0_23, %c0_24] : memref<32x4xf32, #tpu.memory_space<vmem>>, vector<32x4xf32>
    %cst_25 = arith.constant dense<0.000000e+00> : vector<1x4xf32>
    %57 = tpu.matmul %55, %56, %cst_25 {dimension_numbers = #tpu.dot_dimension_numbers<[1], [0], [0], [1], [0, 0, 1, 1], [], []>} : vector<1x32xf32>, vector<32x4xf32>, vector<1x4xf32> -> vector<1x4xf32>
    %c0_26 = arith.constant 0 : index
    %c0_27 = arith.constant 0 : index
    %58 = vector.load %arg4[%c0_26, %c0_27] : memref<1x4xf32, #tpu.memory_space<vmem>>, vector<1x4xf32>
    %59 = arith.addf %57, %58 : vector<1x4xf32>
    %cst_28 = arith.constant 5.000000e+00 : f32
    %60 = vector.broadcast %cst_28 : f32 to vector<1x4xf32>
    %61 = arith.divf %59, %60 : vector<1x4xf32>
    %62 = math.tanh %61 : vector<1x4xf32>
    %cst_29 = arith.constant 2.500000e+00 : f32
    %63 = vector.broadcast %cst_29 : f32 to vector<1x4xf32>
    %64 = arith.mulf %63, %62 : vector<1x4xf32>
    %65 = arith.divf %61, %64 : vector<1x4xf32>
    %cst_30 = arith.constant dense<0xFF800000> : vector<1xf32>
    %66 = vector.multi_reduction <maximumf>, %65, %cst_30 [1] : vector<1x4xf32> to vector<1xf32>
    %67 = vector.shape_cast %66 : vector<1xf32> to vector<1x1xf32>
    %68 = vector.broadcast %67 : vector<1x1xf32> to vector<1x4xf32>
    %69 = arith.subf %65, %68 : vector<1x4xf32>
    %70 = math.exp %69 : vector<1x4xf32>
    %cst_31 = arith.constant dense<0.000000e+00> : vector<1xf32>
    %71 = vector.multi_reduction <add>, %70, %cst_31 [1] : vector<1x4xf32> to vector<1xf32>
    %72 = vector.shape_cast %71 : vector<1xf32> to vector<1x1xf32>
    %73 = vector.broadcast %72 : vector<1x1xf32> to vector<1x4xf32>
    %74 = arith.divf %70, %73 : vector<1x4xf32>
    %75 = math.log %72 : vector<1x1xf32>
    %76 = arith.addf %67, %75 : vector<1x1xf32>
    %77 = vector.broadcast %76 : vector<1x1xf32> to vector<1x4xf32>
    %78 = arith.subf %65, %77 : vector<1x4xf32>
    %c0_32 = arith.constant 0 : index
    %c0_33 = arith.constant 0 : index
    %79 = vector.load %arg12[%c0_32, %c0_33] : memref<1x6xf32, #tpu.memory_space<vmem>>, vector<1x1xf32>
    %80 = vector.extract_strided_slice %74 {offsets = [0, 0], sizes = [1, 1], strides = [1, 1]} : vector<1x4xf32> to vector<1x1xf32>
    %81 = vector.extract_strided_slice %74 {offsets = [0, 1], sizes = [1, 1], strides = [1, 1]} : vector<1x4xf32> to vector<1x1xf32>
    %82 = arith.addf %80, %81 : vector<1x1xf32>
    %83 = vector.extract_strided_slice %74 {offsets = [0, 2], sizes = [1, 1], strides = [1, 1]} : vector<1x4xf32> to vector<1x1xf32>
    %84 = arith.addf %82, %83 : vector<1x1xf32>
    %85 = arith.cmpf oge, %79, %80 : vector<1x1xf32>
    %86 = arith.extui %85 : vector<1x1xi1> to vector<1x1xi32>
    %87 = arith.cmpf oge, %79, %82 : vector<1x1xf32>
    %88 = arith.extui %87 : vector<1x1xi1> to vector<1x1xi32>
    %89 = arith.addi %86, %88 : vector<1x1xi32>
    %90 = arith.cmpf oge, %79, %84 : vector<1x1xf32>
    %91 = arith.extui %90 : vector<1x1xi1> to vector<1x1xi32>
    %92 = arith.addi %89, %91 : vector<1x1xi32>
    %93 = vector.broadcast %92 : vector<1x1xi32> to vector<1x4xi32>
    %94 = arith.cmpi eq, %8, %93 : vector<1x4xi32>
    %95 = arith.extui %94 : vector<1x4xi1> to vector<1x4xi32>
    %96 = arith.sitofp %95 : vector<1x4xi32> to vector<1x4xf32>
    %c0_i32_34 = arith.constant 0 : i32
    %97 = vector.broadcast %c0_i32_34 : i32 to vector<1x6xi32>
    %98 = arith.cmpi eq, %9, %97 : vector<1x6xi32>
    %99 = arith.extui %98 : vector<1x6xi1> to vector<1x6xi32>
    %100 = vector.broadcast %92 : vector<1x1xi32> to vector<1x6xi32>
    %101 = arith.muli %100, %99 : vector<1x6xi32>
    %102 = arith.addi %10, %101 : vector<1x6xi32>
    %c0_35 = arith.constant 0 : index
    %c0_36 = arith.constant 0 : index
    %103 = vector.load %arg5[%c0_35, %c0_36] : memref<4x32xf32, #tpu.memory_space<vmem>>, vector<4x32xf32>
    %cst_37 = arith.constant dense<0.000000e+00> : vector<1x32xf32>
    %104 = tpu.matmul %96, %103, %cst_37 {dimension_numbers = #tpu.dot_dimension_numbers<[1], [0], [0], [1], [0, 0, 1, 1], [], []>} : vector<1x4xf32>, vector<4x32xf32>, vector<1x32xf32> -> vector<1x32xf32>
    %105 = arith.mulf %96, %78 : vector<1x4xf32>
    %cst_38 = arith.constant dense<0.000000e+00> : vector<1xf32>
    %106 = vector.multi_reduction <add>, %105, %cst_38 [1] : vector<1x4xf32> to vector<1xf32>
    %107 = vector.shape_cast %106 : vector<1xf32> to vector<1x1xf32>
    %cst_39 = arith.constant 0.000000e+00 : f32
    %108 = vector.broadcast %cst_39 : f32 to vector<1x1xf32>
    %109 = arith.subf %108, %107 : vector<1x1xf32>
    %110 = arith.addf %5, %109 : vector<1x1xf32>
    %111 = math.exp %109 : vector<1x1xf32>
    %112 = arith.mulf %109, %111 : vector<1x1xf32>
    %113 = arith.addf %6, %112 : vector<1x1xf32>
    %c0_40 = arith.constant 0 : index
    %c0_41 = arith.constant 0 : index
    %c0_42 = arith.constant 0 : index
    %114 = vector.load %arg1[%c0_40, %c0_41, %c0_42] : memref<2x64x128xf32, #tpu.memory_space<vmem>>, vector<1x64x128xf32>
    %115 = vector.shape_cast %114 : vector<1x64x128xf32> to vector<64x128xf32>
    %c0_43 = arith.constant 0 : index
    %c0_44 = arith.constant 0 : index
    %c0_45 = arith.constant 0 : index
    %116 = vector.load %arg2[%c0_43, %c0_44, %c0_45] : memref<2x1x128xf32, #tpu.memory_space<vmem>>, vector<1x1x128xf32>
    %117 = vector.shape_cast %116 : vector<1x1x128xf32> to vector<1x128xf32>
    %118 = tpu.concatenate %104, %33 in 1 : vector<1x32xf32>, vector<1x32xf32> -> vector<1x64xf32>
    %cst_46 = arith.constant dense<0.000000e+00> : vector<1x128xf32>
    %119 = tpu.matmul %118, %115, %cst_46 {dimension_numbers = #tpu.dot_dimension_numbers<[1], [0], [0], [1], [0, 0, 1, 1], [], []>} : vector<1x64xf32>, vector<64x128xf32>, vector<1x128xf32> -> vector<1x128xf32>
    %120 = arith.addf %119, %117 : vector<1x128xf32>
    %121 = arith.negf %120 : vector<1x128xf32>
    %122 = math.exp %121 : vector<1x128xf32>
    %cst_47 = arith.constant 1.000000e+00 : f32
    %123 = vector.broadcast %cst_47 : f32 to vector<1x128xf32>
    %124 = arith.addf %123, %122 : vector<1x128xf32>
    %125 = arith.divf %123, %124 : vector<1x128xf32>
    %126 = math.tanh %120 : vector<1x128xf32>
    %127 = vector.extract_strided_slice %125 {offsets = [0, 0], sizes = [1, 32], strides = [1, 1]} : vector<1x128xf32> to vector<1x32xf32>
    %128 = vector.extract_strided_slice %125 {offsets = [0, 32], sizes = [1, 32], strides = [1, 1]} : vector<1x128xf32> to vector<1x32xf32>
    %129 = vector.extract_strided_slice %125 {offsets = [0, 96], sizes = [1, 32], strides = [1, 1]} : vector<1x128xf32> to vector<1x32xf32>
    %130 = vector.extract_strided_slice %126 {offsets = [0, 64], sizes = [1, 32], strides = [1, 1]} : vector<1x128xf32> to vector<1x32xf32>
    %131 = arith.mulf %128, %31 : vector<1x32xf32>
    %132 = arith.mulf %127, %130 : vector<1x32xf32>
    %133 = arith.addf %131, %132 : vector<1x32xf32>
    %134 = math.tanh %133 : vector<1x32xf32>
    %135 = arith.mulf %129, %134 : vector<1x32xf32>
    %c1_48 = arith.constant 1 : index
    %c0_49 = arith.constant 0 : index
    %c0_50 = arith.constant 0 : index
    %136 = vector.load %arg1[%c1_48, %c0_49, %c0_50] : memref<2x64x128xf32, #tpu.memory_space<vmem>>, vector<1x64x128xf32>
    %137 = vector.shape_cast %136 : vector<1x64x128xf32> to vector<64x128xf32>
    %c1_51 = arith.constant 1 : index
    %c0_52 = arith.constant 0 : index
    %c0_53 = arith.constant 0 : index
    %138 = vector.load %arg2[%c1_51, %c0_52, %c0_53] : memref<2x1x128xf32, #tpu.memory_space<vmem>>, vector<1x1x128xf32>
    %139 = vector.shape_cast %138 : vector<1x1x128xf32> to vector<1x128xf32>
    %140 = tpu.concatenate %135, %55 in 1 : vector<1x32xf32>, vector<1x32xf32> -> vector<1x64xf32>
    %cst_54 = arith.constant dense<0.000000e+00> : vector<1x128xf32>
    %141 = tpu.matmul %140, %137, %cst_54 {dimension_numbers = #tpu.dot_dimension_numbers<[1], [0], [0], [1], [0, 0, 1, 1], [], []>} : vector<1x64xf32>, vector<64x128xf32>, vector<1x128xf32> -> vector<1x128xf32>
    %142 = arith.addf %141, %139 : vector<1x128xf32>
    %143 = arith.negf %142 : vector<1x128xf32>
    %144 = math.exp %143 : vector<1x128xf32>
    %cst_55 = arith.constant 1.000000e+00 : f32
    %145 = vector.broadcast %cst_55 : f32 to vector<1x128xf32>
    %146 = arith.addf %145, %144 : vector<1x128xf32>
    %147 = arith.divf %145, %146 : vector<1x128xf32>
    %148 = math.tanh %142 : vector<1x128xf32>
    %149 = vector.extract_strided_slice %147 {offsets = [0, 0], sizes = [1, 32], strides = [1, 1]} : vector<1x128xf32> to vector<1x32xf32>
    %150 = vector.extract_strided_slice %147 {offsets = [0, 32], sizes = [1, 32], strides = [1, 1]} : vector<1x128xf32> to vector<1x32xf32>
    %151 = vector.extract_strided_slice %147 {offsets = [0, 96], sizes = [1, 32], strides = [1, 1]} : vector<1x128xf32> to vector<1x32xf32>
    %152 = vector.extract_strided_slice %148 {offsets = [0, 64], sizes = [1, 32], strides = [1, 1]} : vector<1x128xf32> to vector<1x32xf32>
    %153 = arith.mulf %150, %53 : vector<1x32xf32>
    %154 = arith.mulf %149, %152 : vector<1x32xf32>
    %155 = arith.addf %153, %154 : vector<1x32xf32>
    %156 = math.tanh %155 : vector<1x32xf32>
    %157 = arith.mulf %151, %156 : vector<1x32xf32>
    %c0_56 = arith.constant 0 : index
    %c0_57 = arith.constant 0 : index
    %158 = vector.load %arg0[%c0_56, %c0_57] : memref<1x32xf32, #tpu.memory_space<vmem>>, vector<1x32xf32>
    %c0_58 = arith.constant 0 : index
    %c0_59 = arith.constant 0 : index
    %159 = vector.load %arg6[%c0_58, %c0_59] : memref<32x32xf32, #tpu.memory_space<vmem>>, vector<32x32xf32>
    %cst_60 = arith.constant dense<0.000000e+00> : vector<1x32xf32>
    %160 = tpu.matmul %157, %159, %cst_60 {dimension_numbers = #tpu.dot_dimension_numbers<[1], [0], [0], [1], [0, 0, 1, 1], [], []>} : vector<1x32xf32>, vector<32x32xf32>, vector<1x32xf32> -> vector<1x32xf32>
    %c0_61 = arith.constant 0 : index
    %c0_62 = arith.constant 0 : index
    %161 = vector.load %arg7[%c0_61, %c0_62] : memref<1x32xf32, #tpu.memory_space<vmem>>, vector<1x32xf32>
    %162 = arith.addf %160, %161 : vector<1x32xf32>
    %c0_63 = arith.constant 0 : index
    %c0_64 = arith.constant 0 : index
    %c0_65 = arith.constant 0 : index
    %163 = vector.load %arg1[%c0_63, %c0_64, %c0_65] : memref<2x64x128xf32, #tpu.memory_space<vmem>>, vector<1x64x128xf32>
    %164 = vector.shape_cast %163 : vector<1x64x128xf32> to vector<64x128xf32>
    %c0_66 = arith.constant 0 : index
    %c0_67 = arith.constant 0 : index
    %c0_68 = arith.constant 0 : index
    %165 = vector.load %arg2[%c0_66, %c0_67, %c0_68] : memref<2x1x128xf32, #tpu.memory_space<vmem>>, vector<1x1x128xf32>
    %166 = vector.shape_cast %165 : vector<1x1x128xf32> to vector<1x128xf32>
    %167 = tpu.concatenate %158, %135 in 1 : vector<1x32xf32>, vector<1x32xf32> -> vector<1x64xf32>
    %cst_69 = arith.constant dense<0.000000e+00> : vector<1x128xf32>
    %168 = tpu.matmul %167, %164, %cst_69 {dimension_numbers = #tpu.dot_dimension_numbers<[1], [0], [0], [1], [0, 0, 1, 1], [], []>} : vector<1x64xf32>, vector<64x128xf32>, vector<1x128xf32> -> vector<1x128xf32>
    %169 = arith.addf %168, %166 : vector<1x128xf32>
    %170 = arith.negf %169 : vector<1x128xf32>
    %171 = math.exp %170 : vector<1x128xf32>
    %cst_70 = arith.constant 1.000000e+00 : f32
    %172 = vector.broadcast %cst_70 : f32 to vector<1x128xf32>
    %173 = arith.addf %172, %171 : vector<1x128xf32>
    %174 = arith.divf %172, %173 : vector<1x128xf32>
    %175 = math.tanh %169 : vector<1x128xf32>
    %176 = vector.extract_strided_slice %174 {offsets = [0, 0], sizes = [1, 32], strides = [1, 1]} : vector<1x128xf32> to vector<1x32xf32>
    %177 = vector.extract_strided_slice %174 {offsets = [0, 32], sizes = [1, 32], strides = [1, 1]} : vector<1x128xf32> to vector<1x32xf32>
    %178 = vector.extract_strided_slice %174 {offsets = [0, 96], sizes = [1, 32], strides = [1, 1]} : vector<1x128xf32> to vector<1x32xf32>
    %179 = vector.extract_strided_slice %175 {offsets = [0, 64], sizes = [1, 32], strides = [1, 1]} : vector<1x128xf32> to vector<1x32xf32>
    %180 = arith.mulf %177, %133 : vector<1x32xf32>
    %181 = arith.mulf %176, %179 : vector<1x32xf32>
    %182 = arith.addf %180, %181 : vector<1x32xf32>
    %183 = math.tanh %182 : vector<1x32xf32>
    %184 = arith.mulf %178, %183 : vector<1x32xf32>
    %c1_71 = arith.constant 1 : index
    %c0_72 = arith.constant 0 : index
    %c0_73 = arith.constant 0 : index
    %185 = vector.load %arg1[%c1_71, %c0_72, %c0_73] : memref<2x64x128xf32, #tpu.memory_space<vmem>>, vector<1x64x128xf32>
    %186 = vector.shape_cast %185 : vector<1x64x128xf32> to vector<64x128xf32>
    %c1_74 = arith.constant 1 : index
    %c0_75 = arith.constant 0 : index
    %c0_76 = arith.constant 0 : index
    %187 = vector.load %arg2[%c1_74, %c0_75, %c0_76] : memref<2x1x128xf32, #tpu.memory_space<vmem>>, vector<1x1x128xf32>
    %188 = vector.shape_cast %187 : vector<1x1x128xf32> to vector<1x128xf32>
    %189 = tpu.concatenate %184, %157 in 1 : vector<1x32xf32>, vector<1x32xf32> -> vector<1x64xf32>
    %cst_77 = arith.constant dense<0.000000e+00> : vector<1x128xf32>
    %190 = tpu.matmul %189, %186, %cst_77 {dimension_numbers = #tpu.dot_dimension_numbers<[1], [0], [0], [1], [0, 0, 1, 1], [], []>} : vector<1x64xf32>, vector<64x128xf32>, vector<1x128xf32> -> vector<1x128xf32>
    %191 = arith.addf %190, %188 : vector<1x128xf32>
    %192 = arith.negf %191 : vector<1x128xf32>
    %193 = math.exp %192 : vector<1x128xf32>
    %cst_78 = arith.constant 1.000000e+00 : f32
    %194 = vector.broadcast %cst_78 : f32 to vector<1x128xf32>
    %195 = arith.addf %194, %193 : vector<1x128xf32>
    %196 = arith.divf %194, %195 : vector<1x128xf32>
    %197 = math.tanh %191 : vector<1x128xf32>
    %198 = vector.extract_strided_slice %196 {offsets = [0, 0], sizes = [1, 32], strides = [1, 1]} : vector<1x128xf32> to vector<1x32xf32>
    %199 = vector.extract_strided_slice %196 {offsets = [0, 32], sizes = [1, 32], strides = [1, 1]} : vector<1x128xf32> to vector<1x32xf32>
    %200 = vector.extract_strided_slice %196 {offsets = [0, 96], sizes = [1, 32], strides = [1, 1]} : vector<1x128xf32> to vector<1x32xf32>
    %201 = vector.extract_strided_slice %197 {offsets = [0, 64], sizes = [1, 32], strides = [1, 1]} : vector<1x128xf32> to vector<1x32xf32>
    %202 = arith.mulf %199, %155 : vector<1x32xf32>
    %203 = arith.mulf %198, %201 : vector<1x32xf32>
    %204 = arith.addf %202, %203 : vector<1x32xf32>
    %205 = math.tanh %204 : vector<1x32xf32>
    %206 = arith.mulf %200, %205 : vector<1x32xf32>
    %c0_79 = arith.constant 0 : index
    %c0_80 = arith.constant 0 : index
    %207 = vector.load %arg3[%c0_79, %c0_80] : memref<32x4xf32, #tpu.memory_space<vmem>>, vector<32x4xf32>
    %cst_81 = arith.constant dense<0.000000e+00> : vector<1x4xf32>
    %208 = tpu.matmul %206, %207, %cst_81 {dimension_numbers = #tpu.dot_dimension_numbers<[1], [0], [0], [1], [0, 0, 1, 1], [], []>} : vector<1x32xf32>, vector<32x4xf32>, vector<1x4xf32> -> vector<1x4xf32>
    %c0_82 = arith.constant 0 : index
    %c0_83 = arith.constant 0 : index
    %209 = vector.load %arg4[%c0_82, %c0_83] : memref<1x4xf32, #tpu.memory_space<vmem>>, vector<1x4xf32>
    %210 = arith.addf %208, %209 : vector<1x4xf32>
    %cst_84 = arith.constant 5.000000e+00 : f32
    %211 = vector.broadcast %cst_84 : f32 to vector<1x4xf32>
    %212 = arith.divf %210, %211 : vector<1x4xf32>
    %213 = math.tanh %212 : vector<1x4xf32>
    %cst_85 = arith.constant 2.500000e+00 : f32
    %214 = vector.broadcast %cst_85 : f32 to vector<1x4xf32>
    %215 = arith.mulf %214, %213 : vector<1x4xf32>
    %216 = arith.divf %212, %215 : vector<1x4xf32>
    %cst_86 = arith.constant dense<0xFF800000> : vector<1xf32>
    %217 = vector.multi_reduction <maximumf>, %216, %cst_86 [1] : vector<1x4xf32> to vector<1xf32>
    %218 = vector.shape_cast %217 : vector<1xf32> to vector<1x1xf32>
    %219 = vector.broadcast %218 : vector<1x1xf32> to vector<1x4xf32>
    %220 = arith.subf %216, %219 : vector<1x4xf32>
    %221 = math.exp %220 : vector<1x4xf32>
    %cst_87 = arith.constant dense<0.000000e+00> : vector<1xf32>
    %222 = vector.multi_reduction <add>, %221, %cst_87 [1] : vector<1x4xf32> to vector<1xf32>
    %223 = vector.shape_cast %222 : vector<1xf32> to vector<1x1xf32>
    %224 = vector.broadcast %223 : vector<1x1xf32> to vector<1x4xf32>
    %225 = arith.divf %221, %224 : vector<1x4xf32>
    %226 = math.log %223 : vector<1x1xf32>
    %227 = arith.addf %218, %226 : vector<1x1xf32>
    %228 = vector.broadcast %227 : vector<1x1xf32> to vector<1x4xf32>
    %229 = arith.subf %216, %228 : vector<1x4xf32>
    %c0_88 = arith.constant 0 : index
    %c1_89 = arith.constant 1 : index
    %230 = vector.load %arg12[%c0_88, %c1_89] : memref<1x6xf32, #tpu.memory_space<vmem>>, vector<1x1xf32>
    %231 = vector.extract_strided_slice %225 {offsets = [0, 0], sizes = [1, 1], strides = [1, 1]} : vector<1x4xf32> to vector<1x1xf32>
    %232 = vector.extract_strided_slice %225 {offsets = [0, 1], sizes = [1, 1], strides = [1, 1]} : vector<1x4xf32> to vector<1x1xf32>
    %233 = arith.addf %231, %232 : vector<1x1xf32>
    %234 = vector.extract_strided_slice %225 {offsets = [0, 2], sizes = [1, 1], strides = [1, 1]} : vector<1x4xf32> to vector<1x1xf32>
    %235 = arith.addf %233, %234 : vector<1x1xf32>
    %236 = arith.cmpf oge, %230, %231 : vector<1x1xf32>
    %237 = arith.extui %236 : vector<1x1xi1> to vector<1x1xi32>
    %238 = arith.cmpf oge, %230, %233 : vector<1x1xf32>
    %239 = arith.extui %238 : vector<1x1xi1> to vector<1x1xi32>
    %240 = arith.addi %237, %239 : vector<1x1xi32>
    %241 = arith.cmpf oge, %230, %235 : vector<1x1xf32>
    %242 = arith.extui %241 : vector<1x1xi1> to vector<1x1xi32>
    %243 = arith.addi %240, %242 : vector<1x1xi32>
    %244 = vector.broadcast %243 : vector<1x1xi32> to vector<1x4xi32>
    %245 = arith.cmpi eq, %8, %244 : vector<1x4xi32>
    %246 = arith.extui %245 : vector<1x4xi1> to vector<1x4xi32>
    %247 = arith.sitofp %246 : vector<1x4xi32> to vector<1x4xf32>
    %c1_i32 = arith.constant 1 : i32
    %248 = vector.broadcast %c1_i32 : i32 to vector<1x6xi32>
    %249 = arith.cmpi eq, %9, %248 : vector<1x6xi32>
    %250 = arith.extui %249 : vector<1x6xi1> to vector<1x6xi32>
    %251 = vector.broadcast %243 : vector<1x1xi32> to vector<1x6xi32>
    %252 = arith.muli %251, %250 : vector<1x6xi32>
    %253 = arith.addi %102, %252 : vector<1x6xi32>
    %c0_90 = arith.constant 0 : index
    %c0_91 = arith.constant 0 : index
    %254 = vector.load %arg5[%c0_90, %c0_91] : memref<4x32xf32, #tpu.memory_space<vmem>>, vector<4x32xf32>
    %cst_92 = arith.constant dense<0.000000e+00> : vector<1x32xf32>
    %255 = tpu.matmul %247, %254, %cst_92 {dimension_numbers = #tpu.dot_dimension_numbers<[1], [0], [0], [1], [0, 0, 1, 1], [], []>} : vector<1x4xf32>, vector<4x32xf32>, vector<1x32xf32> -> vector<1x32xf32>
    %256 = arith.mulf %247, %229 : vector<1x4xf32>
    %cst_93 = arith.constant dense<0.000000e+00> : vector<1xf32>
    %257 = vector.multi_reduction <add>, %256, %cst_93 [1] : vector<1x4xf32> to vector<1xf32>
    %258 = vector.shape_cast %257 : vector<1xf32> to vector<1x1xf32>
    %cst_94 = arith.constant 0.000000e+00 : f32
    %259 = vector.broadcast %cst_94 : f32 to vector<1x1xf32>
    %260 = arith.subf %259, %258 : vector<1x1xf32>
    %261 = arith.addf %110, %260 : vector<1x1xf32>
    %262 = math.exp %260 : vector<1x1xf32>
    %263 = arith.mulf %260, %262 : vector<1x1xf32>
    %264 = arith.addf %113, %263 : vector<1x1xf32>
    %c0_95 = arith.constant 0 : index
    %c0_96 = arith.constant 0 : index
    %c0_97 = arith.constant 0 : index
    %265 = vector.load %arg1[%c0_95, %c0_96, %c0_97] : memref<2x64x128xf32, #tpu.memory_space<vmem>>, vector<1x64x128xf32>
    %266 = vector.shape_cast %265 : vector<1x64x128xf32> to vector<64x128xf32>
    %c0_98 = arith.constant 0 : index
    %c0_99 = arith.constant 0 : index
    %c0_100 = arith.constant 0 : index
    %267 = vector.load %arg2[%c0_98, %c0_99, %c0_100] : memref<2x1x128xf32, #tpu.memory_space<vmem>>, vector<1x1x128xf32>
    %268 = vector.shape_cast %267 : vector<1x1x128xf32> to vector<1x128xf32>
    %269 = tpu.concatenate %255, %184 in 1 : vector<1x32xf32>, vector<1x32xf32> -> vector<1x64xf32>
    %cst_101 = arith.constant dense<0.000000e+00> : vector<1x128xf32>
    %270 = tpu.matmul %269, %266, %cst_101 {dimension_numbers = #tpu.dot_dimension_numbers<[1], [0], [0], [1], [0, 0, 1, 1], [], []>} : vector<1x64xf32>, vector<64x128xf32>, vector<1x128xf32> -> vector<1x128xf32>
    %271 = arith.addf %270, %268 : vector<1x128xf32>
    %272 = arith.negf %271 : vector<1x128xf32>
    %273 = math.exp %272 : vector<1x128xf32>
    %cst_102 = arith.constant 1.000000e+00 : f32
    %274 = vector.broadcast %cst_102 : f32 to vector<1x128xf32>
    %275 = arith.addf %274, %273 : vector<1x128xf32>
    %276 = arith.divf %274, %275 : vector<1x128xf32>
    %277 = math.tanh %271 : vector<1x128xf32>
    %278 = vector.extract_strided_slice %276 {offsets = [0, 0], sizes = [1, 32], strides = [1, 1]} : vector<1x128xf32> to vector<1x32xf32>
    %279 = vector.extract_strided_slice %276 {offsets = [0, 32], sizes = [1, 32], strides = [1, 1]} : vector<1x128xf32> to vector<1x32xf32>
    %280 = vector.extract_strided_slice %276 {offsets = [0, 96], sizes = [1, 32], strides = [1, 1]} : vector<1x128xf32> to vector<1x32xf32>
    %281 = vector.extract_strided_slice %277 {offsets = [0, 64], sizes = [1, 32], strides = [1, 1]} : vector<1x128xf32> to vector<1x32xf32>
    %282 = arith.mulf %279, %182 : vector<1x32xf32>
    %283 = arith.mulf %278, %281 : vector<1x32xf32>
    %284 = arith.addf %282, %283 : vector<1x32xf32>
    %285 = math.tanh %284 : vector<1x32xf32>
    %286 = arith.mulf %280, %285 : vector<1x32xf32>
    %c1_103 = arith.constant 1 : index
    %c0_104 = arith.constant 0 : index
    %c0_105 = arith.constant 0 : index
    %287 = vector.load %arg1[%c1_103, %c0_104, %c0_105] : memref<2x64x128xf32, #tpu.memory_space<vmem>>, vector<1x64x128xf32>
    %288 = vector.shape_cast %287 : vector<1x64x128xf32> to vector<64x128xf32>
    %c1_106 = arith.constant 1 : index
    %c0_107 = arith.constant 0 : index
    %c0_108 = arith.constant 0 : index
    %289 = vector.load %arg2[%c1_106, %c0_107, %c0_108] : memref<2x1x128xf32, #tpu.memory_space<vmem>>, vector<1x1x128xf32>
    %290 = vector.shape_cast %289 : vector<1x1x128xf32> to vector<1x128xf32>
    %291 = tpu.concatenate %286, %206 in 1 : vector<1x32xf32>, vector<1x32xf32> -> vector<1x64xf32>
    %cst_109 = arith.constant dense<0.000000e+00> : vector<1x128xf32>
    %292 = tpu.matmul %291, %288, %cst_109 {dimension_numbers = #tpu.dot_dimension_numbers<[1], [0], [0], [1], [0, 0, 1, 1], [], []>} : vector<1x64xf32>, vector<64x128xf32>, vector<1x128xf32> -> vector<1x128xf32>
    %293 = arith.addf %292, %290 : vector<1x128xf32>
    %294 = arith.negf %293 : vector<1x128xf32>
    %295 = math.exp %294 : vector<1x128xf32>
    %cst_110 = arith.constant 1.000000e+00 : f32
    %296 = vector.broadcast %cst_110 : f32 to vector<1x128xf32>
    %297 = arith.addf %296, %295 : vector<1x128xf32>
    %298 = arith.divf %296, %297 : vector<1x128xf32>
    %299 = math.tanh %293 : vector<1x128xf32>
    %300 = vector.extract_strided_slice %298 {offsets = [0, 0], sizes = [1, 32], strides = [1, 1]} : vector<1x128xf32> to vector<1x32xf32>
    %301 = vector.extract_strided_slice %298 {offsets = [0, 32], sizes = [1, 32], strides = [1, 1]} : vector<1x128xf32> to vector<1x32xf32>
    %302 = vector.extract_strided_slice %298 {offsets = [0, 96], sizes = [1, 32], strides = [1, 1]} : vector<1x128xf32> to vector<1x32xf32>
    %303 = vector.extract_strided_slice %299 {offsets = [0, 64], sizes = [1, 32], strides = [1, 1]} : vector<1x128xf32> to vector<1x32xf32>
    %304 = arith.mulf %301, %204 : vector<1x32xf32>
    %305 = arith.mulf %300, %303 : vector<1x32xf32>
    %306 = arith.addf %304, %305 : vector<1x32xf32>
    %307 = math.tanh %306 : vector<1x32xf32>
    %308 = arith.mulf %302, %307 : vector<1x32xf32>
    %c0_111 = arith.constant 0 : index
    %c0_112 = arith.constant 0 : index
    %309 = vector.load %arg8[%c0_111, %c0_112] : memref<32x32xf32, #tpu.memory_space<vmem>>, vector<32x32xf32>
    %cst_113 = arith.constant dense<0.000000e+00> : vector<1x32xf32>
    %310 = tpu.matmul %308, %309, %cst_113 {dimension_numbers = #tpu.dot_dimension_numbers<[1], [0], [0], [1], [0, 0, 1, 1], [], []>} : vector<1x32xf32>, vector<32x32xf32>, vector<1x32xf32> -> vector<1x32xf32>
    %c0_114 = arith.constant 0 : index
    %c0_115 = arith.constant 0 : index
    %311 = vector.load %arg9[%c0_114, %c0_115] : memref<1x32xf32, #tpu.memory_space<vmem>>, vector<1x32xf32>
    %312 = arith.addf %310, %311 : vector<1x32xf32>
    %313 = arith.addf %312, %162 : vector<1x32xf32>
    %314 = math.tanh %313 : vector<1x32xf32>
    %c0_116 = arith.constant 0 : index
    %c0_117 = arith.constant 0 : index
    %315 = vector.load %arg10[%c0_116, %c0_117] : memref<32x1xf32, #tpu.memory_space<vmem>>, vector<32x1xf32>
    %cst_118 = arith.constant dense<0.000000e+00> : vector<1x1xf32>
    %316 = tpu.matmul %314, %315, %cst_118 {dimension_numbers = #tpu.dot_dimension_numbers<[1], [0], [0], [1], [0, 0, 1, 1], [], []>} : vector<1x32xf32>, vector<32x1xf32>, vector<1x1xf32> -> vector<1x1xf32>
    %c0_119 = arith.constant 0 : index
    %c0_120 = arith.constant 0 : index
    %317 = vector.load %arg11[%c0_119, %c0_120] : memref<1x1xf32, #tpu.memory_space<vmem>>, vector<1x1xf32>
    %318 = arith.addf %316, %317 : vector<1x1xf32>
    %cst_121 = arith.constant 5.000000e+00 : f32
    %319 = vector.broadcast %cst_121 : f32 to vector<1x1xf32>
    %320 = arith.divf %318, %319 : vector<1x1xf32>
    %321 = math.tanh %320 : vector<1x1xf32>
    %cst_122 = arith.constant 2.500000e+00 : f32
    %322 = vector.broadcast %cst_122 : f32 to vector<1x1xf32>
    %323 = arith.mulf %322, %321 : vector<1x1xf32>
    %324 = arith.divf %320, %323 : vector<1x1xf32>
    %325 = arith.negf %324 : vector<1x1xf32>
    %326 = math.exp %325 : vector<1x1xf32>
    %cst_123 = arith.constant 1.000000e+00 : f32
    %327 = vector.broadcast %cst_123 : f32 to vector<1x1xf32>
    %328 = arith.addf %327, %326 : vector<1x1xf32>
    %329 = arith.divf %327, %328 : vector<1x1xf32>
    %330 = arith.negf %324 : vector<1x1xf32>
    %331 = math.exp %330 : vector<1x1xf32>
    %cst_124 = arith.constant 1.000000e+00 : f32
    %332 = vector.broadcast %cst_124 : f32 to vector<1x1xf32>
    %333 = arith.addf %332, %331 : vector<1x1xf32>
    %334 = arith.divf %332, %333 : vector<1x1xf32>
    %335 = arith.addf %329, %334 : vector<1x1xf32>
    %336 = arith.divf %329, %335 : vector<1x1xf32>
    %c0_125 = arith.constant 0 : index
    %c1_126 = arith.constant 1 : index
    %337 = vector.load %arg13[%c0_125, %c1_126] : memref<6x6xf32, #tpu.memory_space<vmem>>, vector<1x1xf32>
    %338 = arith.cmpf oge, %337, %336 : vector<1x1xf32>
    %339 = arith.extui %338 : vector<1x1xi1> to vector<1x1xi32>
    %340 = arith.sitofp %339 : vector<1x1xi32> to vector<1x1xf32>
    %c1_i32_127 = arith.constant 1 : i32
    %341 = vector.broadcast %c1_i32_127 : i32 to vector<1x6xi32>
    %342 = arith.cmpi eq, %9, %341 : vector<1x6xi32>
    %343 = arith.extui %342 : vector<1x6xi1> to vector<1x6xi32>
    %344 = arith.sitofp %343 : vector<1x6xi32> to vector<1x6xf32>
    %cst_128 = arith.constant 0.000000e+00 : f32
    %345 = vector.broadcast %cst_128 : f32 to vector<5x1xf32>
    %346 = tpu.concatenate %340, %345 in 0 : vector<1x1xf32>, vector<5x1xf32> -> vector<6x1xf32>
    %347 = vector.broadcast %346 : vector<6x1xf32> to vector<6x6xf32>
    %348 = vector.broadcast %344 : vector<1x6xf32> to vector<6x6xf32>
    %349 = arith.mulf %347, %348 : vector<6x6xf32>
    %350 = arith.addf %11, %349 : vector<6x6xf32>
    %351 = arith.maximumf %324, %324 : vector<1x1xf32>
    %352 = arith.subf %324, %351 : vector<1x1xf32>
    %353 = math.exp %352 : vector<1x1xf32>
    %354 = arith.subf %324, %351 : vector<1x1xf32>
    %355 = math.exp %354 : vector<1x1xf32>
    %356 = arith.addf %353, %355 : vector<1x1xf32>
    %357 = math.log %356 : vector<1x1xf32>
    %358 = arith.addf %351, %357 : vector<1x1xf32>
    %cst_129 = arith.constant 5.000000e-01 : f32
    %359 = vector.broadcast %cst_129 : f32 to vector<1x1xf32>
    %360 = arith.cmpf ogt, %340, %359 : vector<1x1xf32>
    %361 = arith.select %360, %324, %324 : vector<1x1xi1>, vector<1x1xf32>
    %362 = arith.subf %361, %358 : vector<1x1xf32>
    %cst_130 = arith.constant dense<0.000000e+00> : vector<1xf32>
    %363 = vector.multi_reduction <add>, %362, %cst_130 [0] : vector<1x1xf32> to vector<1xf32>
    %364 = vector.shape_cast %363 : vector<1xf32> to vector<1x1xf32>
    %cst_131 = arith.constant 0.000000e+00 : f32
    %365 = vector.broadcast %cst_131 : f32 to vector<1x1xf32>
    %366 = arith.subf %365, %364 : vector<1x1xf32>
    %cst_132 = arith.constant 1.000000e+00 : f32
    %367 = vector.broadcast %cst_132 : f32 to vector<1x1xf32>
    %368 = arith.mulf %366, %367 : vector<1x1xf32>
    %369 = arith.addf %261, %368 : vector<1x1xf32>
    %370 = math.exp %368 : vector<1x1xf32>
    %371 = arith.mulf %368, %370 : vector<1x1xf32>
    %372 = arith.addf %264, %371 : vector<1x1xf32>
    %cst_133 = arith.constant 1.66666663 : f32
    %373 = vector.broadcast %cst_133 : f32 to vector<1x1xf32>
    %374 = arith.mulf %329, %373 : vector<1x1xf32>
    %375 = math.log %374 : vector<1x1xf32>
    %376 = arith.mulf %329, %375 : vector<1x1xf32>
    %cst_134 = arith.constant 2.500000e+00 : f32
    %377 = vector.broadcast %cst_134 : f32 to vector<1x1xf32>
    %378 = arith.mulf %334, %377 : vector<1x1xf32>
    %379 = math.log %378 : vector<1x1xf32>
    %380 = arith.mulf %334, %379 : vector<1x1xf32>
    %381 = arith.addf %376, %380 : vector<1x1xf32>
    %cst_135 = arith.constant dense<0.000000e+00> : vector<1xf32>
    %382 = vector.multi_reduction <add>, %381, %cst_135 [0] : vector<1x1xf32> to vector<1xf32>
    %383 = vector.shape_cast %382 : vector<1xf32> to vector<1x1xf32>
    %384 = arith.addf %7, %383 : vector<1x1xf32>
    %cst_136 = arith.constant dense<0.000000e+00> : vector<1xf32>
    %385 = vector.multi_reduction <add>, %340, %cst_136 [0] : vector<1x1xf32> to vector<1xf32>
    %386 = vector.shape_cast %385 : vector<1xf32> to vector<1x1xf32>
    %387 = vector.broadcast %340 : vector<1x1xf32> to vector<1x32xf32>
    %388 = arith.mulf %387, %157 : vector<1x32xf32>
    %cst_137 = arith.constant dense<0.000000e+00> : vector<32xf32>
    %389 = vector.multi_reduction <add>, %388, %cst_137 [0] : vector<1x32xf32> to vector<32xf32>
    %390 = vector.shape_cast %389 : vector<32xf32> to vector<1x32xf32>
    %cst_138 = arith.constant 1.000000e+00 : f32
    %391 = vector.broadcast %cst_138 : f32 to vector<1x1xf32>
    %392 = arith.addf %391, %386 : vector<1x1xf32>
    %393 = vector.broadcast %392 : vector<1x1xf32> to vector<1x32xf32>
    %394 = arith.divf %390, %393 : vector<1x32xf32>
    %c0_139 = arith.constant 0 : index
    %c0_140 = arith.constant 0 : index
    %395 = vector.load %arg6[%c0_139, %c0_140] : memref<32x32xf32, #tpu.memory_space<vmem>>, vector<32x32xf32>
    %cst_141 = arith.constant dense<0.000000e+00> : vector<1x32xf32>
    %396 = tpu.matmul %308, %395, %cst_141 {dimension_numbers = #tpu.dot_dimension_numbers<[1], [0], [0], [1], [0, 0, 1, 1], [], []>} : vector<1x32xf32>, vector<32x32xf32>, vector<1x32xf32> -> vector<1x32xf32>
    %c0_142 = arith.constant 0 : index
    %c0_143 = arith.constant 0 : index
    %397 = vector.load %arg7[%c0_142, %c0_143] : memref<1x32xf32, #tpu.memory_space<vmem>>, vector<1x32xf32>
    %398 = arith.addf %396, %397 : vector<1x32xf32>
    %c0_144 = arith.constant 0 : index
    %c0_145 = arith.constant 0 : index
    %c0_146 = arith.constant 0 : index
    %399 = vector.load %arg1[%c0_144, %c0_145, %c0_146] : memref<2x64x128xf32, #tpu.memory_space<vmem>>, vector<1x64x128xf32>
    %400 = vector.shape_cast %399 : vector<1x64x128xf32> to vector<64x128xf32>
    %c0_147 = arith.constant 0 : index
    %c0_148 = arith.constant 0 : index
    %c0_149 = arith.constant 0 : index
    %401 = vector.load %arg2[%c0_147, %c0_148, %c0_149] : memref<2x1x128xf32, #tpu.memory_space<vmem>>, vector<1x1x128xf32>
    %402 = vector.shape_cast %401 : vector<1x1x128xf32> to vector<1x128xf32>
    %403 = tpu.concatenate %394, %286 in 1 : vector<1x32xf32>, vector<1x32xf32> -> vector<1x64xf32>
    %cst_150 = arith.constant dense<0.000000e+00> : vector<1x128xf32>
    %404 = tpu.matmul %403, %400, %cst_150 {dimension_numbers = #tpu.dot_dimension_numbers<[1], [0], [0], [1], [0, 0, 1, 1], [], []>} : vector<1x64xf32>, vector<64x128xf32>, vector<1x128xf32> -> vector<1x128xf32>
    %405 = arith.addf %404, %402 : vector<1x128xf32>
    %406 = arith.negf %405 : vector<1x128xf32>
    %407 = math.exp %406 : vector<1x128xf32>
    %cst_151 = arith.constant 1.000000e+00 : f32
    %408 = vector.broadcast %cst_151 : f32 to vector<1x128xf32>
    %409 = arith.addf %408, %407 : vector<1x128xf32>
    %410 = arith.divf %408, %409 : vector<1x128xf32>
    %411 = math.tanh %405 : vector<1x128xf32>
    %412 = vector.extract_strided_slice %410 {offsets = [0, 0], sizes = [1, 32], strides = [1, 1]} : vector<1x128xf32> to vector<1x32xf32>
    %413 = vector.extract_strided_slice %410 {offsets = [0, 32], sizes = [1, 32], strides = [1, 1]} : vector<1x128xf32> to vector<1x32xf32>
    %414 = vector.extract_strided_slice %410 {offsets = [0, 96], sizes = [1, 32], strides = [1, 1]} : vector<1x128xf32> to vector<1x32xf32>
    %415 = vector.extract_strided_slice %411 {offsets = [0, 64], sizes = [1, 32], strides = [1, 1]} : vector<1x128xf32> to vector<1x32xf32>
    %416 = arith.mulf %413, %284 : vector<1x32xf32>
    %417 = arith.mulf %412, %415 : vector<1x32xf32>
    %418 = arith.addf %416, %417 : vector<1x32xf32>
    %419 = math.tanh %418 : vector<1x32xf32>
    %420 = arith.mulf %414, %419 : vector<1x32xf32>
    %c1_152 = arith.constant 1 : index
    %c0_153 = arith.constant 0 : index
    %c0_154 = arith.constant 0 : index
    %421 = vector.load %arg1[%c1_152, %c0_153, %c0_154] : memref<2x64x128xf32, #tpu.memory_space<vmem>>, vector<1x64x128xf32>
    %422 = vector.shape_cast %421 : vector<1x64x128xf32> to vector<64x128xf32>
    %c1_155 = arith.constant 1 : index
    %c0_156 = arith.constant 0 : index
    %c0_157 = arith.constant 0 : index
    %423 = vector.load %arg2[%c1_155, %c0_156, %c0_157] : memref<2x1x128xf32, #tpu.memory_space<vmem>>, vector<1x1x128xf32>
    %424 = vector.shape_cast %423 : vector<1x1x128xf32> to vector<1x128xf32>
    %425 = tpu.concatenate %420, %308 in 1 : vector<1x32xf32>, vector<1x32xf32> -> vector<1x64xf32>
    %cst_158 = arith.constant dense<0.000000e+00> : vector<1x128xf32>
    %426 = tpu.matmul %425, %422, %cst_158 {dimension_numbers = #tpu.dot_dimension_numbers<[1], [0], [0], [1], [0, 0, 1, 1], [], []>} : vector<1x64xf32>, vector<64x128xf32>, vector<1x128xf32> -> vector<1x128xf32>
    %427 = arith.addf %426, %424 : vector<1x128xf32>
    %428 = arith.negf %427 : vector<1x128xf32>
    %429 = math.exp %428 : vector<1x128xf32>
    %cst_159 = arith.constant 1.000000e+00 : f32
    %430 = vector.broadcast %cst_159 : f32 to vector<1x128xf32>
    %431 = arith.addf %430, %429 : vector<1x128xf32>
    %432 = arith.divf %430, %431 : vector<1x128xf32>
    %433 = math.tanh %427 : vector<1x128xf32>
    %434 = vector.extract_strided_slice %432 {offsets = [0, 0], sizes = [1, 32], strides = [1, 1]} : vector<1x128xf32> to vector<1x32xf32>
    %435 = vector.extract_strided_slice %432 {offsets = [0, 32], sizes = [1, 32], strides = [1, 1]} : vector<1x128xf32> to vector<1x32xf32>
    %436 = vector.extract_strided_slice %432 {offsets = [0, 96], sizes = [1, 32], strides = [1, 1]} : vector<1x128xf32> to vector<1x32xf32>
    %437 = vector.extract_strided_slice %433 {offsets = [0, 64], sizes = [1, 32], strides = [1, 1]} : vector<1x128xf32> to vector<1x32xf32>
    %438 = arith.mulf %435, %306 : vector<1x32xf32>
    %439 = arith.mulf %434, %437 : vector<1x32xf32>
    %440 = arith.addf %438, %439 : vector<1x32xf32>
    %441 = math.tanh %440 : vector<1x32xf32>
    %442 = arith.mulf %436, %441 : vector<1x32xf32>
    %c0_160 = arith.constant 0 : index
    %c0_161 = arith.constant 0 : index
    %443 = vector.load %arg3[%c0_160, %c0_161] : memref<32x4xf32, #tpu.memory_space<vmem>>, vector<32x4xf32>
    %cst_162 = arith.constant dense<0.000000e+00> : vector<1x4xf32>
    %444 = tpu.matmul %442, %443, %cst_162 {dimension_numbers = #tpu.dot_dimension_numbers<[1], [0], [0], [1], [0, 0, 1, 1], [], []>} : vector<1x32xf32>, vector<32x4xf32>, vector<1x4xf32> -> vector<1x4xf32>
    %c0_163 = arith.constant 0 : index
    %c0_164 = arith.constant 0 : index
    %445 = vector.load %arg4[%c0_163, %c0_164] : memref<1x4xf32, #tpu.memory_space<vmem>>, vector<1x4xf32>
    %446 = arith.addf %444, %445 : vector<1x4xf32>
    %cst_165 = arith.constant 5.000000e+00 : f32
    %447 = vector.broadcast %cst_165 : f32 to vector<1x4xf32>
    %448 = arith.divf %446, %447 : vector<1x4xf32>
    %449 = math.tanh %448 : vector<1x4xf32>
    %cst_166 = arith.constant 2.500000e+00 : f32
    %450 = vector.broadcast %cst_166 : f32 to vector<1x4xf32>
    %451 = arith.mulf %450, %449 : vector<1x4xf32>
    %452 = arith.divf %448, %451 : vector<1x4xf32>
    %cst_167 = arith.constant dense<0xFF800000> : vector<1xf32>
    %453 = vector.multi_reduction <maximumf>, %452, %cst_167 [1] : vector<1x4xf32> to vector<1xf32>
    %454 = vector.shape_cast %453 : vector<1xf32> to vector<1x1xf32>
    %455 = vector.broadcast %454 : vector<1x1xf32> to vector<1x4xf32>
    %456 = arith.subf %452, %455 : vector<1x4xf32>
    %457 = math.exp %456 : vector<1x4xf32>
    %cst_168 = arith.constant dense<0.000000e+00> : vector<1xf32>
    %458 = vector.multi_reduction <add>, %457, %cst_168 [1] : vector<1x4xf32> to vector<1xf32>
    %459 = vector.shape_cast %458 : vector<1xf32> to vector<1x1xf32>
    %460 = vector.broadcast %459 : vector<1x1xf32> to vector<1x4xf32>
    %461 = arith.divf %457, %460 : vector<1x4xf32>
    %462 = math.log %459 : vector<1x1xf32>
    %463 = arith.addf %454, %462 : vector<1x1xf32>
    %464 = vector.broadcast %463 : vector<1x1xf32> to vector<1x4xf32>
    %465 = arith.subf %452, %464 : vector<1x4xf32>
    %c0_169 = arith.constant 0 : index
    %c2 = arith.constant 2 : index
    %466 = vector.load %arg12[%c0_169, %c2] : memref<1x6xf32, #tpu.memory_space<vmem>>, vector<1x1xf32>
    %467 = vector.extract_strided_slice %461 {offsets = [0, 0], sizes = [1, 1], strides = [1, 1]} : vector<1x4xf32> to vector<1x1xf32>
    %468 = vector.extract_strided_slice %461 {offsets = [0, 1], sizes = [1, 1], strides = [1, 1]} : vector<1x4xf32> to vector<1x1xf32>
    %469 = arith.addf %467, %468 : vector<1x1xf32>
    %470 = vector.extract_strided_slice %461 {offsets = [0, 2], sizes = [1, 1], strides = [1, 1]} : vector<1x4xf32> to vector<1x1xf32>
    %471 = arith.addf %469, %470 : vector<1x1xf32>
    %472 = arith.cmpf oge, %466, %467 : vector<1x1xf32>
    %473 = arith.extui %472 : vector<1x1xi1> to vector<1x1xi32>
    %474 = arith.cmpf oge, %466, %469 : vector<1x1xf32>
    %475 = arith.extui %474 : vector<1x1xi1> to vector<1x1xi32>
    %476 = arith.addi %473, %475 : vector<1x1xi32>
    %477 = arith.cmpf oge, %466, %471 : vector<1x1xf32>
    %478 = arith.extui %477 : vector<1x1xi1> to vector<1x1xi32>
    %479 = arith.addi %476, %478 : vector<1x1xi32>
    %480 = vector.broadcast %479 : vector<1x1xi32> to vector<1x4xi32>
    %481 = arith.cmpi eq, %8, %480 : vector<1x4xi32>
    %482 = arith.extui %481 : vector<1x4xi1> to vector<1x4xi32>
    %483 = arith.sitofp %482 : vector<1x4xi32> to vector<1x4xf32>
    %c2_i32 = arith.constant 2 : i32
    %484 = vector.broadcast %c2_i32 : i32 to vector<1x6xi32>
    %485 = arith.cmpi eq, %9, %484 : vector<1x6xi32>
    %486 = arith.extui %485 : vector<1x6xi1> to vector<1x6xi32>
    %487 = vector.broadcast %479 : vector<1x1xi32> to vector<1x6xi32>
    %488 = arith.muli %487, %486 : vector<1x6xi32>
    %489 = arith.addi %253, %488 : vector<1x6xi32>
    %c0_170 = arith.constant 0 : index
    %c0_171 = arith.constant 0 : index
    %490 = vector.load %arg5[%c0_170, %c0_171] : memref<4x32xf32, #tpu.memory_space<vmem>>, vector<4x32xf32>
    %cst_172 = arith.constant dense<0.000000e+00> : vector<1x32xf32>
    %491 = tpu.matmul %483, %490, %cst_172 {dimension_numbers = #tpu.dot_dimension_numbers<[1], [0], [0], [1], [0, 0, 1, 1], [], []>} : vector<1x4xf32>, vector<4x32xf32>, vector<1x32xf32> -> vector<1x32xf32>
    %492 = arith.mulf %483, %465 : vector<1x4xf32>
    %cst_173 = arith.constant dense<0.000000e+00> : vector<1xf32>
    %493 = vector.multi_reduction <add>, %492, %cst_173 [1] : vector<1x4xf32> to vector<1xf32>
    %494 = vector.shape_cast %493 : vector<1xf32> to vector<1x1xf32>
    %cst_174 = arith.constant 0.000000e+00 : f32
    %495 = vector.broadcast %cst_174 : f32 to vector<1x1xf32>
    %496 = arith.subf %495, %494 : vector<1x1xf32>
    %497 = arith.addf %369, %496 : vector<1x1xf32>
    %498 = math.exp %496 : vector<1x1xf32>
    %499 = arith.mulf %496, %498 : vector<1x1xf32>
    %500 = arith.addf %372, %499 : vector<1x1xf32>
    %c0_175 = arith.constant 0 : index
    %c0_176 = arith.constant 0 : index
    %c0_177 = arith.constant 0 : index
    %501 = vector.load %arg1[%c0_175, %c0_176, %c0_177] : memref<2x64x128xf32, #tpu.memory_space<vmem>>, vector<1x64x128xf32>
    %502 = vector.shape_cast %501 : vector<1x64x128xf32> to vector<64x128xf32>
    %c0_178 = arith.constant 0 : index
    %c0_179 = arith.constant 0 : index
    %c0_180 = arith.constant 0 : index
    %503 = vector.load %arg2[%c0_178, %c0_179, %c0_180] : memref<2x1x128xf32, #tpu.memory_space<vmem>>, vector<1x1x128xf32>
    %504 = vector.shape_cast %503 : vector<1x1x128xf32> to vector<1x128xf32>
    %505 = tpu.concatenate %491, %420 in 1 : vector<1x32xf32>, vector<1x32xf32> -> vector<1x64xf32>
    %cst_181 = arith.constant dense<0.000000e+00> : vector<1x128xf32>
    %506 = tpu.matmul %505, %502, %cst_181 {dimension_numbers = #tpu.dot_dimension_numbers<[1], [0], [0], [1], [0, 0, 1, 1], [], []>} : vector<1x64xf32>, vector<64x128xf32>, vector<1x128xf32> -> vector<1x128xf32>
    %507 = arith.addf %506, %504 : vector<1x128xf32>
    %508 = arith.negf %507 : vector<1x128xf32>
    %509 = math.exp %508 : vector<1x128xf32>
    %cst_182 = arith.constant 1.000000e+00 : f32
    %510 = vector.broadcast %cst_182 : f32 to vector<1x128xf32>
    %511 = arith.addf %510, %509 : vector<1x128xf32>
    %512 = arith.divf %510, %511 : vector<1x128xf32>
    %513 = math.tanh %507 : vector<1x128xf32>
    %514 = vector.extract_strided_slice %512 {offsets = [0, 0], sizes = [1, 32], strides = [1, 1]} : vector<1x128xf32> to vector<1x32xf32>
    %515 = vector.extract_strided_slice %512 {offsets = [0, 32], sizes = [1, 32], strides = [1, 1]} : vector<1x128xf32> to vector<1x32xf32>
    %516 = vector.extract_strided_slice %512 {offsets = [0, 96], sizes = [1, 32], strides = [1, 1]} : vector<1x128xf32> to vector<1x32xf32>
    %517 = vector.extract_strided_slice %513 {offsets = [0, 64], sizes = [1, 32], strides = [1, 1]} : vector<1x128xf32> to vector<1x32xf32>
    %518 = arith.mulf %515, %418 : vector<1x32xf32>
    %519 = arith.mulf %514, %517 : vector<1x32xf32>
    %520 = arith.addf %518, %519 : vector<1x32xf32>
    %521 = math.tanh %520 : vector<1x32xf32>
    %522 = arith.mulf %516, %521 : vector<1x32xf32>
    %c1_183 = arith.constant 1 : index
    %c0_184 = arith.constant 0 : index
    %c0_185 = arith.constant 0 : index
    %523 = vector.load %arg1[%c1_183, %c0_184, %c0_185] : memref<2x64x128xf32, #tpu.memory_space<vmem>>, vector<1x64x128xf32>
    %524 = vector.shape_cast %523 : vector<1x64x128xf32> to vector<64x128xf32>
    %c1_186 = arith.constant 1 : index
    %c0_187 = arith.constant 0 : index
    %c0_188 = arith.constant 0 : index
    %525 = vector.load %arg2[%c1_186, %c0_187, %c0_188] : memref<2x1x128xf32, #tpu.memory_space<vmem>>, vector<1x1x128xf32>
    %526 = vector.shape_cast %525 : vector<1x1x128xf32> to vector<1x128xf32>
    %527 = tpu.concatenate %522, %442 in 1 : vector<1x32xf32>, vector<1x32xf32> -> vector<1x64xf32>
    %cst_189 = arith.constant dense<0.000000e+00> : vector<1x128xf32>
    %528 = tpu.matmul %527, %524, %cst_189 {dimension_numbers = #tpu.dot_dimension_numbers<[1], [0], [0], [1], [0, 0, 1, 1], [], []>} : vector<1x64xf32>, vector<64x128xf32>, vector<1x128xf32> -> vector<1x128xf32>
    %529 = arith.addf %528, %526 : vector<1x128xf32>
    %530 = arith.negf %529 : vector<1x128xf32>
    %531 = math.exp %530 : vector<1x128xf32>
    %cst_190 = arith.constant 1.000000e+00 : f32
    %532 = vector.broadcast %cst_190 : f32 to vector<1x128xf32>
    %533 = arith.addf %532, %531 : vector<1x128xf32>
    %534 = arith.divf %532, %533 : vector<1x128xf32>
    %535 = math.tanh %529 : vector<1x128xf32>
    %536 = vector.extract_strided_slice %534 {offsets = [0, 0], sizes = [1, 32], strides = [1, 1]} : vector<1x128xf32> to vector<1x32xf32>
    %537 = vector.extract_strided_slice %534 {offsets = [0, 32], sizes = [1, 32], strides = [1, 1]} : vector<1x128xf32> to vector<1x32xf32>
    %538 = vector.extract_strided_slice %534 {offsets = [0, 96], sizes = [1, 32], strides = [1, 1]} : vector<1x128xf32> to vector<1x32xf32>
    %539 = vector.extract_strided_slice %535 {offsets = [0, 64], sizes = [1, 32], strides = [1, 1]} : vector<1x128xf32> to vector<1x32xf32>
    %540 = arith.mulf %537, %440 : vector<1x32xf32>
    %541 = arith.mulf %536, %539 : vector<1x32xf32>
    %542 = arith.addf %540, %541 : vector<1x32xf32>
    %543 = math.tanh %542 : vector<1x32xf32>
    %544 = arith.mulf %538, %543 : vector<1x32xf32>
    %545 = tpu.concatenate %157, %308 in 0 : vector<1x32xf32>, vector<1x32xf32> -> vector<2x32xf32>
    %546 = tpu.concatenate %162, %398 in 0 : vector<1x32xf32>, vector<1x32xf32> -> vector<2x32xf32>
    %c0_191 = arith.constant 0 : index
    %c0_192 = arith.constant 0 : index
    %547 = vector.load %arg8[%c0_191, %c0_192] : memref<32x32xf32, #tpu.memory_space<vmem>>, vector<32x32xf32>
    %cst_193 = arith.constant dense<0.000000e+00> : vector<1x32xf32>
    %548 = tpu.matmul %544, %547, %cst_193 {dimension_numbers = #tpu.dot_dimension_numbers<[1], [0], [0], [1], [0, 0, 1, 1], [], []>} : vector<1x32xf32>, vector<32x32xf32>, vector<1x32xf32> -> vector<1x32xf32>
    %c0_194 = arith.constant 0 : index
    %c0_195 = arith.constant 0 : index
    %549 = vector.load %arg9[%c0_194, %c0_195] : memref<1x32xf32, #tpu.memory_space<vmem>>, vector<1x32xf32>
    %550 = arith.addf %548, %549 : vector<1x32xf32>
    %551 = vector.broadcast %550 : vector<1x32xf32> to vector<2x32xf32>
    %552 = arith.addf %551, %546 : vector<2x32xf32>
    %553 = math.tanh %552 : vector<2x32xf32>
    %c0_196 = arith.constant 0 : index
    %c0_197 = arith.constant 0 : index
    %554 = vector.load %arg10[%c0_196, %c0_197] : memref<32x1xf32, #tpu.memory_space<vmem>>, vector<32x1xf32>
    %cst_198 = arith.constant dense<0.000000e+00> : vector<2x1xf32>
    %555 = tpu.matmul %553, %554, %cst_198 {dimension_numbers = #tpu.dot_dimension_numbers<[1], [0], [0], [1], [0, 0, 1, 1], [], []>} : vector<2x32xf32>, vector<32x1xf32>, vector<2x1xf32> -> vector<2x1xf32>
    %c0_199 = arith.constant 0 : index
    %c0_200 = arith.constant 0 : index
    %556 = vector.load %arg11[%c0_199, %c0_200] : memref<1x1xf32, #tpu.memory_space<vmem>>, vector<1x1xf32>
    %557 = vector.broadcast %556 : vector<1x1xf32> to vector<2x1xf32>
    %558 = arith.addf %555, %557 : vector<2x1xf32>
    %cst_201 = arith.constant 5.000000e+00 : f32
    %559 = vector.broadcast %cst_201 : f32 to vector<2x1xf32>
    %560 = arith.divf %558, %559 : vector<2x1xf32>
    %561 = math.tanh %560 : vector<2x1xf32>
    %cst_202 = arith.constant 2.500000e+00 : f32
    %562 = vector.broadcast %cst_202 : f32 to vector<2x1xf32>
    %563 = arith.mulf %562, %561 : vector<2x1xf32>
    %564 = arith.divf %560, %563 : vector<2x1xf32>
    %565 = arith.negf %564 : vector<2x1xf32>
    %566 = math.exp %565 : vector<2x1xf32>
    %cst_203 = arith.constant 1.000000e+00 : f32
    %567 = vector.broadcast %cst_203 : f32 to vector<2x1xf32>
    %568 = arith.addf %567, %566 : vector<2x1xf32>
    %569 = arith.divf %567, %568 : vector<2x1xf32>
    %570 = arith.negf %564 : vector<2x1xf32>
    %571 = math.exp %570 : vector<2x1xf32>
    %cst_204 = arith.constant 1.000000e+00 : f32
    %572 = vector.broadcast %cst_204 : f32 to vector<2x1xf32>
    %573 = arith.addf %572, %571 : vector<2x1xf32>
    %574 = arith.divf %572, %573 : vector<2x1xf32>
    %575 = arith.addf %569, %574 : vector<2x1xf32>
    %576 = arith.divf %569, %575 : vector<2x1xf32>
    %c0_205 = arith.constant 0 : index
    %c2_206 = arith.constant 2 : index
    %577 = vector.load %arg13[%c0_205, %c2_206] : memref<6x6xf32, #tpu.memory_space<vmem>>, vector<2x1xf32>
    %578 = arith.cmpf oge, %577, %576 : vector<2x1xf32>
    %579 = arith.extui %578 : vector<2x1xi1> to vector<2x1xi32>
    %580 = arith.sitofp %579 : vector<2x1xi32> to vector<2x1xf32>
    %c2_i32_207 = arith.constant 2 : i32
    %581 = vector.broadcast %c2_i32_207 : i32 to vector<1x6xi32>
    %582 = arith.cmpi eq, %9, %581 : vector<1x6xi32>
    %583 = arith.extui %582 : vector<1x6xi1> to vector<1x6xi32>
    %584 = arith.sitofp %583 : vector<1x6xi32> to vector<1x6xf32>
    %cst_208 = arith.constant 0.000000e+00 : f32
    %585 = vector.broadcast %cst_208 : f32 to vector<4x1xf32>
    %586 = tpu.concatenate %580, %585 in 0 : vector<2x1xf32>, vector<4x1xf32> -> vector<6x1xf32>
    %587 = vector.broadcast %586 : vector<6x1xf32> to vector<6x6xf32>
    %588 = vector.broadcast %584 : vector<1x6xf32> to vector<6x6xf32>
    %589 = arith.mulf %587, %588 : vector<6x6xf32>
    %590 = arith.addf %350, %589 : vector<6x6xf32>
    %591 = arith.maximumf %564, %564 : vector<2x1xf32>
    %592 = arith.subf %564, %591 : vector<2x1xf32>
    %593 = math.exp %592 : vector<2x1xf32>
    %594 = arith.subf %564, %591 : vector<2x1xf32>
    %595 = math.exp %594 : vector<2x1xf32>
    %596 = arith.addf %593, %595 : vector<2x1xf32>
    %597 = math.log %596 : vector<2x1xf32>
    %598 = arith.addf %591, %597 : vector<2x1xf32>
    %cst_209 = arith.constant 5.000000e-01 : f32
    %599 = vector.broadcast %cst_209 : f32 to vector<2x1xf32>
    %600 = arith.cmpf ogt, %580, %599 : vector<2x1xf32>
    %601 = arith.select %600, %564, %564 : vector<2x1xi1>, vector<2x1xf32>
    %602 = arith.subf %601, %598 : vector<2x1xf32>
    %cst_210 = arith.constant dense<0.000000e+00> : vector<1xf32>
    %603 = vector.multi_reduction <add>, %602, %cst_210 [0] : vector<2x1xf32> to vector<1xf32>
    %604 = vector.shape_cast %603 : vector<1xf32> to vector<1x1xf32>
    %cst_211 = arith.constant 0.000000e+00 : f32
    %605 = vector.broadcast %cst_211 : f32 to vector<1x1xf32>
    %606 = arith.subf %605, %604 : vector<1x1xf32>
    %cst_212 = arith.constant 5.000000e-01 : f32
    %607 = vector.broadcast %cst_212 : f32 to vector<1x1xf32>
    %608 = arith.mulf %606, %607 : vector<1x1xf32>
    %609 = arith.addf %497, %608 : vector<1x1xf32>
    %610 = math.exp %608 : vector<1x1xf32>
    %611 = arith.mulf %608, %610 : vector<1x1xf32>
    %612 = arith.addf %500, %611 : vector<1x1xf32>
    %cst_213 = arith.constant 1.66666663 : f32
    %613 = vector.broadcast %cst_213 : f32 to vector<2x1xf32>
    %614 = arith.mulf %569, %613 : vector<2x1xf32>
    %615 = math.log %614 : vector<2x1xf32>
    %616 = arith.mulf %569, %615 : vector<2x1xf32>
    %cst_214 = arith.constant 2.500000e+00 : f32
    %617 = vector.broadcast %cst_214 : f32 to vector<2x1xf32>
    %618 = arith.mulf %574, %617 : vector<2x1xf32>
    %619 = math.log %618 : vector<2x1xf32>
    %620 = arith.mulf %574, %619 : vector<2x1xf32>
    %621 = arith.addf %616, %620 : vector<2x1xf32>
    %cst_215 = arith.constant dense<0.000000e+00> : vector<1xf32>
    %622 = vector.multi_reduction <add>, %621, %cst_215 [0] : vector<2x1xf32> to vector<1xf32>
    %623 = vector.shape_cast %622 : vector<1xf32> to vector<1x1xf32>
    %624 = arith.addf %384, %623 : vector<1x1xf32>
    %cst_216 = arith.constant dense<0.000000e+00> : vector<1xf32>
    %625 = vector.multi_reduction <add>, %580, %cst_216 [0] : vector<2x1xf32> to vector<1xf32>
    %626 = vector.shape_cast %625 : vector<1xf32> to vector<1x1xf32>
    %627 = vector.broadcast %580 : vector<2x1xf32> to vector<2x32xf32>
    %628 = arith.mulf %627, %545 : vector<2x32xf32>
    %cst_217 = arith.constant dense<0.000000e+00> : vector<32xf32>
    %629 = vector.multi_reduction <add>, %628, %cst_217 [0] : vector<2x32xf32> to vector<32xf32>
    %630 = vector.shape_cast %629 : vector<32xf32> to vector<1x32xf32>
    %cst_218 = arith.constant 1.000000e+00 : f32
    %631 = vector.broadcast %cst_218 : f32 to vector<1x1xf32>
    %632 = arith.addf %631, %626 : vector<1x1xf32>
    %633 = vector.broadcast %632 : vector<1x1xf32> to vector<1x32xf32>
    %634 = arith.divf %630, %633 : vector<1x32xf32>
    %c0_219 = arith.constant 0 : index
    %c0_220 = arith.constant 0 : index
    %635 = vector.load %arg6[%c0_219, %c0_220] : memref<32x32xf32, #tpu.memory_space<vmem>>, vector<32x32xf32>
    %cst_221 = arith.constant dense<0.000000e+00> : vector<1x32xf32>
    %636 = tpu.matmul %544, %635, %cst_221 {dimension_numbers = #tpu.dot_dimension_numbers<[1], [0], [0], [1], [0, 0, 1, 1], [], []>} : vector<1x32xf32>, vector<32x32xf32>, vector<1x32xf32> -> vector<1x32xf32>
    %c0_222 = arith.constant 0 : index
    %c0_223 = arith.constant 0 : index
    %637 = vector.load %arg7[%c0_222, %c0_223] : memref<1x32xf32, #tpu.memory_space<vmem>>, vector<1x32xf32>
    %638 = arith.addf %636, %637 : vector<1x32xf32>
    %c0_224 = arith.constant 0 : index
    %c0_225 = arith.constant 0 : index
    %c0_226 = arith.constant 0 : index
    %639 = vector.load %arg1[%c0_224, %c0_225, %c0_226] : memref<2x64x128xf32, #tpu.memory_space<vmem>>, vector<1x64x128xf32>
    %640 = vector.shape_cast %639 : vector<1x64x128xf32> to vector<64x128xf32>
    %c0_227 = arith.constant 0 : index
    %c0_228 = arith.constant 0 : index
    %c0_229 = arith.constant 0 : index
    %641 = vector.load %arg2[%c0_227, %c0_228, %c0_229] : memref<2x1x128xf32, #tpu.memory_space<vmem>>, vector<1x1x128xf32>
    %642 = vector.shape_cast %641 : vector<1x1x128xf32> to vector<1x128xf32>
    %643 = tpu.concatenate %634, %522 in 1 : vector<1x32xf32>, vector<1x32xf32> -> vector<1x64xf32>
    %cst_230 = arith.constant dense<0.000000e+00> : vector<1x128xf32>
    %644 = tpu.matmul %643, %640, %cst_230 {dimension_numbers = #tpu.dot_dimension_numbers<[1], [0], [0], [1], [0, 0, 1, 1], [], []>} : vector<1x64xf32>, vector<64x128xf32>, vector<1x128xf32> -> vector<1x128xf32>
    %645 = arith.addf %644, %642 : vector<1x128xf32>
    %646 = arith.negf %645 : vector<1x128xf32>
    %647 = math.exp %646 : vector<1x128xf32>
    %cst_231 = arith.constant 1.000000e+00 : f32
    %648 = vector.broadcast %cst_231 : f32 to vector<1x128xf32>
    %649 = arith.addf %648, %647 : vector<1x128xf32>
    %650 = arith.divf %648, %649 : vector<1x128xf32>
    %651 = math.tanh %645 : vector<1x128xf32>
    %652 = vector.extract_strided_slice %650 {offsets = [0, 0], sizes = [1, 32], strides = [1, 1]} : vector<1x128xf32> to vector<1x32xf32>
    %653 = vector.extract_strided_slice %650 {offsets = [0, 32], sizes = [1, 32], strides = [1, 1]} : vector<1x128xf32> to vector<1x32xf32>
    %654 = vector.extract_strided_slice %650 {offsets = [0, 96], sizes = [1, 32], strides = [1, 1]} : vector<1x128xf32> to vector<1x32xf32>
    %655 = vector.extract_strided_slice %651 {offsets = [0, 64], sizes = [1, 32], strides = [1, 1]} : vector<1x128xf32> to vector<1x32xf32>
    %656 = arith.mulf %653, %520 : vector<1x32xf32>
    %657 = arith.mulf %652, %655 : vector<1x32xf32>
    %658 = arith.addf %656, %657 : vector<1x32xf32>
    %659 = math.tanh %658 : vector<1x32xf32>
    %660 = arith.mulf %654, %659 : vector<1x32xf32>
    %c1_232 = arith.constant 1 : index
    %c0_233 = arith.constant 0 : index
    %c0_234 = arith.constant 0 : index
    %661 = vector.load %arg1[%c1_232, %c0_233, %c0_234] : memref<2x64x128xf32, #tpu.memory_space<vmem>>, vector<1x64x128xf32>
    %662 = vector.shape_cast %661 : vector<1x64x128xf32> to vector<64x128xf32>
    %c1_235 = arith.constant 1 : index
    %c0_236 = arith.constant 0 : index
    %c0_237 = arith.constant 0 : index
    %663 = vector.load %arg2[%c1_235, %c0_236, %c0_237] : memref<2x1x128xf32, #tpu.memory_space<vmem>>, vector<1x1x128xf32>
    %664 = vector.shape_cast %663 : vector<1x1x128xf32> to vector<1x128xf32>
    %665 = tpu.concatenate %660, %544 in 1 : vector<1x32xf32>, vector<1x32xf32> -> vector<1x64xf32>
    %cst_238 = arith.constant dense<0.000000e+00> : vector<1x128xf32>
    %666 = tpu.matmul %665, %662, %cst_238 {dimension_numbers = #tpu.dot_dimension_numbers<[1], [0], [0], [1], [0, 0, 1, 1], [], []>} : vector<1x64xf32>, vector<64x128xf32>, vector<1x128xf32> -> vector<1x128xf32>
    %667 = arith.addf %666, %664 : vector<1x128xf32>
    %668 = arith.negf %667 : vector<1x128xf32>
    %669 = math.exp %668 : vector<1x128xf32>
    %cst_239 = arith.constant 1.000000e+00 : f32
    %670 = vector.broadcast %cst_239 : f32 to vector<1x128xf32>
    %671 = arith.addf %670, %669 : vector<1x128xf32>
    %672 = arith.divf %670, %671 : vector<1x128xf32>
    %673 = math.tanh %667 : vector<1x128xf32>
    %674 = vector.extract_strided_slice %672 {offsets = [0, 0], sizes = [1, 32], strides = [1, 1]} : vector<1x128xf32> to vector<1x32xf32>
    %675 = vector.extract_strided_slice %672 {offsets = [0, 32], sizes = [1, 32], strides = [1, 1]} : vector<1x128xf32> to vector<1x32xf32>
    %676 = vector.extract_strided_slice %672 {offsets = [0, 96], sizes = [1, 32], strides = [1, 1]} : vector<1x128xf32> to vector<1x32xf32>
    %677 = vector.extract_strided_slice %673 {offsets = [0, 64], sizes = [1, 32], strides = [1, 1]} : vector<1x128xf32> to vector<1x32xf32>
    %678 = arith.mulf %675, %542 : vector<1x32xf32>
    %679 = arith.mulf %674, %677 : vector<1x32xf32>
    %680 = arith.addf %678, %679 : vector<1x32xf32>
    %681 = math.tanh %680 : vector<1x32xf32>
    %682 = arith.mulf %676, %681 : vector<1x32xf32>
    %c0_240 = arith.constant 0 : index
    %c0_241 = arith.constant 0 : index
    %683 = vector.load %arg3[%c0_240, %c0_241] : memref<32x4xf32, #tpu.memory_space<vmem>>, vector<32x4xf32>
    %cst_242 = arith.constant dense<0.000000e+00> : vector<1x4xf32>
    %684 = tpu.matmul %682, %683, %cst_242 {dimension_numbers = #tpu.dot_dimension_numbers<[1], [0], [0], [1], [0, 0, 1, 1], [], []>} : vector<1x32xf32>, vector<32x4xf32>, vector<1x4xf32> -> vector<1x4xf32>
    %c0_243 = arith.constant 0 : index
    %c0_244 = arith.constant 0 : index
    %685 = vector.load %arg4[%c0_243, %c0_244] : memref<1x4xf32, #tpu.memory_space<vmem>>, vector<1x4xf32>
    %686 = arith.addf %684, %685 : vector<1x4xf32>
    %cst_245 = arith.constant 5.000000e+00 : f32
    %687 = vector.broadcast %cst_245 : f32 to vector<1x4xf32>
    %688 = arith.divf %686, %687 : vector<1x4xf32>
    %689 = math.tanh %688 : vector<1x4xf32>
    %cst_246 = arith.constant 2.500000e+00 : f32
    %690 = vector.broadcast %cst_246 : f32 to vector<1x4xf32>
    %691 = arith.mulf %690, %689 : vector<1x4xf32>
    %692 = arith.divf %688, %691 : vector<1x4xf32>
    %cst_247 = arith.constant dense<0xFF800000> : vector<1xf32>
    %693 = vector.multi_reduction <maximumf>, %692, %cst_247 [1] : vector<1x4xf32> to vector<1xf32>
    %694 = vector.shape_cast %693 : vector<1xf32> to vector<1x1xf32>
    %695 = vector.broadcast %694 : vector<1x1xf32> to vector<1x4xf32>
    %696 = arith.subf %692, %695 : vector<1x4xf32>
    %697 = math.exp %696 : vector<1x4xf32>
    %cst_248 = arith.constant dense<0.000000e+00> : vector<1xf32>
    %698 = vector.multi_reduction <add>, %697, %cst_248 [1] : vector<1x4xf32> to vector<1xf32>
    %699 = vector.shape_cast %698 : vector<1xf32> to vector<1x1xf32>
    %700 = vector.broadcast %699 : vector<1x1xf32> to vector<1x4xf32>
    %701 = arith.divf %697, %700 : vector<1x4xf32>
    %702 = math.log %699 : vector<1x1xf32>
    %703 = arith.addf %694, %702 : vector<1x1xf32>
    %704 = vector.broadcast %703 : vector<1x1xf32> to vector<1x4xf32>
    %705 = arith.subf %692, %704 : vector<1x4xf32>
    %c0_249 = arith.constant 0 : index
    %c3 = arith.constant 3 : index
    %706 = vector.load %arg12[%c0_249, %c3] : memref<1x6xf32, #tpu.memory_space<vmem>>, vector<1x1xf32>
    %707 = vector.extract_strided_slice %701 {offsets = [0, 0], sizes = [1, 1], strides = [1, 1]} : vector<1x4xf32> to vector<1x1xf32>
    %708 = vector.extract_strided_slice %701 {offsets = [0, 1], sizes = [1, 1], strides = [1, 1]} : vector<1x4xf32> to vector<1x1xf32>
    %709 = arith.addf %707, %708 : vector<1x1xf32>
    %710 = vector.extract_strided_slice %701 {offsets = [0, 2], sizes = [1, 1], strides = [1, 1]} : vector<1x4xf32> to vector<1x1xf32>
    %711 = arith.addf %709, %710 : vector<1x1xf32>
    %712 = arith.cmpf oge, %706, %707 : vector<1x1xf32>
    %713 = arith.extui %712 : vector<1x1xi1> to vector<1x1xi32>
    %714 = arith.cmpf oge, %706, %709 : vector<1x1xf32>
    %715 = arith.extui %714 : vector<1x1xi1> to vector<1x1xi32>
    %716 = arith.addi %713, %715 : vector<1x1xi32>
    %717 = arith.cmpf oge, %706, %711 : vector<1x1xf32>
    %718 = arith.extui %717 : vector<1x1xi1> to vector<1x1xi32>
    %719 = arith.addi %716, %718 : vector<1x1xi32>
    %720 = vector.broadcast %719 : vector<1x1xi32> to vector<1x4xi32>
    %721 = arith.cmpi eq, %8, %720 : vector<1x4xi32>
    %722 = arith.extui %721 : vector<1x4xi1> to vector<1x4xi32>
    %723 = arith.sitofp %722 : vector<1x4xi32> to vector<1x4xf32>
    %c3_i32 = arith.constant 3 : i32
    %724 = vector.broadcast %c3_i32 : i32 to vector<1x6xi32>
    %725 = arith.cmpi eq, %9, %724 : vector<1x6xi32>
    %726 = arith.extui %725 : vector<1x6xi1> to vector<1x6xi32>
    %727 = vector.broadcast %719 : vector<1x1xi32> to vector<1x6xi32>
    %728 = arith.muli %727, %726 : vector<1x6xi32>
    %729 = arith.addi %489, %728 : vector<1x6xi32>
    %c0_250 = arith.constant 0 : index
    %c0_251 = arith.constant 0 : index
    %730 = vector.load %arg5[%c0_250, %c0_251] : memref<4x32xf32, #tpu.memory_space<vmem>>, vector<4x32xf32>
    %cst_252 = arith.constant dense<0.000000e+00> : vector<1x32xf32>
    %731 = tpu.matmul %723, %730, %cst_252 {dimension_numbers = #tpu.dot_dimension_numbers<[1], [0], [0], [1], [0, 0, 1, 1], [], []>} : vector<1x4xf32>, vector<4x32xf32>, vector<1x32xf32> -> vector<1x32xf32>
    %732 = arith.mulf %723, %705 : vector<1x4xf32>
    %cst_253 = arith.constant dense<0.000000e+00> : vector<1xf32>
    %733 = vector.multi_reduction <add>, %732, %cst_253 [1] : vector<1x4xf32> to vector<1xf32>
    %734 = vector.shape_cast %733 : vector<1xf32> to vector<1x1xf32>
    %cst_254 = arith.constant 0.000000e+00 : f32
    %735 = vector.broadcast %cst_254 : f32 to vector<1x1xf32>
    %736 = arith.subf %735, %734 : vector<1x1xf32>
    %737 = arith.addf %609, %736 : vector<1x1xf32>
    %738 = math.exp %736 : vector<1x1xf32>
    %739 = arith.mulf %736, %738 : vector<1x1xf32>
    %740 = arith.addf %612, %739 : vector<1x1xf32>
    %c0_255 = arith.constant 0 : index
    %c0_256 = arith.constant 0 : index
    %c0_257 = arith.constant 0 : index
    %741 = vector.load %arg1[%c0_255, %c0_256, %c0_257] : memref<2x64x128xf32, #tpu.memory_space<vmem>>, vector<1x64x128xf32>
    %742 = vector.shape_cast %741 : vector<1x64x128xf32> to vector<64x128xf32>
    %c0_258 = arith.constant 0 : index
    %c0_259 = arith.constant 0 : index
    %c0_260 = arith.constant 0 : index
    %743 = vector.load %arg2[%c0_258, %c0_259, %c0_260] : memref<2x1x128xf32, #tpu.memory_space<vmem>>, vector<1x1x128xf32>
    %744 = vector.shape_cast %743 : vector<1x1x128xf32> to vector<1x128xf32>
    %745 = tpu.concatenate %731, %660 in 1 : vector<1x32xf32>, vector<1x32xf32> -> vector<1x64xf32>
    %cst_261 = arith.constant dense<0.000000e+00> : vector<1x128xf32>
    %746 = tpu.matmul %745, %742, %cst_261 {dimension_numbers = #tpu.dot_dimension_numbers<[1], [0], [0], [1], [0, 0, 1, 1], [], []>} : vector<1x64xf32>, vector<64x128xf32>, vector<1x128xf32> -> vector<1x128xf32>
    %747 = arith.addf %746, %744 : vector<1x128xf32>
    %748 = arith.negf %747 : vector<1x128xf32>
    %749 = math.exp %748 : vector<1x128xf32>
    %cst_262 = arith.constant 1.000000e+00 : f32
    %750 = vector.broadcast %cst_262 : f32 to vector<1x128xf32>
    %751 = arith.addf %750, %749 : vector<1x128xf32>
    %752 = arith.divf %750, %751 : vector<1x128xf32>
    %753 = math.tanh %747 : vector<1x128xf32>
    %754 = vector.extract_strided_slice %752 {offsets = [0, 0], sizes = [1, 32], strides = [1, 1]} : vector<1x128xf32> to vector<1x32xf32>
    %755 = vector.extract_strided_slice %752 {offsets = [0, 32], sizes = [1, 32], strides = [1, 1]} : vector<1x128xf32> to vector<1x32xf32>
    %756 = vector.extract_strided_slice %752 {offsets = [0, 96], sizes = [1, 32], strides = [1, 1]} : vector<1x128xf32> to vector<1x32xf32>
    %757 = vector.extract_strided_slice %753 {offsets = [0, 64], sizes = [1, 32], strides = [1, 1]} : vector<1x128xf32> to vector<1x32xf32>
    %758 = arith.mulf %755, %658 : vector<1x32xf32>
    %759 = arith.mulf %754, %757 : vector<1x32xf32>
    %760 = arith.addf %758, %759 : vector<1x32xf32>
    %761 = math.tanh %760 : vector<1x32xf32>
    %762 = arith.mulf %756, %761 : vector<1x32xf32>
    %c1_263 = arith.constant 1 : index
    %c0_264 = arith.constant 0 : index
    %c0_265 = arith.constant 0 : index
    %763 = vector.load %arg1[%c1_263, %c0_264, %c0_265] : memref<2x64x128xf32, #tpu.memory_space<vmem>>, vector<1x64x128xf32>
    %764 = vector.shape_cast %763 : vector<1x64x128xf32> to vector<64x128xf32>
    %c1_266 = arith.constant 1 : index
    %c0_267 = arith.constant 0 : index
    %c0_268 = arith.constant 0 : index
    %765 = vector.load %arg2[%c1_266, %c0_267, %c0_268] : memref<2x1x128xf32, #tpu.memory_space<vmem>>, vector<1x1x128xf32>
    %766 = vector.shape_cast %765 : vector<1x1x128xf32> to vector<1x128xf32>
    %767 = tpu.concatenate %762, %682 in 1 : vector<1x32xf32>, vector<1x32xf32> -> vector<1x64xf32>
    %cst_269 = arith.constant dense<0.000000e+00> : vector<1x128xf32>
    %768 = tpu.matmul %767, %764, %cst_269 {dimension_numbers = #tpu.dot_dimension_numbers<[1], [0], [0], [1], [0, 0, 1, 1], [], []>} : vector<1x64xf32>, vector<64x128xf32>, vector<1x128xf32> -> vector<1x128xf32>
    %769 = arith.addf %768, %766 : vector<1x128xf32>
    %770 = arith.negf %769 : vector<1x128xf32>
    %771 = math.exp %770 : vector<1x128xf32>
    %cst_270 = arith.constant 1.000000e+00 : f32
    %772 = vector.broadcast %cst_270 : f32 to vector<1x128xf32>
    %773 = arith.addf %772, %771 : vector<1x128xf32>
    %774 = arith.divf %772, %773 : vector<1x128xf32>
    %775 = math.tanh %769 : vector<1x128xf32>
    %776 = vector.extract_strided_slice %774 {offsets = [0, 0], sizes = [1, 32], strides = [1, 1]} : vector<1x128xf32> to vector<1x32xf32>
    %777 = vector.extract_strided_slice %774 {offsets = [0, 32], sizes = [1, 32], strides = [1, 1]} : vector<1x128xf32> to vector<1x32xf32>
    %778 = vector.extract_strided_slice %774 {offsets = [0, 96], sizes = [1, 32], strides = [1, 1]} : vector<1x128xf32> to vector<1x32xf32>
    %779 = vector.extract_strided_slice %775 {offsets = [0, 64], sizes = [1, 32], strides = [1, 1]} : vector<1x128xf32> to vector<1x32xf32>
    %780 = arith.mulf %777, %680 : vector<1x32xf32>
    %781 = arith.mulf %776, %779 : vector<1x32xf32>
    %782 = arith.addf %780, %781 : vector<1x32xf32>
    %783 = math.tanh %782 : vector<1x32xf32>
    %784 = arith.mulf %778, %783 : vector<1x32xf32>
    %785 = tpu.concatenate %157, %308, %544 in 0 : vector<1x32xf32>, vector<1x32xf32>, vector<1x32xf32> -> vector<3x32xf32>
    %786 = tpu.concatenate %162, %398, %638 in 0 : vector<1x32xf32>, vector<1x32xf32>, vector<1x32xf32> -> vector<3x32xf32>
    %c0_271 = arith.constant 0 : index
    %c0_272 = arith.constant 0 : index
    %787 = vector.load %arg8[%c0_271, %c0_272] : memref<32x32xf32, #tpu.memory_space<vmem>>, vector<32x32xf32>
    %cst_273 = arith.constant dense<0.000000e+00> : vector<1x32xf32>
    %788 = tpu.matmul %784, %787, %cst_273 {dimension_numbers = #tpu.dot_dimension_numbers<[1], [0], [0], [1], [0, 0, 1, 1], [], []>} : vector<1x32xf32>, vector<32x32xf32>, vector<1x32xf32> -> vector<1x32xf32>
    %c0_274 = arith.constant 0 : index
    %c0_275 = arith.constant 0 : index
    %789 = vector.load %arg9[%c0_274, %c0_275] : memref<1x32xf32, #tpu.memory_space<vmem>>, vector<1x32xf32>
    %790 = arith.addf %788, %789 : vector<1x32xf32>
    %791 = vector.broadcast %790 : vector<1x32xf32> to vector<3x32xf32>
    %792 = arith.addf %791, %786 : vector<3x32xf32>
    %793 = math.tanh %792 : vector<3x32xf32>
    %c0_276 = arith.constant 0 : index
    %c0_277 = arith.constant 0 : index
    %794 = vector.load %arg10[%c0_276, %c0_277] : memref<32x1xf32, #tpu.memory_space<vmem>>, vector<32x1xf32>
    %cst_278 = arith.constant dense<0.000000e+00> : vector<3x1xf32>
    %795 = tpu.matmul %793, %794, %cst_278 {dimension_numbers = #tpu.dot_dimension_numbers<[1], [0], [0], [1], [0, 0, 1, 1], [], []>} : vector<3x32xf32>, vector<32x1xf32>, vector<3x1xf32> -> vector<3x1xf32>
    %c0_279 = arith.constant 0 : index
    %c0_280 = arith.constant 0 : index
    %796 = vector.load %arg11[%c0_279, %c0_280] : memref<1x1xf32, #tpu.memory_space<vmem>>, vector<1x1xf32>
    %797 = vector.broadcast %796 : vector<1x1xf32> to vector<3x1xf32>
    %798 = arith.addf %795, %797 : vector<3x1xf32>
    %cst_281 = arith.constant 5.000000e+00 : f32
    %799 = vector.broadcast %cst_281 : f32 to vector<3x1xf32>
    %800 = arith.divf %798, %799 : vector<3x1xf32>
    %801 = math.tanh %800 : vector<3x1xf32>
    %cst_282 = arith.constant 2.500000e+00 : f32
    %802 = vector.broadcast %cst_282 : f32 to vector<3x1xf32>
    %803 = arith.mulf %802, %801 : vector<3x1xf32>
    %804 = arith.divf %800, %803 : vector<3x1xf32>
    %805 = arith.negf %804 : vector<3x1xf32>
    %806 = math.exp %805 : vector<3x1xf32>
    %cst_283 = arith.constant 1.000000e+00 : f32
    %807 = vector.broadcast %cst_283 : f32 to vector<3x1xf32>
    %808 = arith.addf %807, %806 : vector<3x1xf32>
    %809 = arith.divf %807, %808 : vector<3x1xf32>
    %810 = arith.negf %804 : vector<3x1xf32>
    %811 = math.exp %810 : vector<3x1xf32>
    %cst_284 = arith.constant 1.000000e+00 : f32
    %812 = vector.broadcast %cst_284 : f32 to vector<3x1xf32>
    %813 = arith.addf %812, %811 : vector<3x1xf32>
    %814 = arith.divf %812, %813 : vector<3x1xf32>
    %815 = arith.addf %809, %814 : vector<3x1xf32>
    %816 = arith.divf %809, %815 : vector<3x1xf32>
    %c0_285 = arith.constant 0 : index
    %c3_286 = arith.constant 3 : index
    %817 = vector.load %arg13[%c0_285, %c3_286] : memref<6x6xf32, #tpu.memory_space<vmem>>, vector<3x1xf32>
    %818 = arith.cmpf oge, %817, %816 : vector<3x1xf32>
    %819 = arith.extui %818 : vector<3x1xi1> to vector<3x1xi32>
    %820 = arith.sitofp %819 : vector<3x1xi32> to vector<3x1xf32>
    %c3_i32_287 = arith.constant 3 : i32
    %821 = vector.broadcast %c3_i32_287 : i32 to vector<1x6xi32>
    %822 = arith.cmpi eq, %9, %821 : vector<1x6xi32>
    %823 = arith.extui %822 : vector<1x6xi1> to vector<1x6xi32>
    %824 = arith.sitofp %823 : vector<1x6xi32> to vector<1x6xf32>
    %cst_288 = arith.constant 0.000000e+00 : f32
    %825 = vector.broadcast %cst_288 : f32 to vector<3x1xf32>
    %826 = tpu.concatenate %820, %825 in 0 : vector<3x1xf32>, vector<3x1xf32> -> vector<6x1xf32>
    %827 = vector.broadcast %826 : vector<6x1xf32> to vector<6x6xf32>
    %828 = vector.broadcast %824 : vector<1x6xf32> to vector<6x6xf32>
    %829 = arith.mulf %827, %828 : vector<6x6xf32>
    %830 = arith.addf %590, %829 : vector<6x6xf32>
    %831 = arith.maximumf %804, %804 : vector<3x1xf32>
    %832 = arith.subf %804, %831 : vector<3x1xf32>
    %833 = math.exp %832 : vector<3x1xf32>
    %834 = arith.subf %804, %831 : vector<3x1xf32>
    %835 = math.exp %834 : vector<3x1xf32>
    %836 = arith.addf %833, %835 : vector<3x1xf32>
    %837 = math.log %836 : vector<3x1xf32>
    %838 = arith.addf %831, %837 : vector<3x1xf32>
    %cst_289 = arith.constant 5.000000e-01 : f32
    %839 = vector.broadcast %cst_289 : f32 to vector<3x1xf32>
    %840 = arith.cmpf ogt, %820, %839 : vector<3x1xf32>
    %841 = arith.select %840, %804, %804 : vector<3x1xi1>, vector<3x1xf32>
    %842 = arith.subf %841, %838 : vector<3x1xf32>
    %cst_290 = arith.constant dense<0.000000e+00> : vector<1xf32>
    %843 = vector.multi_reduction <add>, %842, %cst_290 [0] : vector<3x1xf32> to vector<1xf32>
    %844 = vector.shape_cast %843 : vector<1xf32> to vector<1x1xf32>
    %cst_291 = arith.constant 0.000000e+00 : f32
    %845 = vector.broadcast %cst_291 : f32 to vector<1x1xf32>
    %846 = arith.subf %845, %844 : vector<1x1xf32>
    %cst_292 = arith.constant 0.333333343 : f32
    %847 = vector.broadcast %cst_292 : f32 to vector<1x1xf32>
    %848 = arith.mulf %846, %847 : vector<1x1xf32>
    %849 = arith.addf %737, %848 : vector<1x1xf32>
    %850 = math.exp %848 : vector<1x1xf32>
    %851 = arith.mulf %848, %850 : vector<1x1xf32>
    %852 = arith.addf %740, %851 : vector<1x1xf32>
    %cst_293 = arith.constant 1.66666663 : f32
    %853 = vector.broadcast %cst_293 : f32 to vector<3x1xf32>
    %854 = arith.mulf %809, %853 : vector<3x1xf32>
    %855 = math.log %854 : vector<3x1xf32>
    %856 = arith.mulf %809, %855 : vector<3x1xf32>
    %cst_294 = arith.constant 2.500000e+00 : f32
    %857 = vector.broadcast %cst_294 : f32 to vector<3x1xf32>
    %858 = arith.mulf %814, %857 : vector<3x1xf32>
    %859 = math.log %858 : vector<3x1xf32>
    %860 = arith.mulf %814, %859 : vector<3x1xf32>
    %861 = arith.addf %856, %860 : vector<3x1xf32>
    %cst_295 = arith.constant dense<0.000000e+00> : vector<1xf32>
    %862 = vector.multi_reduction <add>, %861, %cst_295 [0] : vector<3x1xf32> to vector<1xf32>
    %863 = vector.shape_cast %862 : vector<1xf32> to vector<1x1xf32>
    %864 = arith.addf %624, %863 : vector<1x1xf32>
    %cst_296 = arith.constant dense<0.000000e+00> : vector<1xf32>
    %865 = vector.multi_reduction <add>, %820, %cst_296 [0] : vector<3x1xf32> to vector<1xf32>
    %866 = vector.shape_cast %865 : vector<1xf32> to vector<1x1xf32>
    %867 = vector.broadcast %820 : vector<3x1xf32> to vector<3x32xf32>
    %868 = arith.mulf %867, %785 : vector<3x32xf32>
    %cst_297 = arith.constant dense<0.000000e+00> : vector<32xf32>
    %869 = vector.multi_reduction <add>, %868, %cst_297 [0] : vector<3x32xf32> to vector<32xf32>
    %870 = vector.shape_cast %869 : vector<32xf32> to vector<1x32xf32>
    %cst_298 = arith.constant 1.000000e+00 : f32
    %871 = vector.broadcast %cst_298 : f32 to vector<1x1xf32>
    %872 = arith.addf %871, %866 : vector<1x1xf32>
    %873 = vector.broadcast %872 : vector<1x1xf32> to vector<1x32xf32>
    %874 = arith.divf %870, %873 : vector<1x32xf32>
    %c0_299 = arith.constant 0 : index
    %c0_300 = arith.constant 0 : index
    %875 = vector.load %arg6[%c0_299, %c0_300] : memref<32x32xf32, #tpu.memory_space<vmem>>, vector<32x32xf32>
    %cst_301 = arith.constant dense<0.000000e+00> : vector<1x32xf32>
    %876 = tpu.matmul %784, %875, %cst_301 {dimension_numbers = #tpu.dot_dimension_numbers<[1], [0], [0], [1], [0, 0, 1, 1], [], []>} : vector<1x32xf32>, vector<32x32xf32>, vector<1x32xf32> -> vector<1x32xf32>
    %c0_302 = arith.constant 0 : index
    %c0_303 = arith.constant 0 : index
    %877 = vector.load %arg7[%c0_302, %c0_303] : memref<1x32xf32, #tpu.memory_space<vmem>>, vector<1x32xf32>
    %878 = arith.addf %876, %877 : vector<1x32xf32>
    %c0_304 = arith.constant 0 : index
    %c0_305 = arith.constant 0 : index
    %c0_306 = arith.constant 0 : index
    %879 = vector.load %arg1[%c0_304, %c0_305, %c0_306] : memref<2x64x128xf32, #tpu.memory_space<vmem>>, vector<1x64x128xf32>
    %880 = vector.shape_cast %879 : vector<1x64x128xf32> to vector<64x128xf32>
    %c0_307 = arith.constant 0 : index
    %c0_308 = arith.constant 0 : index
    %c0_309 = arith.constant 0 : index
    %881 = vector.load %arg2[%c0_307, %c0_308, %c0_309] : memref<2x1x128xf32, #tpu.memory_space<vmem>>, vector<1x1x128xf32>
    %882 = vector.shape_cast %881 : vector<1x1x128xf32> to vector<1x128xf32>
    %883 = tpu.concatenate %874, %762 in 1 : vector<1x32xf32>, vector<1x32xf32> -> vector<1x64xf32>
    %cst_310 = arith.constant dense<0.000000e+00> : vector<1x128xf32>
    %884 = tpu.matmul %883, %880, %cst_310 {dimension_numbers = #tpu.dot_dimension_numbers<[1], [0], [0], [1], [0, 0, 1, 1], [], []>} : vector<1x64xf32>, vector<64x128xf32>, vector<1x128xf32> -> vector<1x128xf32>
    %885 = arith.addf %884, %882 : vector<1x128xf32>
    %886 = arith.negf %885 : vector<1x128xf32>
    %887 = math.exp %886 : vector<1x128xf32>
    %cst_311 = arith.constant 1.000000e+00 : f32
    %888 = vector.broadcast %cst_311 : f32 to vector<1x128xf32>
    %889 = arith.addf %888, %887 : vector<1x128xf32>
    %890 = arith.divf %888, %889 : vector<1x128xf32>
    %891 = math.tanh %885 : vector<1x128xf32>
    %892 = vector.extract_strided_slice %890 {offsets = [0, 0], sizes = [1, 32], strides = [1, 1]} : vector<1x128xf32> to vector<1x32xf32>
    %893 = vector.extract_strided_slice %890 {offsets = [0, 32], sizes = [1, 32], strides = [1, 1]} : vector<1x128xf32> to vector<1x32xf32>
    %894 = vector.extract_strided_slice %890 {offsets = [0, 96], sizes = [1, 32], strides = [1, 1]} : vector<1x128xf32> to vector<1x32xf32>
    %895 = vector.extract_strided_slice %891 {offsets = [0, 64], sizes = [1, 32], strides = [1, 1]} : vector<1x128xf32> to vector<1x32xf32>
    %896 = arith.mulf %893, %760 : vector<1x32xf32>
    %897 = arith.mulf %892, %895 : vector<1x32xf32>
    %898 = arith.addf %896, %897 : vector<1x32xf32>
    %899 = math.tanh %898 : vector<1x32xf32>
    %900 = arith.mulf %894, %899 : vector<1x32xf32>
    %c1_312 = arith.constant 1 : index
    %c0_313 = arith.constant 0 : index
    %c0_314 = arith.constant 0 : index
    %901 = vector.load %arg1[%c1_312, %c0_313, %c0_314] : memref<2x64x128xf32, #tpu.memory_space<vmem>>, vector<1x64x128xf32>
    %902 = vector.shape_cast %901 : vector<1x64x128xf32> to vector<64x128xf32>
    %c1_315 = arith.constant 1 : index
    %c0_316 = arith.constant 0 : index
    %c0_317 = arith.constant 0 : index
    %903 = vector.load %arg2[%c1_315, %c0_316, %c0_317] : memref<2x1x128xf32, #tpu.memory_space<vmem>>, vector<1x1x128xf32>
    %904 = vector.shape_cast %903 : vector<1x1x128xf32> to vector<1x128xf32>
    %905 = tpu.concatenate %900, %784 in 1 : vector<1x32xf32>, vector<1x32xf32> -> vector<1x64xf32>
    %cst_318 = arith.constant dense<0.000000e+00> : vector<1x128xf32>
    %906 = tpu.matmul %905, %902, %cst_318 {dimension_numbers = #tpu.dot_dimension_numbers<[1], [0], [0], [1], [0, 0, 1, 1], [], []>} : vector<1x64xf32>, vector<64x128xf32>, vector<1x128xf32> -> vector<1x128xf32>
    %907 = arith.addf %906, %904 : vector<1x128xf32>
    %908 = arith.negf %907 : vector<1x128xf32>
    %909 = math.exp %908 : vector<1x128xf32>
    %cst_319 = arith.constant 1.000000e+00 : f32
    %910 = vector.broadcast %cst_319 : f32 to vector<1x128xf32>
    %911 = arith.addf %910, %909 : vector<1x128xf32>
    %912 = arith.divf %910, %911 : vector<1x128xf32>
    %913 = math.tanh %907 : vector<1x128xf32>
    %914 = vector.extract_strided_slice %912 {offsets = [0, 0], sizes = [1, 32], strides = [1, 1]} : vector<1x128xf32> to vector<1x32xf32>
    %915 = vector.extract_strided_slice %912 {offsets = [0, 32], sizes = [1, 32], strides = [1, 1]} : vector<1x128xf32> to vector<1x32xf32>
    %916 = vector.extract_strided_slice %912 {offsets = [0, 96], sizes = [1, 32], strides = [1, 1]} : vector<1x128xf32> to vector<1x32xf32>
    %917 = vector.extract_strided_slice %913 {offsets = [0, 64], sizes = [1, 32], strides = [1, 1]} : vector<1x128xf32> to vector<1x32xf32>
    %918 = arith.mulf %915, %782 : vector<1x32xf32>
    %919 = arith.mulf %914, %917 : vector<1x32xf32>
    %920 = arith.addf %918, %919 : vector<1x32xf32>
    %921 = math.tanh %920 : vector<1x32xf32>
    %922 = arith.mulf %916, %921 : vector<1x32xf32>
    %c0_320 = arith.constant 0 : index
    %c0_321 = arith.constant 0 : index
    %923 = vector.load %arg3[%c0_320, %c0_321] : memref<32x4xf32, #tpu.memory_space<vmem>>, vector<32x4xf32>
    %cst_322 = arith.constant dense<0.000000e+00> : vector<1x4xf32>
    %924 = tpu.matmul %922, %923, %cst_322 {dimension_numbers = #tpu.dot_dimension_numbers<[1], [0], [0], [1], [0, 0, 1, 1], [], []>} : vector<1x32xf32>, vector<32x4xf32>, vector<1x4xf32> -> vector<1x4xf32>
    %c0_323 = arith.constant 0 : index
    %c0_324 = arith.constant 0 : index
    %925 = vector.load %arg4[%c0_323, %c0_324] : memref<1x4xf32, #tpu.memory_space<vmem>>, vector<1x4xf32>
    %926 = arith.addf %924, %925 : vector<1x4xf32>
    %cst_325 = arith.constant 5.000000e+00 : f32
    %927 = vector.broadcast %cst_325 : f32 to vector<1x4xf32>
    %928 = arith.divf %926, %927 : vector<1x4xf32>
    %929 = math.tanh %928 : vector<1x4xf32>
    %cst_326 = arith.constant 2.500000e+00 : f32
    %930 = vector.broadcast %cst_326 : f32 to vector<1x4xf32>
    %931 = arith.mulf %930, %929 : vector<1x4xf32>
    %932 = arith.divf %928, %931 : vector<1x4xf32>
    %cst_327 = arith.constant dense<0xFF800000> : vector<1xf32>
    %933 = vector.multi_reduction <maximumf>, %932, %cst_327 [1] : vector<1x4xf32> to vector<1xf32>
    %934 = vector.shape_cast %933 : vector<1xf32> to vector<1x1xf32>
    %935 = vector.broadcast %934 : vector<1x1xf32> to vector<1x4xf32>
    %936 = arith.subf %932, %935 : vector<1x4xf32>
    %937 = math.exp %936 : vector<1x4xf32>
    %cst_328 = arith.constant dense<0.000000e+00> : vector<1xf32>
    %938 = vector.multi_reduction <add>, %937, %cst_328 [1] : vector<1x4xf32> to vector<1xf32>
    %939 = vector.shape_cast %938 : vector<1xf32> to vector<1x1xf32>
    %940 = vector.broadcast %939 : vector<1x1xf32> to vector<1x4xf32>
    %941 = arith.divf %937, %940 : vector<1x4xf32>
    %942 = math.log %939 : vector<1x1xf32>
    %943 = arith.addf %934, %942 : vector<1x1xf32>
    %944 = vector.broadcast %943 : vector<1x1xf32> to vector<1x4xf32>
    %945 = arith.subf %932, %944 : vector<1x4xf32>
    %c0_329 = arith.constant 0 : index
    %c4 = arith.constant 4 : index
    %946 = vector.load %arg12[%c0_329, %c4] : memref<1x6xf32, #tpu.memory_space<vmem>>, vector<1x1xf32>
    %947 = vector.extract_strided_slice %941 {offsets = [0, 0], sizes = [1, 1], strides = [1, 1]} : vector<1x4xf32> to vector<1x1xf32>
    %948 = vector.extract_strided_slice %941 {offsets = [0, 1], sizes = [1, 1], strides = [1, 1]} : vector<1x4xf32> to vector<1x1xf32>
    %949 = arith.addf %947, %948 : vector<1x1xf32>
    %950 = vector.extract_strided_slice %941 {offsets = [0, 2], sizes = [1, 1], strides = [1, 1]} : vector<1x4xf32> to vector<1x1xf32>
    %951 = arith.addf %949, %950 : vector<1x1xf32>
    %952 = arith.cmpf oge, %946, %947 : vector<1x1xf32>
    %953 = arith.extui %952 : vector<1x1xi1> to vector<1x1xi32>
    %954 = arith.cmpf oge, %946, %949 : vector<1x1xf32>
    %955 = arith.extui %954 : vector<1x1xi1> to vector<1x1xi32>
    %956 = arith.addi %953, %955 : vector<1x1xi32>
    %957 = arith.cmpf oge, %946, %951 : vector<1x1xf32>
    %958 = arith.extui %957 : vector<1x1xi1> to vector<1x1xi32>
    %959 = arith.addi %956, %958 : vector<1x1xi32>
    %960 = vector.broadcast %959 : vector<1x1xi32> to vector<1x4xi32>
    %961 = arith.cmpi eq, %8, %960 : vector<1x4xi32>
    %962 = arith.extui %961 : vector<1x4xi1> to vector<1x4xi32>
    %963 = arith.sitofp %962 : vector<1x4xi32> to vector<1x4xf32>
    %c4_i32 = arith.constant 4 : i32
    %964 = vector.broadcast %c4_i32 : i32 to vector<1x6xi32>
    %965 = arith.cmpi eq, %9, %964 : vector<1x6xi32>
    %966 = arith.extui %965 : vector<1x6xi1> to vector<1x6xi32>
    %967 = vector.broadcast %959 : vector<1x1xi32> to vector<1x6xi32>
    %968 = arith.muli %967, %966 : vector<1x6xi32>
    %969 = arith.addi %729, %968 : vector<1x6xi32>
    %c0_330 = arith.constant 0 : index
    %c0_331 = arith.constant 0 : index
    %970 = vector.load %arg5[%c0_330, %c0_331] : memref<4x32xf32, #tpu.memory_space<vmem>>, vector<4x32xf32>
    %cst_332 = arith.constant dense<0.000000e+00> : vector<1x32xf32>
    %971 = tpu.matmul %963, %970, %cst_332 {dimension_numbers = #tpu.dot_dimension_numbers<[1], [0], [0], [1], [0, 0, 1, 1], [], []>} : vector<1x4xf32>, vector<4x32xf32>, vector<1x32xf32> -> vector<1x32xf32>
    %972 = arith.mulf %963, %945 : vector<1x4xf32>
    %cst_333 = arith.constant dense<0.000000e+00> : vector<1xf32>
    %973 = vector.multi_reduction <add>, %972, %cst_333 [1] : vector<1x4xf32> to vector<1xf32>
    %974 = vector.shape_cast %973 : vector<1xf32> to vector<1x1xf32>
    %cst_334 = arith.constant 0.000000e+00 : f32
    %975 = vector.broadcast %cst_334 : f32 to vector<1x1xf32>
    %976 = arith.subf %975, %974 : vector<1x1xf32>
    %977 = arith.addf %849, %976 : vector<1x1xf32>
    %978 = math.exp %976 : vector<1x1xf32>
    %979 = arith.mulf %976, %978 : vector<1x1xf32>
    %980 = arith.addf %852, %979 : vector<1x1xf32>
    %c0_335 = arith.constant 0 : index
    %c0_336 = arith.constant 0 : index
    %c0_337 = arith.constant 0 : index
    %981 = vector.load %arg1[%c0_335, %c0_336, %c0_337] : memref<2x64x128xf32, #tpu.memory_space<vmem>>, vector<1x64x128xf32>
    %982 = vector.shape_cast %981 : vector<1x64x128xf32> to vector<64x128xf32>
    %c0_338 = arith.constant 0 : index
    %c0_339 = arith.constant 0 : index
    %c0_340 = arith.constant 0 : index
    %983 = vector.load %arg2[%c0_338, %c0_339, %c0_340] : memref<2x1x128xf32, #tpu.memory_space<vmem>>, vector<1x1x128xf32>
    %984 = vector.shape_cast %983 : vector<1x1x128xf32> to vector<1x128xf32>
    %985 = tpu.concatenate %971, %900 in 1 : vector<1x32xf32>, vector<1x32xf32> -> vector<1x64xf32>
    %cst_341 = arith.constant dense<0.000000e+00> : vector<1x128xf32>
    %986 = tpu.matmul %985, %982, %cst_341 {dimension_numbers = #tpu.dot_dimension_numbers<[1], [0], [0], [1], [0, 0, 1, 1], [], []>} : vector<1x64xf32>, vector<64x128xf32>, vector<1x128xf32> -> vector<1x128xf32>
    %987 = arith.addf %986, %984 : vector<1x128xf32>
    %988 = arith.negf %987 : vector<1x128xf32>
    %989 = math.exp %988 : vector<1x128xf32>
    %cst_342 = arith.constant 1.000000e+00 : f32
    %990 = vector.broadcast %cst_342 : f32 to vector<1x128xf32>
    %991 = arith.addf %990, %989 : vector<1x128xf32>
    %992 = arith.divf %990, %991 : vector<1x128xf32>
    %993 = math.tanh %987 : vector<1x128xf32>
    %994 = vector.extract_strided_slice %992 {offsets = [0, 0], sizes = [1, 32], strides = [1, 1]} : vector<1x128xf32> to vector<1x32xf32>
    %995 = vector.extract_strided_slice %992 {offsets = [0, 32], sizes = [1, 32], strides = [1, 1]} : vector<1x128xf32> to vector<1x32xf32>
    %996 = vector.extract_strided_slice %992 {offsets = [0, 96], sizes = [1, 32], strides = [1, 1]} : vector<1x128xf32> to vector<1x32xf32>
    %997 = vector.extract_strided_slice %993 {offsets = [0, 64], sizes = [1, 32], strides = [1, 1]} : vector<1x128xf32> to vector<1x32xf32>
    %998 = arith.mulf %995, %898 : vector<1x32xf32>
    %999 = arith.mulf %994, %997 : vector<1x32xf32>
    %1000 = arith.addf %998, %999 : vector<1x32xf32>
    %1001 = math.tanh %1000 : vector<1x32xf32>
    %1002 = arith.mulf %996, %1001 : vector<1x32xf32>
    %c1_343 = arith.constant 1 : index
    %c0_344 = arith.constant 0 : index
    %c0_345 = arith.constant 0 : index
    %1003 = vector.load %arg1[%c1_343, %c0_344, %c0_345] : memref<2x64x128xf32, #tpu.memory_space<vmem>>, vector<1x64x128xf32>
    %1004 = vector.shape_cast %1003 : vector<1x64x128xf32> to vector<64x128xf32>
    %c1_346 = arith.constant 1 : index
    %c0_347 = arith.constant 0 : index
    %c0_348 = arith.constant 0 : index
    %1005 = vector.load %arg2[%c1_346, %c0_347, %c0_348] : memref<2x1x128xf32, #tpu.memory_space<vmem>>, vector<1x1x128xf32>
    %1006 = vector.shape_cast %1005 : vector<1x1x128xf32> to vector<1x128xf32>
    %1007 = tpu.concatenate %1002, %922 in 1 : vector<1x32xf32>, vector<1x32xf32> -> vector<1x64xf32>
    %cst_349 = arith.constant dense<0.000000e+00> : vector<1x128xf32>
    %1008 = tpu.matmul %1007, %1004, %cst_349 {dimension_numbers = #tpu.dot_dimension_numbers<[1], [0], [0], [1], [0, 0, 1, 1], [], []>} : vector<1x64xf32>, vector<64x128xf32>, vector<1x128xf32> -> vector<1x128xf32>
    %1009 = arith.addf %1008, %1006 : vector<1x128xf32>
    %1010 = arith.negf %1009 : vector<1x128xf32>
    %1011 = math.exp %1010 : vector<1x128xf32>
    %cst_350 = arith.constant 1.000000e+00 : f32
    %1012 = vector.broadcast %cst_350 : f32 to vector<1x128xf32>
    %1013 = arith.addf %1012, %1011 : vector<1x128xf32>
    %1014 = arith.divf %1012, %1013 : vector<1x128xf32>
    %1015 = math.tanh %1009 : vector<1x128xf32>
    %1016 = vector.extract_strided_slice %1014 {offsets = [0, 0], sizes = [1, 32], strides = [1, 1]} : vector<1x128xf32> to vector<1x32xf32>
    %1017 = vector.extract_strided_slice %1014 {offsets = [0, 32], sizes = [1, 32], strides = [1, 1]} : vector<1x128xf32> to vector<1x32xf32>
    %1018 = vector.extract_strided_slice %1014 {offsets = [0, 96], sizes = [1, 32], strides = [1, 1]} : vector<1x128xf32> to vector<1x32xf32>
    %1019 = vector.extract_strided_slice %1015 {offsets = [0, 64], sizes = [1, 32], strides = [1, 1]} : vector<1x128xf32> to vector<1x32xf32>
    %1020 = arith.mulf %1017, %920 : vector<1x32xf32>
    %1021 = arith.mulf %1016, %1019 : vector<1x32xf32>
    %1022 = arith.addf %1020, %1021 : vector<1x32xf32>
    %1023 = math.tanh %1022 : vector<1x32xf32>
    %1024 = arith.mulf %1018, %1023 : vector<1x32xf32>
    %1025 = tpu.concatenate %157, %308, %544, %784 in 0 : vector<1x32xf32>, vector<1x32xf32>, vector<1x32xf32>, vector<1x32xf32> -> vector<4x32xf32>
    %1026 = tpu.concatenate %162, %398, %638, %878 in 0 : vector<1x32xf32>, vector<1x32xf32>, vector<1x32xf32>, vector<1x32xf32> -> vector<4x32xf32>
    %c0_351 = arith.constant 0 : index
    %c0_352 = arith.constant 0 : index
    %1027 = vector.load %arg8[%c0_351, %c0_352] : memref<32x32xf32, #tpu.memory_space<vmem>>, vector<32x32xf32>
    %cst_353 = arith.constant dense<0.000000e+00> : vector<1x32xf32>
    %1028 = tpu.matmul %1024, %1027, %cst_353 {dimension_numbers = #tpu.dot_dimension_numbers<[1], [0], [0], [1], [0, 0, 1, 1], [], []>} : vector<1x32xf32>, vector<32x32xf32>, vector<1x32xf32> -> vector<1x32xf32>
    %c0_354 = arith.constant 0 : index
    %c0_355 = arith.constant 0 : index
    %1029 = vector.load %arg9[%c0_354, %c0_355] : memref<1x32xf32, #tpu.memory_space<vmem>>, vector<1x32xf32>
    %1030 = arith.addf %1028, %1029 : vector<1x32xf32>
    %1031 = vector.broadcast %1030 : vector<1x32xf32> to vector<4x32xf32>
    %1032 = arith.addf %1031, %1026 : vector<4x32xf32>
    %1033 = math.tanh %1032 : vector<4x32xf32>
    %c0_356 = arith.constant 0 : index
    %c0_357 = arith.constant 0 : index
    %1034 = vector.load %arg10[%c0_356, %c0_357] : memref<32x1xf32, #tpu.memory_space<vmem>>, vector<32x1xf32>
    %cst_358 = arith.constant dense<0.000000e+00> : vector<4x1xf32>
    %1035 = tpu.matmul %1033, %1034, %cst_358 {dimension_numbers = #tpu.dot_dimension_numbers<[1], [0], [0], [1], [0, 0, 1, 1], [], []>} : vector<4x32xf32>, vector<32x1xf32>, vector<4x1xf32> -> vector<4x1xf32>
    %c0_359 = arith.constant 0 : index
    %c0_360 = arith.constant 0 : index
    %1036 = vector.load %arg11[%c0_359, %c0_360] : memref<1x1xf32, #tpu.memory_space<vmem>>, vector<1x1xf32>
    %1037 = vector.broadcast %1036 : vector<1x1xf32> to vector<4x1xf32>
    %1038 = arith.addf %1035, %1037 : vector<4x1xf32>
    %cst_361 = arith.constant 5.000000e+00 : f32
    %1039 = vector.broadcast %cst_361 : f32 to vector<4x1xf32>
    %1040 = arith.divf %1038, %1039 : vector<4x1xf32>
    %1041 = math.tanh %1040 : vector<4x1xf32>
    %cst_362 = arith.constant 2.500000e+00 : f32
    %1042 = vector.broadcast %cst_362 : f32 to vector<4x1xf32>
    %1043 = arith.mulf %1042, %1041 : vector<4x1xf32>
    %1044 = arith.divf %1040, %1043 : vector<4x1xf32>
    %1045 = arith.negf %1044 : vector<4x1xf32>
    %1046 = math.exp %1045 : vector<4x1xf32>
    %cst_363 = arith.constant 1.000000e+00 : f32
    %1047 = vector.broadcast %cst_363 : f32 to vector<4x1xf32>
    %1048 = arith.addf %1047, %1046 : vector<4x1xf32>
    %1049 = arith.divf %1047, %1048 : vector<4x1xf32>
    %1050 = arith.negf %1044 : vector<4x1xf32>
    %1051 = math.exp %1050 : vector<4x1xf32>
    %cst_364 = arith.constant 1.000000e+00 : f32
    %1052 = vector.broadcast %cst_364 : f32 to vector<4x1xf32>
    %1053 = arith.addf %1052, %1051 : vector<4x1xf32>
    %1054 = arith.divf %1052, %1053 : vector<4x1xf32>
    %1055 = arith.addf %1049, %1054 : vector<4x1xf32>
    %1056 = arith.divf %1049, %1055 : vector<4x1xf32>
    %c0_365 = arith.constant 0 : index
    %c4_366 = arith.constant 4 : index
    %1057 = vector.load %arg13[%c0_365, %c4_366] : memref<6x6xf32, #tpu.memory_space<vmem>>, vector<4x1xf32>
    %1058 = arith.cmpf oge, %1057, %1056 : vector<4x1xf32>
    %1059 = arith.extui %1058 : vector<4x1xi1> to vector<4x1xi32>
    %1060 = arith.sitofp %1059 : vector<4x1xi32> to vector<4x1xf32>
    %c4_i32_367 = arith.constant 4 : i32
    %1061 = vector.broadcast %c4_i32_367 : i32 to vector<1x6xi32>
    %1062 = arith.cmpi eq, %9, %1061 : vector<1x6xi32>
    %1063 = arith.extui %1062 : vector<1x6xi1> to vector<1x6xi32>
    %1064 = arith.sitofp %1063 : vector<1x6xi32> to vector<1x6xf32>
    %cst_368 = arith.constant 0.000000e+00 : f32
    %1065 = vector.broadcast %cst_368 : f32 to vector<2x1xf32>
    %1066 = tpu.concatenate %1060, %1065 in 0 : vector<4x1xf32>, vector<2x1xf32> -> vector<6x1xf32>
    %1067 = vector.broadcast %1066 : vector<6x1xf32> to vector<6x6xf32>
    %1068 = vector.broadcast %1064 : vector<1x6xf32> to vector<6x6xf32>
    %1069 = arith.mulf %1067, %1068 : vector<6x6xf32>
    %1070 = arith.addf %830, %1069 : vector<6x6xf32>
    %1071 = arith.maximumf %1044, %1044 : vector<4x1xf32>
    %1072 = arith.subf %1044, %1071 : vector<4x1xf32>
    %1073 = math.exp %1072 : vector<4x1xf32>
    %1074 = arith.subf %1044, %1071 : vector<4x1xf32>
    %1075 = math.exp %1074 : vector<4x1xf32>
    %1076 = arith.addf %1073, %1075 : vector<4x1xf32>
    %1077 = math.log %1076 : vector<4x1xf32>
    %1078 = arith.addf %1071, %1077 : vector<4x1xf32>
    %cst_369 = arith.constant 5.000000e-01 : f32
    %1079 = vector.broadcast %cst_369 : f32 to vector<4x1xf32>
    %1080 = arith.cmpf ogt, %1060, %1079 : vector<4x1xf32>
    %1081 = arith.select %1080, %1044, %1044 : vector<4x1xi1>, vector<4x1xf32>
    %1082 = arith.subf %1081, %1078 : vector<4x1xf32>
    %cst_370 = arith.constant dense<0.000000e+00> : vector<1xf32>
    %1083 = vector.multi_reduction <add>, %1082, %cst_370 [0] : vector<4x1xf32> to vector<1xf32>
    %1084 = vector.shape_cast %1083 : vector<1xf32> to vector<1x1xf32>
    %cst_371 = arith.constant 0.000000e+00 : f32
    %1085 = vector.broadcast %cst_371 : f32 to vector<1x1xf32>
    %1086 = arith.subf %1085, %1084 : vector<1x1xf32>
    %cst_372 = arith.constant 2.500000e-01 : f32
    %1087 = vector.broadcast %cst_372 : f32 to vector<1x1xf32>
    %1088 = arith.mulf %1086, %1087 : vector<1x1xf32>
    %1089 = arith.addf %977, %1088 : vector<1x1xf32>
    %1090 = math.exp %1088 : vector<1x1xf32>
    %1091 = arith.mulf %1088, %1090 : vector<1x1xf32>
    %1092 = arith.addf %980, %1091 : vector<1x1xf32>
    %cst_373 = arith.constant 1.66666663 : f32
    %1093 = vector.broadcast %cst_373 : f32 to vector<4x1xf32>
    %1094 = arith.mulf %1049, %1093 : vector<4x1xf32>
    %1095 = math.log %1094 : vector<4x1xf32>
    %1096 = arith.mulf %1049, %1095 : vector<4x1xf32>
    %cst_374 = arith.constant 2.500000e+00 : f32
    %1097 = vector.broadcast %cst_374 : f32 to vector<4x1xf32>
    %1098 = arith.mulf %1054, %1097 : vector<4x1xf32>
    %1099 = math.log %1098 : vector<4x1xf32>
    %1100 = arith.mulf %1054, %1099 : vector<4x1xf32>
    %1101 = arith.addf %1096, %1100 : vector<4x1xf32>
    %cst_375 = arith.constant dense<0.000000e+00> : vector<1xf32>
    %1102 = vector.multi_reduction <add>, %1101, %cst_375 [0] : vector<4x1xf32> to vector<1xf32>
    %1103 = vector.shape_cast %1102 : vector<1xf32> to vector<1x1xf32>
    %1104 = arith.addf %864, %1103 : vector<1x1xf32>
    %cst_376 = arith.constant dense<0.000000e+00> : vector<1xf32>
    %1105 = vector.multi_reduction <add>, %1060, %cst_376 [0] : vector<4x1xf32> to vector<1xf32>
    %1106 = vector.shape_cast %1105 : vector<1xf32> to vector<1x1xf32>
    %1107 = vector.broadcast %1060 : vector<4x1xf32> to vector<4x32xf32>
    %1108 = arith.mulf %1107, %1025 : vector<4x32xf32>
    %cst_377 = arith.constant dense<0.000000e+00> : vector<32xf32>
    %1109 = vector.multi_reduction <add>, %1108, %cst_377 [0] : vector<4x32xf32> to vector<32xf32>
    %1110 = vector.shape_cast %1109 : vector<32xf32> to vector<1x32xf32>
    %cst_378 = arith.constant 1.000000e+00 : f32
    %1111 = vector.broadcast %cst_378 : f32 to vector<1x1xf32>
    %1112 = arith.addf %1111, %1106 : vector<1x1xf32>
    %1113 = vector.broadcast %1112 : vector<1x1xf32> to vector<1x32xf32>
    %1114 = arith.divf %1110, %1113 : vector<1x32xf32>
    %c0_379 = arith.constant 0 : index
    %c0_380 = arith.constant 0 : index
    %1115 = vector.load %arg6[%c0_379, %c0_380] : memref<32x32xf32, #tpu.memory_space<vmem>>, vector<32x32xf32>
    %cst_381 = arith.constant dense<0.000000e+00> : vector<1x32xf32>
    %1116 = tpu.matmul %1024, %1115, %cst_381 {dimension_numbers = #tpu.dot_dimension_numbers<[1], [0], [0], [1], [0, 0, 1, 1], [], []>} : vector<1x32xf32>, vector<32x32xf32>, vector<1x32xf32> -> vector<1x32xf32>
    %c0_382 = arith.constant 0 : index
    %c0_383 = arith.constant 0 : index
    %1117 = vector.load %arg7[%c0_382, %c0_383] : memref<1x32xf32, #tpu.memory_space<vmem>>, vector<1x32xf32>
    %1118 = arith.addf %1116, %1117 : vector<1x32xf32>
    %c0_384 = arith.constant 0 : index
    %c0_385 = arith.constant 0 : index
    %c0_386 = arith.constant 0 : index
    %1119 = vector.load %arg1[%c0_384, %c0_385, %c0_386] : memref<2x64x128xf32, #tpu.memory_space<vmem>>, vector<1x64x128xf32>
    %1120 = vector.shape_cast %1119 : vector<1x64x128xf32> to vector<64x128xf32>
    %c0_387 = arith.constant 0 : index
    %c0_388 = arith.constant 0 : index
    %c0_389 = arith.constant 0 : index
    %1121 = vector.load %arg2[%c0_387, %c0_388, %c0_389] : memref<2x1x128xf32, #tpu.memory_space<vmem>>, vector<1x1x128xf32>
    %1122 = vector.shape_cast %1121 : vector<1x1x128xf32> to vector<1x128xf32>
    %1123 = tpu.concatenate %1114, %1002 in 1 : vector<1x32xf32>, vector<1x32xf32> -> vector<1x64xf32>
    %cst_390 = arith.constant dense<0.000000e+00> : vector<1x128xf32>
    %1124 = tpu.matmul %1123, %1120, %cst_390 {dimension_numbers = #tpu.dot_dimension_numbers<[1], [0], [0], [1], [0, 0, 1, 1], [], []>} : vector<1x64xf32>, vector<64x128xf32>, vector<1x128xf32> -> vector<1x128xf32>
    %1125 = arith.addf %1124, %1122 : vector<1x128xf32>
    %1126 = arith.negf %1125 : vector<1x128xf32>
    %1127 = math.exp %1126 : vector<1x128xf32>
    %cst_391 = arith.constant 1.000000e+00 : f32
    %1128 = vector.broadcast %cst_391 : f32 to vector<1x128xf32>
    %1129 = arith.addf %1128, %1127 : vector<1x128xf32>
    %1130 = arith.divf %1128, %1129 : vector<1x128xf32>
    %1131 = math.tanh %1125 : vector<1x128xf32>
    %1132 = vector.extract_strided_slice %1130 {offsets = [0, 0], sizes = [1, 32], strides = [1, 1]} : vector<1x128xf32> to vector<1x32xf32>
    %1133 = vector.extract_strided_slice %1130 {offsets = [0, 32], sizes = [1, 32], strides = [1, 1]} : vector<1x128xf32> to vector<1x32xf32>
    %1134 = vector.extract_strided_slice %1130 {offsets = [0, 96], sizes = [1, 32], strides = [1, 1]} : vector<1x128xf32> to vector<1x32xf32>
    %1135 = vector.extract_strided_slice %1131 {offsets = [0, 64], sizes = [1, 32], strides = [1, 1]} : vector<1x128xf32> to vector<1x32xf32>
    %1136 = arith.mulf %1133, %1000 : vector<1x32xf32>
    %1137 = arith.mulf %1132, %1135 : vector<1x32xf32>
    %1138 = arith.addf %1136, %1137 : vector<1x32xf32>
    %1139 = math.tanh %1138 : vector<1x32xf32>
    %1140 = arith.mulf %1134, %1139 : vector<1x32xf32>
    %c1_392 = arith.constant 1 : index
    %c0_393 = arith.constant 0 : index
    %c0_394 = arith.constant 0 : index
    %1141 = vector.load %arg1[%c1_392, %c0_393, %c0_394] : memref<2x64x128xf32, #tpu.memory_space<vmem>>, vector<1x64x128xf32>
    %1142 = vector.shape_cast %1141 : vector<1x64x128xf32> to vector<64x128xf32>
    %c1_395 = arith.constant 1 : index
    %c0_396 = arith.constant 0 : index
    %c0_397 = arith.constant 0 : index
    %1143 = vector.load %arg2[%c1_395, %c0_396, %c0_397] : memref<2x1x128xf32, #tpu.memory_space<vmem>>, vector<1x1x128xf32>
    %1144 = vector.shape_cast %1143 : vector<1x1x128xf32> to vector<1x128xf32>
    %1145 = tpu.concatenate %1140, %1024 in 1 : vector<1x32xf32>, vector<1x32xf32> -> vector<1x64xf32>
    %cst_398 = arith.constant dense<0.000000e+00> : vector<1x128xf32>
    %1146 = tpu.matmul %1145, %1142, %cst_398 {dimension_numbers = #tpu.dot_dimension_numbers<[1], [0], [0], [1], [0, 0, 1, 1], [], []>} : vector<1x64xf32>, vector<64x128xf32>, vector<1x128xf32> -> vector<1x128xf32>
    %1147 = arith.addf %1146, %1144 : vector<1x128xf32>
    %1148 = arith.negf %1147 : vector<1x128xf32>
    %1149 = math.exp %1148 : vector<1x128xf32>
    %cst_399 = arith.constant 1.000000e+00 : f32
    %1150 = vector.broadcast %cst_399 : f32 to vector<1x128xf32>
    %1151 = arith.addf %1150, %1149 : vector<1x128xf32>
    %1152 = arith.divf %1150, %1151 : vector<1x128xf32>
    %1153 = math.tanh %1147 : vector<1x128xf32>
    %1154 = vector.extract_strided_slice %1152 {offsets = [0, 0], sizes = [1, 32], strides = [1, 1]} : vector<1x128xf32> to vector<1x32xf32>
    %1155 = vector.extract_strided_slice %1152 {offsets = [0, 32], sizes = [1, 32], strides = [1, 1]} : vector<1x128xf32> to vector<1x32xf32>
    %1156 = vector.extract_strided_slice %1152 {offsets = [0, 96], sizes = [1, 32], strides = [1, 1]} : vector<1x128xf32> to vector<1x32xf32>
    %1157 = vector.extract_strided_slice %1153 {offsets = [0, 64], sizes = [1, 32], strides = [1, 1]} : vector<1x128xf32> to vector<1x32xf32>
    %1158 = arith.mulf %1155, %1022 : vector<1x32xf32>
    %1159 = arith.mulf %1154, %1157 : vector<1x32xf32>
    %1160 = arith.addf %1158, %1159 : vector<1x32xf32>
    %1161 = math.tanh %1160 : vector<1x32xf32>
    %1162 = arith.mulf %1156, %1161 : vector<1x32xf32>
    %c0_400 = arith.constant 0 : index
    %c0_401 = arith.constant 0 : index
    %1163 = vector.load %arg3[%c0_400, %c0_401] : memref<32x4xf32, #tpu.memory_space<vmem>>, vector<32x4xf32>
    %cst_402 = arith.constant dense<0.000000e+00> : vector<1x4xf32>
    %1164 = tpu.matmul %1162, %1163, %cst_402 {dimension_numbers = #tpu.dot_dimension_numbers<[1], [0], [0], [1], [0, 0, 1, 1], [], []>} : vector<1x32xf32>, vector<32x4xf32>, vector<1x4xf32> -> vector<1x4xf32>
    %c0_403 = arith.constant 0 : index
    %c0_404 = arith.constant 0 : index
    %1165 = vector.load %arg4[%c0_403, %c0_404] : memref<1x4xf32, #tpu.memory_space<vmem>>, vector<1x4xf32>
    %1166 = arith.addf %1164, %1165 : vector<1x4xf32>
    %cst_405 = arith.constant 5.000000e+00 : f32
    %1167 = vector.broadcast %cst_405 : f32 to vector<1x4xf32>
    %1168 = arith.divf %1166, %1167 : vector<1x4xf32>
    %1169 = math.tanh %1168 : vector<1x4xf32>
    %cst_406 = arith.constant 2.500000e+00 : f32
    %1170 = vector.broadcast %cst_406 : f32 to vector<1x4xf32>
    %1171 = arith.mulf %1170, %1169 : vector<1x4xf32>
    %1172 = arith.divf %1168, %1171 : vector<1x4xf32>
    %cst_407 = arith.constant dense<0xFF800000> : vector<1xf32>
    %1173 = vector.multi_reduction <maximumf>, %1172, %cst_407 [1] : vector<1x4xf32> to vector<1xf32>
    %1174 = vector.shape_cast %1173 : vector<1xf32> to vector<1x1xf32>
    %1175 = vector.broadcast %1174 : vector<1x1xf32> to vector<1x4xf32>
    %1176 = arith.subf %1172, %1175 : vector<1x4xf32>
    %1177 = math.exp %1176 : vector<1x4xf32>
    %cst_408 = arith.constant dense<0.000000e+00> : vector<1xf32>
    %1178 = vector.multi_reduction <add>, %1177, %cst_408 [1] : vector<1x4xf32> to vector<1xf32>
    %1179 = vector.shape_cast %1178 : vector<1xf32> to vector<1x1xf32>
    %1180 = vector.broadcast %1179 : vector<1x1xf32> to vector<1x4xf32>
    %1181 = arith.divf %1177, %1180 : vector<1x4xf32>
    %1182 = math.log %1179 : vector<1x1xf32>
    %1183 = arith.addf %1174, %1182 : vector<1x1xf32>
    %1184 = vector.broadcast %1183 : vector<1x1xf32> to vector<1x4xf32>
    %1185 = arith.subf %1172, %1184 : vector<1x4xf32>
    %c0_409 = arith.constant 0 : index
    %c5 = arith.constant 5 : index
    %1186 = vector.load %arg12[%c0_409, %c5] : memref<1x6xf32, #tpu.memory_space<vmem>>, vector<1x1xf32>
    %1187 = vector.extract_strided_slice %1181 {offsets = [0, 0], sizes = [1, 1], strides = [1, 1]} : vector<1x4xf32> to vector<1x1xf32>
    %1188 = vector.extract_strided_slice %1181 {offsets = [0, 1], sizes = [1, 1], strides = [1, 1]} : vector<1x4xf32> to vector<1x1xf32>
    %1189 = arith.addf %1187, %1188 : vector<1x1xf32>
    %1190 = vector.extract_strided_slice %1181 {offsets = [0, 2], sizes = [1, 1], strides = [1, 1]} : vector<1x4xf32> to vector<1x1xf32>
    %1191 = arith.addf %1189, %1190 : vector<1x1xf32>
    %1192 = arith.cmpf oge, %1186, %1187 : vector<1x1xf32>
    %1193 = arith.extui %1192 : vector<1x1xi1> to vector<1x1xi32>
    %1194 = arith.cmpf oge, %1186, %1189 : vector<1x1xf32>
    %1195 = arith.extui %1194 : vector<1x1xi1> to vector<1x1xi32>
    %1196 = arith.addi %1193, %1195 : vector<1x1xi32>
    %1197 = arith.cmpf oge, %1186, %1191 : vector<1x1xf32>
    %1198 = arith.extui %1197 : vector<1x1xi1> to vector<1x1xi32>
    %1199 = arith.addi %1196, %1198 : vector<1x1xi32>
    %1200 = vector.broadcast %1199 : vector<1x1xi32> to vector<1x4xi32>
    %1201 = arith.cmpi eq, %8, %1200 : vector<1x4xi32>
    %1202 = arith.extui %1201 : vector<1x4xi1> to vector<1x4xi32>
    %1203 = arith.sitofp %1202 : vector<1x4xi32> to vector<1x4xf32>
    %c5_i32 = arith.constant 5 : i32
    %1204 = vector.broadcast %c5_i32 : i32 to vector<1x6xi32>
    %1205 = arith.cmpi eq, %9, %1204 : vector<1x6xi32>
    %1206 = arith.extui %1205 : vector<1x6xi1> to vector<1x6xi32>
    %1207 = vector.broadcast %1199 : vector<1x1xi32> to vector<1x6xi32>
    %1208 = arith.muli %1207, %1206 : vector<1x6xi32>
    %1209 = arith.addi %969, %1208 : vector<1x6xi32>
    %c0_410 = arith.constant 0 : index
    %c0_411 = arith.constant 0 : index
    %1210 = vector.load %arg5[%c0_410, %c0_411] : memref<4x32xf32, #tpu.memory_space<vmem>>, vector<4x32xf32>
    %cst_412 = arith.constant dense<0.000000e+00> : vector<1x32xf32>
    %1211 = tpu.matmul %1203, %1210, %cst_412 {dimension_numbers = #tpu.dot_dimension_numbers<[1], [0], [0], [1], [0, 0, 1, 1], [], []>} : vector<1x4xf32>, vector<4x32xf32>, vector<1x32xf32> -> vector<1x32xf32>
    %1212 = arith.mulf %1203, %1185 : vector<1x4xf32>
    %cst_413 = arith.constant dense<0.000000e+00> : vector<1xf32>
    %1213 = vector.multi_reduction <add>, %1212, %cst_413 [1] : vector<1x4xf32> to vector<1xf32>
    %1214 = vector.shape_cast %1213 : vector<1xf32> to vector<1x1xf32>
    %cst_414 = arith.constant 0.000000e+00 : f32
    %1215 = vector.broadcast %cst_414 : f32 to vector<1x1xf32>
    %1216 = arith.subf %1215, %1214 : vector<1x1xf32>
    %1217 = arith.addf %1089, %1216 : vector<1x1xf32>
    %1218 = math.exp %1216 : vector<1x1xf32>
    %1219 = arith.mulf %1216, %1218 : vector<1x1xf32>
    %1220 = arith.addf %1092, %1219 : vector<1x1xf32>
    %c0_415 = arith.constant 0 : index
    %c0_416 = arith.constant 0 : index
    %c0_417 = arith.constant 0 : index
    %1221 = vector.load %arg1[%c0_415, %c0_416, %c0_417] : memref<2x64x128xf32, #tpu.memory_space<vmem>>, vector<1x64x128xf32>
    %1222 = vector.shape_cast %1221 : vector<1x64x128xf32> to vector<64x128xf32>
    %c0_418 = arith.constant 0 : index
    %c0_419 = arith.constant 0 : index
    %c0_420 = arith.constant 0 : index
    %1223 = vector.load %arg2[%c0_418, %c0_419, %c0_420] : memref<2x1x128xf32, #tpu.memory_space<vmem>>, vector<1x1x128xf32>
    %1224 = vector.shape_cast %1223 : vector<1x1x128xf32> to vector<1x128xf32>
    %1225 = tpu.concatenate %1211, %1140 in 1 : vector<1x32xf32>, vector<1x32xf32> -> vector<1x64xf32>
    %cst_421 = arith.constant dense<0.000000e+00> : vector<1x128xf32>
    %1226 = tpu.matmul %1225, %1222, %cst_421 {dimension_numbers = #tpu.dot_dimension_numbers<[1], [0], [0], [1], [0, 0, 1, 1], [], []>} : vector<1x64xf32>, vector<64x128xf32>, vector<1x128xf32> -> vector<1x128xf32>
    %1227 = arith.addf %1226, %1224 : vector<1x128xf32>
    %1228 = arith.negf %1227 : vector<1x128xf32>
    %1229 = math.exp %1228 : vector<1x128xf32>
    %cst_422 = arith.constant 1.000000e+00 : f32
    %1230 = vector.broadcast %cst_422 : f32 to vector<1x128xf32>
    %1231 = arith.addf %1230, %1229 : vector<1x128xf32>
    %1232 = arith.divf %1230, %1231 : vector<1x128xf32>
    %1233 = math.tanh %1227 : vector<1x128xf32>
    %1234 = vector.extract_strided_slice %1232 {offsets = [0, 0], sizes = [1, 32], strides = [1, 1]} : vector<1x128xf32> to vector<1x32xf32>
    %1235 = vector.extract_strided_slice %1232 {offsets = [0, 32], sizes = [1, 32], strides = [1, 1]} : vector<1x128xf32> to vector<1x32xf32>
    %1236 = vector.extract_strided_slice %1232 {offsets = [0, 96], sizes = [1, 32], strides = [1, 1]} : vector<1x128xf32> to vector<1x32xf32>
    %1237 = vector.extract_strided_slice %1233 {offsets = [0, 64], sizes = [1, 32], strides = [1, 1]} : vector<1x128xf32> to vector<1x32xf32>
    %1238 = arith.mulf %1235, %1138 : vector<1x32xf32>
    %1239 = arith.mulf %1234, %1237 : vector<1x32xf32>
    %1240 = arith.addf %1238, %1239 : vector<1x32xf32>
    %1241 = math.tanh %1240 : vector<1x32xf32>
    %1242 = arith.mulf %1236, %1241 : vector<1x32xf32>
    %c1_423 = arith.constant 1 : index
    %c0_424 = arith.constant 0 : index
    %c0_425 = arith.constant 0 : index
    %1243 = vector.load %arg1[%c1_423, %c0_424, %c0_425] : memref<2x64x128xf32, #tpu.memory_space<vmem>>, vector<1x64x128xf32>
    %1244 = vector.shape_cast %1243 : vector<1x64x128xf32> to vector<64x128xf32>
    %c1_426 = arith.constant 1 : index
    %c0_427 = arith.constant 0 : index
    %c0_428 = arith.constant 0 : index
    %1245 = vector.load %arg2[%c1_426, %c0_427, %c0_428] : memref<2x1x128xf32, #tpu.memory_space<vmem>>, vector<1x1x128xf32>
    %1246 = vector.shape_cast %1245 : vector<1x1x128xf32> to vector<1x128xf32>
    %1247 = tpu.concatenate %1242, %1162 in 1 : vector<1x32xf32>, vector<1x32xf32> -> vector<1x64xf32>
    %cst_429 = arith.constant dense<0.000000e+00> : vector<1x128xf32>
    %1248 = tpu.matmul %1247, %1244, %cst_429 {dimension_numbers = #tpu.dot_dimension_numbers<[1], [0], [0], [1], [0, 0, 1, 1], [], []>} : vector<1x64xf32>, vector<64x128xf32>, vector<1x128xf32> -> vector<1x128xf32>
    %1249 = arith.addf %1248, %1246 : vector<1x128xf32>
    %1250 = arith.negf %1249 : vector<1x128xf32>
    %1251 = math.exp %1250 : vector<1x128xf32>
    %cst_430 = arith.constant 1.000000e+00 : f32
    %1252 = vector.broadcast %cst_430 : f32 to vector<1x128xf32>
    %1253 = arith.addf %1252, %1251 : vector<1x128xf32>
    %1254 = arith.divf %1252, %1253 : vector<1x128xf32>
    %1255 = math.tanh %1249 : vector<1x128xf32>
    %1256 = vector.extract_strided_slice %1254 {offsets = [0, 0], sizes = [1, 32], strides = [1, 1]} : vector<1x128xf32> to vector<1x32xf32>
    %1257 = vector.extract_strided_slice %1254 {offsets = [0, 32], sizes = [1, 32], strides = [1, 1]} : vector<1x128xf32> to vector<1x32xf32>
    %1258 = vector.extract_strided_slice %1254 {offsets = [0, 96], sizes = [1, 32], strides = [1, 1]} : vector<1x128xf32> to vector<1x32xf32>
    %1259 = vector.extract_strided_slice %1255 {offsets = [0, 64], sizes = [1, 32], strides = [1, 1]} : vector<1x128xf32> to vector<1x32xf32>
    %1260 = arith.mulf %1257, %1160 : vector<1x32xf32>
    %1261 = arith.mulf %1256, %1259 : vector<1x32xf32>
    %1262 = arith.addf %1260, %1261 : vector<1x32xf32>
    %1263 = math.tanh %1262 : vector<1x32xf32>
    %1264 = arith.mulf %1258, %1263 : vector<1x32xf32>
    %1265 = tpu.concatenate %162, %398, %638, %878, %1118 in 0 : vector<1x32xf32>, vector<1x32xf32>, vector<1x32xf32>, vector<1x32xf32>, vector<1x32xf32> -> vector<5x32xf32>
    %c0_431 = arith.constant 0 : index
    %c0_432 = arith.constant 0 : index
    %1266 = vector.load %arg8[%c0_431, %c0_432] : memref<32x32xf32, #tpu.memory_space<vmem>>, vector<32x32xf32>
    %cst_433 = arith.constant dense<0.000000e+00> : vector<1x32xf32>
    %1267 = tpu.matmul %1264, %1266, %cst_433 {dimension_numbers = #tpu.dot_dimension_numbers<[1], [0], [0], [1], [0, 0, 1, 1], [], []>} : vector<1x32xf32>, vector<32x32xf32>, vector<1x32xf32> -> vector<1x32xf32>
    %c0_434 = arith.constant 0 : index
    %c0_435 = arith.constant 0 : index
    %1268 = vector.load %arg9[%c0_434, %c0_435] : memref<1x32xf32, #tpu.memory_space<vmem>>, vector<1x32xf32>
    %1269 = arith.addf %1267, %1268 : vector<1x32xf32>
    %1270 = vector.broadcast %1269 : vector<1x32xf32> to vector<5x32xf32>
    %1271 = arith.addf %1270, %1265 : vector<5x32xf32>
    %1272 = math.tanh %1271 : vector<5x32xf32>
    %c0_436 = arith.constant 0 : index
    %c0_437 = arith.constant 0 : index
    %1273 = vector.load %arg10[%c0_436, %c0_437] : memref<32x1xf32, #tpu.memory_space<vmem>>, vector<32x1xf32>
    %cst_438 = arith.constant dense<0.000000e+00> : vector<5x1xf32>
    %1274 = tpu.matmul %1272, %1273, %cst_438 {dimension_numbers = #tpu.dot_dimension_numbers<[1], [0], [0], [1], [0, 0, 1, 1], [], []>} : vector<5x32xf32>, vector<32x1xf32>, vector<5x1xf32> -> vector<5x1xf32>
    %c0_439 = arith.constant 0 : index
    %c0_440 = arith.constant 0 : index
    %1275 = vector.load %arg11[%c0_439, %c0_440] : memref<1x1xf32, #tpu.memory_space<vmem>>, vector<1x1xf32>
    %1276 = vector.broadcast %1275 : vector<1x1xf32> to vector<5x1xf32>
    %1277 = arith.addf %1274, %1276 : vector<5x1xf32>
    %cst_441 = arith.constant 5.000000e+00 : f32
    %1278 = vector.broadcast %cst_441 : f32 to vector<5x1xf32>
    %1279 = arith.divf %1277, %1278 : vector<5x1xf32>
    %1280 = math.tanh %1279 : vector<5x1xf32>
    %cst_442 = arith.constant 2.500000e+00 : f32
    %1281 = vector.broadcast %cst_442 : f32 to vector<5x1xf32>
    %1282 = arith.mulf %1281, %1280 : vector<5x1xf32>
    %1283 = arith.divf %1279, %1282 : vector<5x1xf32>
    %1284 = arith.negf %1283 : vector<5x1xf32>
    %1285 = math.exp %1284 : vector<5x1xf32>
    %cst_443 = arith.constant 1.000000e+00 : f32
    %1286 = vector.broadcast %cst_443 : f32 to vector<5x1xf32>
    %1287 = arith.addf %1286, %1285 : vector<5x1xf32>
    %1288 = arith.divf %1286, %1287 : vector<5x1xf32>
    %1289 = arith.negf %1283 : vector<5x1xf32>
    %1290 = math.exp %1289 : vector<5x1xf32>
    %cst_444 = arith.constant 1.000000e+00 : f32
    %1291 = vector.broadcast %cst_444 : f32 to vector<5x1xf32>
    %1292 = arith.addf %1291, %1290 : vector<5x1xf32>
    %1293 = arith.divf %1291, %1292 : vector<5x1xf32>
    %1294 = arith.addf %1288, %1293 : vector<5x1xf32>
    %1295 = arith.divf %1288, %1294 : vector<5x1xf32>
    %c0_445 = arith.constant 0 : index
    %c5_446 = arith.constant 5 : index
    %1296 = vector.load %arg13[%c0_445, %c5_446] : memref<6x6xf32, #tpu.memory_space<vmem>>, vector<5x1xf32>
    %1297 = arith.cmpf oge, %1296, %1295 : vector<5x1xf32>
    %1298 = arith.extui %1297 : vector<5x1xi1> to vector<5x1xi32>
    %1299 = arith.sitofp %1298 : vector<5x1xi32> to vector<5x1xf32>
    %c5_i32_447 = arith.constant 5 : i32
    %1300 = vector.broadcast %c5_i32_447 : i32 to vector<1x6xi32>
    %1301 = arith.cmpi eq, %9, %1300 : vector<1x6xi32>
    %1302 = arith.extui %1301 : vector<1x6xi1> to vector<1x6xi32>
    %1303 = arith.sitofp %1302 : vector<1x6xi32> to vector<1x6xf32>
    %cst_448 = arith.constant 0.000000e+00 : f32
    %1304 = vector.broadcast %cst_448 : f32 to vector<1x1xf32>
    %1305 = tpu.concatenate %1299, %1304 in 0 : vector<5x1xf32>, vector<1x1xf32> -> vector<6x1xf32>
    %1306 = vector.broadcast %1305 : vector<6x1xf32> to vector<6x6xf32>
    %1307 = vector.broadcast %1303 : vector<1x6xf32> to vector<6x6xf32>
    %1308 = arith.mulf %1306, %1307 : vector<6x6xf32>
    %1309 = arith.addf %1070, %1308 : vector<6x6xf32>
    %1310 = arith.maximumf %1283, %1283 : vector<5x1xf32>
    %1311 = arith.subf %1283, %1310 : vector<5x1xf32>
    %1312 = math.exp %1311 : vector<5x1xf32>
    %1313 = arith.subf %1283, %1310 : vector<5x1xf32>
    %1314 = math.exp %1313 : vector<5x1xf32>
    %1315 = arith.addf %1312, %1314 : vector<5x1xf32>
    %1316 = math.log %1315 : vector<5x1xf32>
    %1317 = arith.addf %1310, %1316 : vector<5x1xf32>
    %cst_449 = arith.constant 5.000000e-01 : f32
    %1318 = vector.broadcast %cst_449 : f32 to vector<5x1xf32>
    %1319 = arith.cmpf ogt, %1299, %1318 : vector<5x1xf32>
    %1320 = arith.select %1319, %1283, %1283 : vector<5x1xi1>, vector<5x1xf32>
    %1321 = arith.subf %1320, %1317 : vector<5x1xf32>
    %cst_450 = arith.constant dense<0.000000e+00> : vector<1xf32>
    %1322 = vector.multi_reduction <add>, %1321, %cst_450 [0] : vector<5x1xf32> to vector<1xf32>
    %1323 = vector.shape_cast %1322 : vector<1xf32> to vector<1x1xf32>
    %cst_451 = arith.constant 0.000000e+00 : f32
    %1324 = vector.broadcast %cst_451 : f32 to vector<1x1xf32>
    %1325 = arith.subf %1324, %1323 : vector<1x1xf32>
    %cst_452 = arith.constant 2.000000e-01 : f32
    %1326 = vector.broadcast %cst_452 : f32 to vector<1x1xf32>
    %1327 = arith.mulf %1325, %1326 : vector<1x1xf32>
    %1328 = arith.addf %1217, %1327 : vector<1x1xf32>
    %1329 = math.exp %1327 : vector<1x1xf32>
    %1330 = arith.mulf %1327, %1329 : vector<1x1xf32>
    %1331 = arith.addf %1220, %1330 : vector<1x1xf32>
    %cst_453 = arith.constant 1.66666663 : f32
    %1332 = vector.broadcast %cst_453 : f32 to vector<5x1xf32>
    %1333 = arith.mulf %1288, %1332 : vector<5x1xf32>
    %1334 = math.log %1333 : vector<5x1xf32>
    %1335 = arith.mulf %1288, %1334 : vector<5x1xf32>
    %cst_454 = arith.constant 2.500000e+00 : f32
    %1336 = vector.broadcast %cst_454 : f32 to vector<5x1xf32>
    %1337 = arith.mulf %1293, %1336 : vector<5x1xf32>
    %1338 = math.log %1337 : vector<5x1xf32>
    %1339 = arith.mulf %1293, %1338 : vector<5x1xf32>
    %1340 = arith.addf %1335, %1339 : vector<5x1xf32>
    %cst_455 = arith.constant dense<0.000000e+00> : vector<1xf32>
    %1341 = vector.multi_reduction <add>, %1340, %cst_455 [0] : vector<5x1xf32> to vector<1xf32>
    %1342 = vector.shape_cast %1341 : vector<1xf32> to vector<1x1xf32>
    %1343 = arith.addf %1104, %1342 : vector<1x1xf32>
    %c0_456 = arith.constant 0 : index
    %c0_457 = arith.constant 0 : index
    %1344 = vector.load %arg14[%c0_456, %c0_457] : memref<1x6xi32, #tpu.memory_space<vmem>>, vector<1x6xi32>
    tpu.vector_store %arg14[%c0_456, %c0_457], %1209 {strides = array<i32>} : memref<1x6xi32, #tpu.memory_space<vmem>>, vector<1x6xi32>,
    %1345 = arith.fptosi %1309 : vector<6x6xf32> to vector<6x6xi32>
    %c0_458 = arith.constant 0 : index
    %c0_459 = arith.constant 0 : index
    %1346 = vector.load %arg15[%c0_458, %c0_459] : memref<6x6xi32, #tpu.memory_space<vmem>>, vector<6x6xi32>
    tpu.vector_store %arg15[%c0_458, %c0_459], %1345 {strides = array<i32>} : memref<6x6xi32, #tpu.memory_space<vmem>>, vector<6x6xi32>,
    %1347 = tpu.concatenate %1328, %1331, %1343 in 1 : vector<1x1xf32>, vector<1x1xf32>, vector<1x1xf32> -> vector<1x3xf32>
    %c0_460 = arith.constant 0 : index
    %c0_461 = arith.constant 0 : index
    %1348 = vector.load %arg16[%c0_460, %c0_461] : memref<1x3xf32, #tpu.memory_space<vmem>>, vector<1x3xf32>
    tpu.vector_store %arg16[%c0_460, %c0_461], %1347 {strides = array<i32>} : memref<1x3xf32, #tpu.memory_space<vmem>>, vector<1x3xf32>,
    return
  }
}

</mosaic_0001>

<bundles_post_ra>
// kernel: _forward_impl.3
= control target key start
LH: loop header
LB: loop body
LE: loop exit
PB: predicated region body
PF: predicated region fallthrough
CT: control target
= control target key end

     0   :  { %s9529_s0 = inlined_call_operand.vmem [shape: f32[1,32], index: 0, kind: input, shape index: {}]   ;;  %s9530_s1 = inlined_call_operand.vmem [shape: f32[2,64,128], index: 1, kind: input, shape index: {}]   ;;  %s9531_s2 = inlined_call_operand.vmem [shape: f32[2,1,128], index: 2, kind: input, shape index: {}]   ;;  %s9532_s3 = inlined_call_operand.vmem [shape: f32[32,4], index: 3, kind: input, shape index: {}]   ;;  %s9533_s4 = inlined_call_operand.vmem [shape: f32[1,4], index: 4, kind: input, shape index: {}]   ;;  %s9534_s5 = inlined_call_operand.vmem [shape: f32[4,32], index: 5, kind: input, shape index: {}]   ;;  %s9535_s6 = inlined_call_operand.vmem [shape: f32[32,32], index: 6, kind: input, shape index: {}]   ;;  %s9536_s7 = inlined_call_operand.vmem [shape: f32[1,32], index: 7, kind: input, shape index: {}]   ;;  %s9537_s8 = inlined_call_operand.vmem [shape: f32[32,32], index: 8, kind: input, shape index: {}]   ;;  %s9538_s9 = inlined_call_operand.vmem [shape: f32[1,32], index: 9, kind: input, shape index: {}]   ;;  %s9539_s10 = inlined_call_operand.vmem [shape: f32[32,1], index: 10, kind: input, shape index: {}]   ;;  %s9540_s11 = inlined_call_operand.<no memory space> [shape: f32[1,1], index: 11, kind: input, shape index: {}]   ;;  %s9541_s12 = inlined_call_operand.vmem [shape: f32[1,6], index: 12, kind: input, shape index: {}]   ;;  %s9542_s13 = inlined_call_operand.vmem [shape: f32[6,6], index: 13, kind: input, shape index: {}]   ;;  %s9543_s14 = inlined_call_operand.hbm [shape: s32[1,6], index: 14, kind: output, shape index: {0}]   ;;  %s9544_s15 = inlined_call_operand.hbm [shape: s32[6,6], index: 15, kind: output, shape index: {1}]   ;;  %s9545_s16 = inlined_call_operand.hbm [shape: f32[1,3], index: 16, kind: output, shape index: {2}]  }
   0x1   :  { %9576 = sst [smem:[#allocation24_spill]] %s9529_s0  ;;  %v22_v0 = vstv %s9540_s11 }
   0x2   :  { %23 = vst [vmem:[#allocation2] sm:$0x1] %v22_v0 }
   0x3   :  { %24 = vsyncpa [#allocation4], 0  ;;  %v57_v1 = vld [vmem:[%s9530_s1] sm:$0xff]  ;;  %v58_v2 = vld [vmem:[%s9530_s1 + $0x8] sm:$0xff]  ;;  %v9550_v4 = vmov 0.0|0.0   ;;  %vm7853_vm0 = vmmov 0  }
   0x4   :  { %v59_v3 = vld [vmem:[%s9530_s1 + $0x10] sm:$0xff]  ;;  %6936 = vmatprep.subr.bf16.mxu0 %v9550_v4  ;;  %v7972_v5 = vpack.c.bf16 %v58_v2, %v57_v1  ;;  %v60_v6 = vld [vmem:[%s9530_s1 + $0x18] sm:$0xff]  ;;  %v9552_v7 = vmov 0.0   ;;  %6948 = vmatprep.subr.bf16.mxu1 %v9550_v4 }
   0x5   :  { %6235 = vmatprep.mubr.msk.f32.mxu0 %vm7853_vm0, %v9552_v7  ;;  %6254 = vmatprep.mubr.msk.f32.mxu1 %vm7853_vm0, %v9552_v7  ;;  %v7983_v8 = vpack.c.bf16 %v60_v6, %v59_v3 }
   0x6   :  { %6938 = vmatpush3.bf16.msra.mxu0 %v7972_v5 }
   0x7   :  { %25 = vsyncpa [#allocation6], 0  ;;  %6939 = vmatprep.subr.bf16.mxu0 %v9550_v4  ;;  %v61_v9 = vld [vmem:[%s9530_s1 + $0x20] sm:$0xff]  ;;  %v62_v10 = vld [vmem:[%s9530_s1 + $0x28] sm:$0xff]  ;;  %s9577_s25 = sld [smem:[#allocation24_spill]]  ;;  %vm66_vm1 = vcmask 261120  }
   0x8   :  { %v7993_v11 = vpack.c.bf16 %v62_v10, %v61_v9  ;;  %v63_v12 = vld [vmem:[%s9530_s1 + $0x30] sm:$0xff]  ;;  %v64_v13 = vld [vmem:[%s9530_s1 + $0x38] sm:$0xff]  ;;  %vm68_vm2 = vcmask 523264   ;;  %v8021_v17 = vld [vmem:[%s9531_s2] sm:$0x1]  ;;  %s7855_s28 = smov 64  }
   0x9   :  { %v8003_v14 = vpack.c.bf16 %v64_v13, %v63_v12  ;;  %s7856_s11 = smov 32   ;;  %v5777_v31 = vld [vmem:[%s9530_s1 + $0x40] sm:$0xff]  ;;  %v5778_v32 = vld [vmem:[%s9530_s1 + $0x48] sm:$0xff]  ;;  %v5779_v33 = vld [vmem:[%s9530_s1 + $0x50] sm:$0xff]  ;;  %vm365_vm3 = vcmask 24576   ;;  %s7858_s26 = smov 126  }
   0xa   :  { %6941 = vmatpush3.bf16.msra.mxu0 %v7983_v8  ;;  %v8038_v34 = vpack.c.bf16 %v5778_v32, %v5777_v31  ;;  %v5780_v35 = vld [vmem:[%s9530_s1 + $0x58] sm:$0xff]  ;;  %v5781_v37 = vld [vmem:[%s9530_s1 + $0x60] sm:$0xff]  ;;  %v5782_v38 = vld [vmem:[%s9530_s1 + $0x68] sm:$0xff]  ;;  %v9548_v32 = vmov 0   ;;  %s7859_s27 = smov 127   ;;  %vm417_vm7 = vcmask 1043456  }
   0xb   :  { %6942 = vmatprep.subr.bf16.mxu0 %v9550_v4  ;;  %v8044_v36 = vpack.c.bf16 %v5780_v35, %v5779_v33  ;;  %v8054_v39 = vpack.c.bf16 %v5782_v38, %v5781_v37  ;;  %v5783_v40 = vld [vmem:[%s9530_s1 + $0x70] sm:$0xff]  ;;  %v5784_v41 = vld [vmem:[%s9530_s1 + $0x78] sm:$0xff]  ;;  %v8081_v48 = vld [vmem:[%s9531_s2 + $0x1] sm:$0x1]  ;;  %7374 = vset.pattern.permute.xlu0 %v9548_v32  ;;  %vm413_vm8 = vcmask 31744   ;;  %s7863_s22 = smov 2  }
   0xc   :  { %6950 = vmatpush3.bf16.msra.mxu1 %v8038_v34  ;;  %v8065_v43 = vpack.c.bf16 %v5784_v41, %v5783_v40  ;;  %v279_v62 = vld [vmem:[%s9532_s3] sm:$0xff]  ;;  %v280_v63 = vld [vmem:[%s9532_s3 + $0x8] sm:$0xff]  ;;  %v281_v0 = vld [vmem:[%s9532_s3 + $0x10] sm:$0xff]  ;;  %s7865_s1 = smov 3   ;;  %s7871_s18 = smov [#allocation3]  }
   0xd   :  { %v8009_v15 = vld [vmem:[%s9577_s25] sm:$0x1]  ;;  %6951 = vmatprep.subr.bf16.mxu1 %v9550_v4  ;;  %v8098_v1 = vpack.c.bf16 %v280_v63, %v279_v62  ;;  %v282_v2 = vld [vmem:[%s9532_s3 + $0x18] sm:$0xff] }
   0xe   :  { %6944 = vmatpush3.bf16.msra.mxu0 %v7993_v11  ;;  %v67_v16 = vsel %vm66_vm1, %v8009_v15, 0.0  ;;  %v8104_v3 = vpack.c.bf16 %v282_v2, %v281_v0  ;;  %v8128_v13 = vld [vmem:[%s9533_s4] sm:$0x1] }
   0xf   :  { %6945 = vmatprep.subr.bf16.mxu0 %v9550_v4  ;;  %v8151_v38 = vld [vmem:[%s9541_s12] sm:$0x1] }
  0x10   :  { %6953 = vmatpush3.bf16.msra.mxu1 %v8044_v36 }
  0x11   :  { %6954 = vmatprep.subr.bf16.mxu1 %v9550_v4 }
  0x12   :  { %6947 = vmatpush3.bf16.msra.mxu0 %v8003_v14 }
  0x13   :  { %6960 = vmatprep.subr.bf16.mxu0 %v9550_v4 }
  0x14   :  { %6956 = vmatpush3.bf16.msra.mxu1 %v8054_v39 }
  0x15   :  { %6236 = vmatmul.mubr.msk.f32.vlgmr.msra.gmra.mrb[0].mxu0 %vm68_vm2, %v67_v16  ;;  %6957 = vmatprep.subr.bf16.mxu1 %v9550_v4 }
  0x16   :  { %6265 = vmatprep.mubr.msk.f32.mxu0 %vm7853_vm0, %v9552_v7  ;;  %6962 = vmatpush3.bf16.msra.mxu0 %v8098_v1 }
  0x17   :  { %6963 = vmatprep.subr.bf16.mxu0 %v9550_v4 }
  0x18   :  { %6959 = vmatpush3.bf16.msra.mxu1 %v8065_v43 }
  0x19   :  { %6268 = vmatprep.subr.mxu1 %v9552_v7 }
  0x1a   :  { %6965 = vmatpush3.bf16.msra.mxu0 %v8104_v3 }
  0x1b   :  { %6978 = vmatprep.subr.bf16.mxu0 %v9550_v4 }
  0xe8   :  { %v138_v18 = vpop.f32.mrb[0].mxu0 }
  0xe9   :  { %v139_v19 = vadd.f32 %v138_v18, %v8021_v17  ;;  %v6237_v20 = vpop.f32.mrb[1].mxu0 }
  0xeb   :  { %7389 = vtanh.f32 %v139_v19  ;;  %v5776_v22 = vmul.f32 -1.442695, %v139_v19 }
  0xed   :  { %7391 = vpow2.f32 %v5776_v22 }
  0xf5   :  { %v7390_v21 = vpop.eup %7389 }
  0xf6   :  { %151 = vrot.lane.b32.xlu0 %v7390_v21, %s7855_s28 }
  0xf7   :  { %v7392_v23 = vpop.eup %7391 }
  0xf8   :  { %v145_v24 = vadd.f32 1.0, %v7392_v23 }
  0xfa   :  { %7393 = vrcp.f32 %v145_v24 }
 0x104   :  { %v7394_v25 = vpop.eup %7393 }
 0x105   :  { %v149_v28 = vmul.f32 0.0, %v7394_v25 }
 0x168   :  { %v152_v26 = vpop.permute.xlu0 %151 }
 0x169   :  { %v154_v27 = vmul.f32 %v7394_v25, %v152_v26 }
 0x16b   :  { %156 = vrot.lane.b32.xlu0 %v154_v27, %s7856_s11 }
 0x1dd   :  { %v157_v29 = vpop.permute.xlu0 %156 }
 0x1de   :  { %v8026_v30 = vadd.f32 %v157_v29, %v149_v28 }
 0x1e0   :  { %7395 = vtanh.f32 %v8026_v30 }
 0x1ea   :  { %v7396_v42 = vpop.eup %7395 }
 0x1eb   :  { %162 = vrot.lane.b32.xlu1 %v7396_v42, %s7855_s28 }
 0x25d   :  { %v163_v44 = vpop.permute.xlu1 %162 }
 0x25e   :  { %v8070_v45 = vmul.f32 %v7394_v25, %v163_v44 }
 0x260   :  { %178 = vrot.lane.b32.xlu1 %v8070_v45, %s7856_s11 }
 0x2d2   :  { %v179_v46 = vpop.permute.xlu1 %178 }
 0x2d3   :  { %v181_v47 = vsel %vm66_vm1, %v179_v46, 0.0 }
 0x2d4   :  { %6255 = vmatmul.mubr.msk.f32.vlgmr.msra.gmra.mrb[0].mxu1 %vm68_vm2, %v181_v47 }
 0x2d5   :  { %6270 = vmatprep.mubr.msk.f32.mxu1 %vm7853_vm0, %v9552_v7 }
 0x3a7   :  { %v251_v49 = vpop.f32.mrb[0].mxu1 }
 0x3a8   :  { %v252_v50 = vadd.f32 %v8081_v48, %v251_v49  ;;  %v6256_v51 = vpop.f32.mrb[1].mxu1 }
 0x3a9   :  { %v8162_v51 = vld [vmem:[%s9534_s5] sm:$0xf] }
 0x3aa   :  { %7397 = vtanh.f32 %v252_v50  ;;  %v5787_v53 = vmul.f32 -1.442695, %v252_v50  ;;  %6269 = vmatpush3.msk.msra.mxu1 %vm417_vm7, %v8162_v51 }
 0x3ab   :  { %6966 = vmatprep.subr.bf16.mxu1 %v9550_v4 }
 0x3ac   :  { %7399 = vpow2.f32 %v5787_v53 }
 0x3b4   :  { %v7398_v52 = vpop.eup %7397 }
 0x3b5   :  { %264 = vrot.lane.b32.xlu0 %v7398_v52, %s7855_s28  ;;  %v55_v52 = vlaneseq }
 0x3b6   :  { %v7400_v54 = vpop.eup %7399 }
 0x3b7   :  { %v258_v55 = vadd.f32 1.0, %v7400_v54  ;;  %v8167_v53 = vshrl.u32 %v55_v52, 7 }
 0x3b9   :  { %7401 = vrcp.f32 %v258_v55  ;;  %v8170_v54 = vsub.s32 0, %v8167_v53 }
 0x3c3   :  { %v7402_v56 = vpop.eup %7401 }
 0x3c4   :  { %v262_v59 = vmul.f32 0.0, %v7402_v56 }
 0x427   :  { %v265_v57 = vpop.permute.xlu0 %264 }
 0x428   :  { %v267_v58 = vmul.f32 %v7402_v56, %v265_v57 }
 0x42a   :  { %269 = vrot.lane.b32.xlu1 %v267_v58, %s7856_s11 }
 0x49c   :  { %v270_v60 = vpop.permute.xlu1 %269 }
 0x49d   :  { %v8086_v61 = vadd.f32 %v270_v60, %v262_v59 }
 0x49f   :  { %7403 = vtanh.f32 %v8086_v61 }
 0x4a9   :  { %v7404_v6 = vpop.eup %7403 }
 0x4aa   :  { %275 = vrot.lane.b32.xlu0 %v7404_v6, %s7855_s28 }
 0x51c   :  { %v276_v9 = vpop.permute.xlu0 %275 }
 0x51d   :  { %v8110_v10 = vmul.f32 %v7402_v56, %v276_v9  ;;  %v8172_v56 = vand.u32 127, %v55_v52 }
 0x51f   :  { %285 = vrot.lane.b32.xlu1 %v8110_v10, %s7856_s11  ;;  %vm409_vm13 = vcmp.eq.s32.totalorder %v8172_v56, 0  ;;  %vm9569_vm14 = vcmp.eq.s32.totalorder %v8172_v56, 1 }
 0x591   :  { %v286_v12 = vpop.permute.xlu1 %285 }
 0x592   :  { %6266 = vmatmul.mubr.msk.f32.vlgmr.msra.gmra.mrb[2].mxu0 %vm66_vm1, %v286_v12 }
 0x593   :  { %6980 = vmatpush3.bf16.msra.mxu0 %v8038_v34  ;;  %6308 = vmatprep.mubr.msk.f32.mxu0 %vm7853_vm0, %v9552_v7 }
 0x594   :  { %6981 = vmatprep.subr.bf16.mxu0 %v9550_v4 }
 0x597   :  { %6983 = vmatpush3.bf16.msra.mxu0 %v8044_v36 }
 0x598   :  { %6984 = vmatprep.subr.bf16.mxu0 %v9550_v4 }
 0x59b   :  { %6986 = vmatpush3.bf16.msra.mxu0 %v8054_v39 }
 0x59c   :  { %6987 = vmatprep.subr.bf16.mxu0 %v9550_v4 }
 0x59f   :  { %6989 = vmatpush3.bf16.msra.mxu0 %v8065_v43 }
 0x5a0   :  { %6996 = vmatprep.subr.bf16.mxu0 %v9550_v4 }
 0x665   :  { %v355_v16 = vpop.f32.mrb[2].mxu0 }
 0x666   :  { %v356_v18 = vadd.f32 %v355_v16, %v8128_v13  ;;  %v6267_v19 = vpop.f32.mrb[3].mxu0 }
 0x668   :  { %v360_v20 = vmul.f32 0.2, %v356_v18 }
 0x66a   :  { %7405 = vtanh.f32 %v360_v20 }
 0x674   :  { %v7406_v21 = vpop.eup %7405 }
 0x675   :  { %v362_v22 = vmul.f32 2.5, %v7406_v21 }
 0x677   :  { %7407 = vrcp.f32 %v362_v22 }
 0x681   :  { %v7408_v23 = vpop.eup %7407 }
 0x682   :  { %v8131_v24 = vmul.f32 %v7408_v23, %v360_v20 }
 0x684   :  { %v366_v25 = vsel %vm365_vm3, %v8131_v24, -inf }
 0x685   :  { %367 = vmax.xlane.f32.xlu0 %v366_v25 }
 0x712   :  { %v8135_v26 = vpop.xlane.xlu0 %367 }
 0x713   :  { %v369_v27 = vsub.f32 %v8131_v24, %v8135_v26 }
 0x715   :  { %v370_v28 = vmul.f32 1.442695, %v369_v27 }
 0x717   :  { %7409 = vpow2.f32 %v370_v28 }
 0x721   :  { %v7410_v29 = vpop.eup %7409 }
 0x722   :  { %v372_v31 = vsel %vm365_vm3, %v7410_v29, 0.0 }
 0x723   :  { %373 = vadd.xlane.f32.xlu1 %v372_v31 }
 0x7b0   :  { %v8141_v33 = vpop.xlane.xlu1 %373 }
 0x7b1   :  { %7411 = vrcp.f32 %v8141_v33 }
 0x7bb   :  { %v7412_v35 = vpop.eup %7411 }
 0x7bc   :  { %v376_v37 = vmul.f32 %v7412_v35, %v7410_v29 }
 0x7be   :  { %387 = vrot.lane.b32.xlu1 %v376_v37, %s7858_s26  ;;  %383 = vrot.lane.b32.xlu0 %v376_v37, %s7859_s27  ;;  %vm391_vm4 = vcmp.ge.f32.partialorder %v8151_v38, %v376_v37 }
 0x7bf   :  { %v392_v46 = vsel %vm391_vm4, 1, %v9548_v32  ;;  %vm1644_vm4 = vcmask 1040384  }
 0x7c2   :  { %501 = vrot.lane.b32.xlu1 %v8070_v45, %s7855_s28 }
 0x830   :  { %v384_v40 = vpop.permute.xlu0 %383  ;;  %v388_v42 = vpop.permute.xlu1 %387 }
 0x831   :  { %v386_v41 = vadd.f32 %v384_v40, %v376_v37 }
 0x833   :  { %v390_v44 = vadd.f32 %v388_v42, %v386_v41  ;;  %vm393_vm5 = vcmp.ge.f32.partialorder %v8151_v38, %v386_v41 }
 0x834   :  { %v394_v47 = vsel %vm393_vm5, 1, %v9548_v32  ;;  %v502_v59 = vpop.permute.xlu1 %501 }
 0x835   :  { %v395_v49 = vadd.s32 %v394_v47, %v392_v46  ;;  %vm396_vm6 = vcmp.ge.f32.partialorder %v8151_v38, %v390_v44 }
 0x836   :  { %v397_v45 = vsel %vm396_vm6, 1, %v9548_v32 }
 0x837   :  { %v398_v50 = vadd.s32 %v397_v45, %v395_v49 }
 0x839   :  { %400 = vperm.xlu0 %7374, %v398_v50  }
 0x8b8   :  { %v401_v55 = vpop.permute.xlu0 %400 }
 0x8b9   :  { %v8175_v57 = vrot.slane %v401_v55, %v8170_v54 }
 0x8bb   :  { %vm406_vm9 = vcmp.eq.s32.totalorder %v8172_v56, %v8175_v57 }
 0x8bc   :  { %v8180_v58 = vsel %vm406_vm9, 1.0, %v9552_v7 }
 0x8bd   :  { %6271 = vmatmul.mubr.msk.f32.vlgmr.msra.gmra.mrb[2].mxu1 %vm413_vm8, %v8180_v58 }
 0x8be   :  { %6968 = vmatpush3.bf16.msra.mxu1 %v7972_v5  ;;  %6289 = vmatprep.mubr.msk.f32.mxu1 %vm7853_vm0, %v9552_v7 }
 0x8bf   :  { %6969 = vmatprep.subr.bf16.mxu1 %v9550_v4 }
 0x8c2   :  { %6971 = vmatpush3.bf16.msra.mxu1 %v7983_v8 }
 0x8c3   :  { %6972 = vmatprep.subr.bf16.mxu1 %v9550_v4 }
 0x8c6   :  { %6974 = vmatpush3.bf16.msra.mxu1 %v7993_v11 }
 0x8c7   :  { %6975 = vmatprep.subr.bf16.mxu1 %v9550_v4 }
 0x8ca   :  { %6977 = vmatpush3.bf16.msra.mxu1 %v8003_v14 }
 0x8cb   :  { %6990 = vmatprep.subr.bf16.mxu1 %v9550_v4 }
 0x990   :  { %v487_v60 = vpop.f32.mrb[2].mxu1 }
 0x991   :  { %v504_v62 = vsel %vm66_vm1, %v487_v60, %v502_v59  ;;  %v6272_v63 = vpop.f32.mrb[3].mxu1 }
 0x992   :  { %6290 = vmatmul.mubr.msk.f32.vlgmr.msra.gmra.mrb[4].mxu1 %vm68_vm2, %v504_v62 }
 0x993   :  { %6319 = vmatprep.mubr.msk.f32.mxu1 %vm7853_vm0, %v9552_v7 }
 0xa65   :  { %v574_v0 = vpop.f32.mrb[4].mxu1 }
 0xa66   :  { %v575_v2 = vadd.f32 %v574_v0, %v8021_v17  ;;  %v6291_v6 = vpop.f32.mrb[5].mxu1 }
 0xa68   :  { %7413 = vtanh.f32 %v575_v2  ;;  %v5793_v12 = vmul.f32 -1.442695, %v575_v2 }
 0xa6a   :  { %7415 = vpow2.f32 %v5793_v12 }
 0xa72   :  { %v7414_v9 = vpop.eup %7413 }
 0xa73   :  { %587 = vrot.lane.b32.xlu1 %v7414_v9, %s7855_s28 }
 0xa74   :  { %v7416_v16 = vpop.eup %7415 }
 0xa75   :  { %v581_v18 = vadd.f32 1.0, %v7416_v16 }
 0xa77   :  { %7417 = vrcp.f32 %v581_v18 }
 0xa81   :  { %v7418_v19 = vpop.eup %7417 }
 0xa82   :  { %v585_v22 = vmul.f32 %v7418_v19, %v8026_v30 }
 0xae5   :  { %v588_v20 = vpop.permute.xlu1 %587 }
 0xae6   :  { %v590_v21 = vmul.f32 %v7418_v19, %v588_v20 }
 0xae8   :  { %592 = vrot.lane.b32.xlu0 %v590_v21, %s7856_s11 }
 0xb5a   :  { %v593_v23 = vpop.permute.xlu0 %592 }
 0xb5b   :  { %v8202_v25 = vadd.f32 %v593_v23, %v585_v22  ;;  %v707_v23 = vld [vmem:[%s9535_s6] sm:$0xff] }
 0xb5d   :  { %7419 = vtanh.f32 %v8202_v25 }
 0xb67   :  { %v7420_v27 = vpop.eup %7419 }
 0xb68   :  { %598 = vrot.lane.b32.xlu1 %v7420_v27, %s7855_s28  ;;  %v709_v27 = vld [vmem:[%s9535_s6 + $0x10] sm:$0xff] }
 0xb6c   :  { %606 = vrot.lane.b32.xlu1 %v8110_v10, %s7855_s28 }
 0xbda   :  { %v599_v28 = vpop.permute.xlu1 %598 }
 0xbdb   :  { %v601_v29 = vmul.f32 %v7418_v19, %v599_v28 }
 0xbdd   :  { %603 = vrot.lane.b32.xlu0 %v601_v29, %s7856_s11 }
 0xbde   :  { %v607_v31 = vpop.permute.xlu1 %606 }
 0xbe1   :  { %787 = vrot.lane.b32.xlu0 %v601_v29, %s7855_s28 }
 0xc4f   :  { %v604_v35 = vpop.permute.xlu0 %603 }
 0xc50   :  { %v609_v30 = vsel %vm66_vm1, %v604_v35, %v607_v31 }
 0xc51   :  { %6309 = vmatmul.mubr.msk.f32.vlgmr.msra.gmra.mrb[4].mxu0 %vm68_vm2, %v609_v30 }
 0xc52   :  { %6998 = vmatpush3.bf16.msra.mxu0 %v7972_v5  ;;  %6338 = vmatprep.mubr.msk.f32.mxu0 %vm7853_vm0, %v9552_v7 }
 0xc53   :  { %6999 = vmatprep.subr.bf16.mxu0 %v9550_v4  ;;  %v788_v10 = vpop.permute.xlu0 %787 }
 0xc54   :  { %v790_v37 = vsel %vm66_vm1, %v8009_v15, %v788_v10 }
 0xc56   :  { %7001 = vmatpush3.bf16.msra.mxu0 %v7983_v8 }
 0xc57   :  { %7002 = vmatprep.subr.bf16.mxu0 %v9550_v4 }
 0xc5a   :  { %7004 = vmatpush3.bf16.msra.mxu0 %v7993_v11 }
 0xc5b   :  { %7005 = vmatprep.subr.bf16.mxu0 %v9550_v4 }
 0xc5e   :  { %7007 = vmatpush3.bf16.msra.mxu0 %v8003_v14 }
 0xc5f   :  { %7020 = vmatprep.subr.bf16.mxu0 %v9550_v4 }
 0xc61   :  { %6339 = vmatmul.mubr.msk.f32.vlgmr.msra.gmra.mrb[6].mxu0 %vm68_vm2, %v790_v37 }
 0xc62   :  { %7022 = vmatpush3.bf16.msra.mxu0 %v8098_v1  ;;  %6368 = vmatprep.mubr.msk.f32.mxu0 %vm7853_vm0, %v9552_v7 }
 0xc63   :  { %7023 = vmatprep.subr.bf16.mxu0 %v9550_v4 }
 0xc66   :  { %7025 = vmatpush3.bf16.msra.mxu0 %v8104_v3 }
 0xc67   :  { %7026 = vmatprep.subr.bf16.mxu0 %v9550_v4 }
 0xd24   :  { %v679_v40 = vpop.f32.mrb[4].mxu0 }
 0xd25   :  { %v680_v41 = vadd.f32 %v8081_v48, %v679_v40  ;;  %v6310_v42 = vpop.f32.mrb[5].mxu0 }
 0xd27   :  { %7421 = vtanh.f32 %v680_v41  ;;  %v5795_v45 = vmul.f32 -1.442695, %v680_v41 }
 0xd31   :  { %v7422_v44 = vpop.eup %7421 }
 0xd32   :  { %692 = vrot.lane.b32.xlu1 %v7422_v44, %s7855_s28 }
 0xd34   :  { %v860_v15 = vpop.f32.mrb[6].mxu0 }
 0xd35   :  { %v861_v46 = vadd.f32 %v860_v15, %v8021_v17  ;;  %v6340_v47 = vpop.f32.mrb[7].mxu0 }
 0xd37   :  { %7423 = vtanh.f32 %v861_v46  ;;  %v5798_v52 = vmul.f32 -1.442695, %v861_v46 }
 0xd38   :  { %7425 = vpow2.f32 %v5795_v45 }
 0xd39   :  { %7427 = vpow2.f32 %v5798_v52 }
 0xd41   :  { %v7424_v49 = vpop.eup %7423 }
 0xd42   :  { %873 = vrot.lane.b32.xlu0 %v7424_v49, %s7855_s28  ;;  %v7426_v50 = vpop.eup %7425 }
 0xd43   :  { %v686_v55 = vadd.f32 1.0, %v7426_v50  ;;  %v7428_v59 = vpop.eup %7427 }
 0xd44   :  { %v867_v0 = vadd.f32 1.0, %v7428_v59 }
 0xd45   :  { %7429 = vrcp.f32 %v686_v55 }
 0xd46   :  { %7431 = vrcp.f32 %v867_v0 }
 0xd4f   :  { %v7430_v60 = vpop.eup %7429 }
 0xd50   :  { %v7432_v2 = vpop.eup %7431  ;;  %v690_v12 = vmul.f32 %v7430_v60, %v8086_v61  ;;  %v708_v61 = vld [vmem:[%s9535_s6 + $0x8] sm:$0xff] }
 0xd51   :  { %v871_v20 = vmul.f32 %v7432_v2, %v8202_v25  ;;  %v8252_v28 = vpack.c.bf16 %v708_v61, %v707_v23  ;;  %v710_v25 = vld [vmem:[%s9535_s6 + $0x18] sm:$0xff]  ;;  %s7861_s6 = smov 1  }
 0xd52   :  { %v8258_v29 = vpack.c.bf16 %v710_v25, %v709_v27 }
 0xd53   :  { %6992 = vmatpush3.bf16.msra.mxu1 %v8252_v28 }
 0xd54   :  { %6993 = vmatprep.subr.bf16.mxu1 %v9550_v4 }
 0xd57   :  { %6995 = vmatpush3.bf16.msra.mxu1 %v8258_v29 }
 0xd58   :  { %7008 = vmatprep.subr.bf16.mxu1 %v9550_v4 }
 0xda4   :  { %v693_v62 = vpop.permute.xlu1 %692 }
 0xda5   :  { %v695_v63 = vmul.f32 %v7430_v60, %v693_v62 }
 0xda7   :  { %697 = vrot.lane.b32.xlu1 %v695_v63, %s7856_s11 }
 0xdb4   :  { %v874_v6 = vpop.permute.xlu0 %873 }
 0xdb5   :  { %v876_v9 = vmul.f32 %v7432_v2, %v874_v6 }
 0xdb7   :  { %878 = vrot.lane.b32.xlu0 %v876_v9, %s7856_s11 }
 0xe19   :  { %v698_v16 = vpop.permute.xlu1 %697 }
 0xe1a   :  { %v700_v18 = vadd.f32 %v698_v16, %v690_v12 }
 0xe1c   :  { %7433 = vtanh.f32 %v700_v18 }
 0xe26   :  { %v7434_v19 = vpop.eup %7433 }
 0xe27   :  { %703 = vrot.lane.b32.xlu1 %v7434_v19, %s7855_s28 }
 0xe29   :  { %v879_v21 = vpop.permute.xlu0 %878 }
 0xe2a   :  { %v8240_v22 = vadd.f32 %v879_v21, %v871_v20 }
 0xe2c   :  { %7435 = vtanh.f32 %v8240_v22 }
 0xe36   :  { %v7436_v31 = vpop.eup %7435 }
 0xe37   :  { %884 = vrot.lane.b32.xlu0 %v7436_v31, %s7855_s28 }
 0xe99   :  { %v704_v35 = vpop.permute.xlu1 %703 }
 0xe9a   :  { %v8264_v30 = vmul.f32 %v7430_v60, %v704_v35 }
 0xe9c   :  { %713 = vrot.lane.b32.xlu1 %v8264_v30, %s7856_s11 }
 0xea0   :  { %892 = vrot.lane.b32.xlu1 %v8264_v30, %s7855_s28 }
 0xea9   :  { %v885_v10 = vpop.permute.xlu0 %884 }
 0xeaa   :  { %v8270_v37 = vmul.f32 %v7432_v2, %v885_v10 }
 0xeac   :  { %889 = vrot.lane.b32.xlu0 %v8270_v37, %s7856_s11 }
 0xf0e   :  { %v714_v40 = vpop.permute.xlu1 %713 }
 0xf0f   :  { %6320 = vmatmul.mubr.msk.f32.vlgmr.msra.gmra.mrb[6].mxu1 %vm66_vm1, %v714_v40 }
 0xf10   :  { %7010 = vmatpush3.bf16.msra.mxu1 %v8038_v34  ;;  %6357 = vmatprep.mubr.msk.f32.mxu1 %vm7853_vm0, %v9552_v7 }
 0xf11   :  { %7011 = vmatprep.subr.bf16.mxu1 %v9550_v4 }
 0xf12   :  { %v893_v41 = vpop.permute.xlu1 %892 }
 0xf14   :  { %7013 = vmatpush3.bf16.msra.mxu1 %v8044_v36 }
 0xf15   :  { %7014 = vmatprep.subr.bf16.mxu1 %v9550_v4 }
 0xf18   :  { %7016 = vmatpush3.bf16.msra.mxu1 %v8054_v39 }
 0xf19   :  { %7017 = vmatprep.subr.bf16.mxu1 %v9550_v4 }
 0xf1c   :  { %7019 = vmatpush3.bf16.msra.mxu1 %v8065_v43 }
 0xf1d   :  { %6371 = vmatprep.subr.mxu1 %v9552_v7 }
 0xf1e   :  { %v890_v42 = vpop.permute.xlu0 %889 }
 0xf1f   :  { %v895_v44 = vsel %vm66_vm1, %v890_v42, %v893_v41 }
 0xf20   :  { %6358 = vmatmul.mubr.msk.f32.vlgmr.msra.gmra.mrb[8].mxu1 %vm68_vm2, %v895_v44 }
 0xf21   :  { %6372 = vmatpush3.msk.msra.mxu1 %vm417_vm7, %v8162_v51  ;;  %6373 = vmatprep.mubr.msk.f32.mxu1 %vm7853_vm0, %v9552_v7 }
 0xf22   :  { %7038 = vmatprep.subr.bf16.mxu1 %v9550_v4 }
 0xfe2   :  { %v8292_v15 = vpop.f32.mrb[6].mxu1 }
 0xfe3   :  { %v6321_v46 = vpop.f32.mrb[7].mxu1 }
 0xfe4   :  { %v7860_v46 = vmov 1966171168  }
 0xff3   :  { %v965_v47 = vpop.f32.mrb[8].mxu1 }
 0xff4   :  { %v966_v49 = vadd.f32 %v8081_v48, %v965_v47  ;;  %v6359_v45 = vpop.f32.mrb[9].mxu1  ;;  %v1098_v47 = vunpack.c.l.s4 %v7860_v46 }
 0xff6   :  { %7437 = vtanh.f32 %v966_v49  ;;  %v5800_v52 = vmul.f32 -1.442695, %v966_v49  ;;  %v1099_v49 = vunpack.c.0.s8 %v1098_v47 }
 0xff8   :  { %7439 = vpow2.f32 %v5800_v52  ;;  %v8330_v45 = vsub.s32 %v1099_v49, %v8167_v53 }
0x1000   :  { %v7438_v50 = vpop.eup %7437 }
0x1001   :  { %978 = vrot.lane.b32.xlu0 %v7438_v50, %s7855_s28 }
0x1002   :  { %v7440_v55 = vpop.eup %7439 }
0x1003   :  { %v972_v59 = vadd.f32 1.0, %v7440_v55 }
0x1005   :  { %7441 = vrcp.f32 %v972_v59 }
0x100f   :  { %v7442_v60 = vpop.eup %7441 }
0x1010   :  { %v976_v0 = vmul.f32 %v7442_v60, %v700_v18 }
0x1073   :  { %v979_v62 = vpop.permute.xlu0 %978 }
0x1074   :  { %v981_v63 = vmul.f32 %v7442_v60, %v979_v62 }
0x1076   :  { %983 = vrot.lane.b32.xlu1 %v981_v63, %s7856_s11 }
0x10e8   :  { %v984_v2 = vpop.permute.xlu1 %983 }
0x10e9   :  { %v8297_v6 = vadd.f32 %v984_v2, %v976_v0 }
0x10eb   :  { %7443 = vtanh.f32 %v8297_v6 }
0x10f5   :  { %v7444_v9 = vpop.eup %7443 }
0x10f6   :  { %989 = vrot.lane.b32.xlu0 %v7444_v9, %s7855_s28 }
0x1168   :  { %v990_v12 = vpop.permute.xlu0 %989 }
0x1169   :  { %v8301_v16 = vmul.f32 %v7442_v60, %v990_v12  ;;  %v9547_v60 = vmov 1  }
0x116a   :  { %7375 = vset.pattern.permute.xlu1 %v9547_v60  ;;  %7376 = vset.pattern.permute.xlu0 %v9547_v60 }
0x116b   :  { %994 = vrot.lane.b32.xlu1 %v8301_v16, %s7856_s11 }
0x11dd   :  { %v995_v19 = vpop.permute.xlu1 %994 }
0x11de   :  { %6369 = vmatmul.mubr.msk.f32.vlgmr.msra.gmra.mrb[8].mxu0 %vm66_vm1, %v995_v19 }
0x11df   :  { %7028 = vmatpush3.bf16.msra.mxu0 %v7972_v5  ;;  %6392 = vmatprep.mubr.msk.f32.mxu0 %vm7853_vm0, %v9552_v7 }
0x11e0   :  { %7029 = vmatprep.subr.bf16.mxu0 %v9550_v4 }
0x11e3   :  { %7031 = vmatpush3.bf16.msra.mxu0 %v7983_v8 }
0x11e4   :  { %7032 = vmatprep.subr.bf16.mxu0 %v9550_v4 }
0x11e7   :  { %7034 = vmatpush3.bf16.msra.mxu0 %v7993_v11 }
0x11e8   :  { %7035 = vmatprep.subr.bf16.mxu0 %v9550_v4 }
0x11eb   :  { %7037 = vmatpush3.bf16.msra.mxu0 %v8003_v14 }
0x11ec   :  { %7050 = vmatprep.subr.bf16.mxu0 %v9550_v4 }
0x12b1   :  { %v1064_v18 = vpop.f32.mrb[8].mxu0 }
0x12b2   :  { %v1065_v20 = vadd.f32 %v1064_v18, %v8128_v13  ;;  %v6370_v21 = vpop.f32.mrb[9].mxu0 }
0x12b4   :  { %v1068_v23 = vmul.f32 0.2, %v1065_v20 }
0x12b6   :  { %7445 = vtanh.f32 %v1068_v23 }
0x12c0   :  { %v7446_v61 = vpop.eup %7445 }
0x12c1   :  { %v1070_v27 = vmul.f32 2.5, %v7446_v61 }
0x12c3   :  { %7447 = vrcp.f32 %v1070_v27 }
0x12cd   :  { %v7448_v25 = vpop.eup %7447 }
0x12ce   :  { %v8317_v31 = vmul.f32 %v7448_v25, %v1068_v23 }
0x12d0   :  { %9578 = vst [vmem:[#allocation10_spill] sm:$0xff] %v8317_v31  ;;  %v1073_v35 = vsel %vm365_vm3, %v8317_v31, -inf }
0x12d1   :  { %1074 = vmax.xlane.f32.xlu0 %v1073_v35 }
0x135e   :  { %v8321_v10 = vpop.xlane.xlu0 %1074 }
0x135f   :  { %9579 = vst [vmem:[#allocation11_spill] sm:$0xff] %v8321_v10  ;;  %v1076_v40 = vsub.f32 %v8317_v31, %v8321_v10 }
0x1361   :  { %v1077_v41 = vmul.f32 1.442695, %v1076_v40 }
0x1363   :  { %7449 = vpow2.f32 %v1077_v41  ;;  %v1169_v41 = vsel %vm9569_vm14, 1, %v9548_v32  ;;  %vm9574_vm14 = vcmp.eq.s32.totalorder %v8172_v56, 4 }
0x136d   :  { %v7450_v13 = vpop.eup %7449 }
0x136e   :  { %v1079_v42 = vsel %vm365_vm3, %v7450_v13, 0.0 }
0x136f   :  { %1080 = vadd.xlane.f32.xlu1 %v1079_v42 }
0x13fc   :  { %v8326_v44 = vpop.xlane.xlu1 %1080 }
0x13fd   :  { %9580 = vst [vmem:[#allocation12_spill] sm:$0xff] %v8326_v44  ;;  %7451 = vrcp.f32 %v8326_v44 }
0x1407   :  { %v7452_v50 = vpop.eup %7451 }
0x1408   :  { %v1083_v52 = vmul.f32 %v7452_v50, %v7450_v13 }
0x140a   :  { %1093 = vrot.lane.b32.xlu1 %v1083_v52, %s7858_s26  ;;  %1089 = vrot.lane.b32.xlu0 %v1083_v52, %s7859_s27  ;;  %v1103_v55 = vrot.slane %v1083_v52, %v8330_v45 }
0x140c   :  { %v1110_v59 = vrot.slane %v1103_v55, %v8330_v45 }
0x140e   :  { %1111 = vrot.lane.b32.xlu0 %v1110_v59, %s7861_s6 }
0x147c   :  { %v1090_v53 = vpop.permute.xlu0 %1089  ;;  %v1094_v63 = vpop.permute.xlu1 %1093 }
0x147d   :  { %v1092_v62 = vadd.f32 %v1090_v53, %v1083_v52 }
0x147f   :  { %v1096_v0 = vadd.f32 %v1094_v63, %v1092_v62  ;;  %v1123_v2 = vrot.slane %v1092_v62, %v8330_v45 }
0x1480   :  { %v1112_v18 = vpop.permute.xlu0 %1111 }
0x1481   :  { %v1144_v9 = vrot.slane %v1096_v0, %v8330_v45  ;;  %v1130_v12 = vrot.slane %v1123_v2, %v8330_v45  ;;  %vm1114_vm10 = vcmp.ge.f32.partialorder %v8151_v38, %v1112_v18 }
0x1482   :  { %v1115_v21 = vsel %vm1114_vm10, 1, %v9548_v32 }
0x1483   :  { %1131 = vrot.lane.b32.xlu1 %v1130_v12, %s7861_s6  ;;  %v1151_v19 = vrot.slane %v1144_v9, %v8330_v45 }
0x1485   :  { %1152 = vrot.lane.b32.xlu0 %v1151_v19, %s7861_s6 }
0x1489   :  { %1255 = vrot.lane.b32.xlu0 %v8270_v37, %s7855_s28  ;;  %v410_v37 = vsel %vm409_vm13, 1, %v9548_v32  ;;  %vm2634_vm13 = vcmask 1041408  }
0x148a   :  { %v411_v42 = vmul.u32 %v410_v37, %v8175_v57 }
0x14f5   :  { %v1132_v20 = vpop.permute.xlu1 %1131 }
0x14f6   :  { %vm1134_vm11 = vcmp.ge.f32.partialorder %v8151_v38, %v1132_v20 }
0x14f7   :  { %v1135_v23 = vsel %vm1134_vm11, 1, %v9548_v32  ;;  %v1153_v61 = vpop.permute.xlu0 %1152  ;;  %vm9575_vm11 = vcmp.eq.s32.totalorder %v8172_v56, 2 }
0x14f8   :  { %v1136_v27 = vadd.s32 %v1135_v23, %v1115_v21  ;;  %vm1155_vm12 = vcmp.ge.f32.partialorder %v8151_v38, %v1153_v61 }
0x14f9   :  { %v1156_v25 = vsel %vm1155_vm12, 1, %v9548_v32 }
0x14fa   :  { %v1157_v35 = vadd.s32 %v1156_v25, %v1136_v27 }
0x14fb   :  { %v1256_v57 = vpop.permute.xlu0 %1255 }
0x14fc   :  { %1159 = vperm.xlu1 %7375, %v1157_v35  }
0x157b   :  { %v1160_v40 = vpop.permute.xlu1 %1159 }
0x157c   :  { %v1164_v13 = vrot.slane %v1160_v40, %v8170_v54 }
0x157e   :  { %vm1165_vm15 = vcmp.eq.s32.totalorder %v8172_v56, %v1164_v13  ;;  %v1170_v38 = vmul.u32 %v1169_v41, %v1164_v13 }
0x157f   :  { %v8363_v46 = vsel %vm1165_vm15, 1.0, %v9552_v7  ;;  %vm2651_vm15 = vcmask 1024  }
0x1580   :  { %9581 = vst [vmem:[#allocation13_spill] sm:$0xff] %v8363_v46  ;;  %6374 = vmatmul.mubr.msk.f32.vlgmr.msra.gmra.mrb[10].mxu1 %vm413_vm8, %v8363_v46  ;;  %v8367_v47 = vadd.s32 %v1170_v38, %v411_v42 }
0x1581   :  { %7040 = vmatpush3.bf16.msra.mxu1 %v8038_v34  ;;  %6411 = vmatprep.mubr.msk.f32.mxu1 %vm7853_vm0, %v9552_v7 }
0x1582   :  { %7041 = vmatprep.subr.bf16.mxu1 %v9550_v4 }
0x1585   :  { %7043 = vmatpush3.bf16.msra.mxu1 %v8044_v36 }
0x1586   :  { %7044 = vmatprep.subr.bf16.mxu1 %v9550_v4 }
0x1589   :  { %7046 = vmatpush3.bf16.msra.mxu1 %v8054_v39 }
0x158a   :  { %7047 = vmatprep.subr.bf16.mxu1 %v9550_v4 }
0x158d   :  { %7049 = vmatpush3.bf16.msra.mxu1 %v8065_v43 }
0x158e   :  { %7056 = vmatprep.subr.bf16.mxu1 %v9550_v4 }
0x1653   :  { %v1241_v49 = vpop.f32.mrb[10].mxu1 }
0x1654   :  { %v1258_v50 = vsel %vm66_vm1, %v1241_v49, %v1256_v57  ;;  %v6375_v52 = vpop.f32.mrb[11].mxu1 }
0x1655   :  { %6393 = vmatmul.mubr.msk.f32.vlgmr.msra.gmra.mrb[10].mxu0 %vm68_vm2, %v1258_v50 }
0x1656   :  { %6422 = vmatprep.mubr.msk.f32.mxu0 %vm7853_vm0, %v9552_v7 }
0x1728   :  { %v1328_v55 = vpop.f32.mrb[10].mxu0 }
0x1729   :  { %v1329_v59 = vadd.f32 %v1328_v55, %v8021_v17  ;;  %v6394_v53 = vpop.f32.mrb[11].mxu0 }
0x172a   :  { %v1463_v53 = vld [vmem:[%s9537_s8 + $0x10] sm:$0xff] }
0x172b   :  { %7453 = vtanh.f32 %v1329_v59  ;;  %v5806_v63 = vmul.f32 -1.442695, %v1329_v59  ;;  %v1462_v59 = vld [vmem:[%s9537_s8 + $0x8] sm:$0xff] }
0x172d   :  { %7455 = vpow2.f32 %v5806_v63 }
0x1735   :  { %v7454_v62 = vpop.eup %7453 }
0x1736   :  { %1341 = vrot.lane.b32.xlu1 %v7454_v62, %s7855_s28 }
0x1737   :  { %v7456_v0 = vpop.eup %7455 }
0x1738   :  { %v1335_v2 = vadd.f32 1.0, %v7456_v0 }
0x173a   :  { %7457 = vrcp.f32 %v1335_v2 }
0x1744   :  { %v7458_v9 = vpop.eup %7457 }
0x1745   :  { %v1339_v18 = vmul.f32 %v7458_v9, %v8240_v22 }
0x17a8   :  { %v1342_v12 = vpop.permute.xlu1 %1341 }
0x17a9   :  { %v1344_v19 = vmul.f32 %v7458_v9, %v1342_v12 }
0x17ab   :  { %1346 = vrot.lane.b32.xlu0 %v1344_v19, %s7856_s11  ;;  %v1543_v19 = vld [vmem:[%s9539_s10] sm:$0xff] }
0x181d   :  { %v1347_v20 = vpop.permute.xlu0 %1346 }
0x181e   :  { %v8387_v21 = vadd.f32 %v1347_v20, %v1339_v18  ;;  %v1544_v18 = vld [vmem:[%s9539_s10 + $0x8] sm:$0xff] }
0x181f   :  { %v8457_v20 = vpack.c.bf16 %v1544_v18, %v1543_v19 }
0x1820   :  { %7459 = vtanh.f32 %v8387_v21 }
0x182a   :  { %v7460_v17 = vpop.eup %7459 }
0x182b   :  { %1352 = vrot.lane.b32.xlu1 %v7460_v17, %s7855_s28  ;;  %v1545_v17 = vld [vmem:[%s9539_s10 + $0x10] sm:$0xff] }
0x182f   :  { %1360 = vrot.lane.b32.xlu1 %v8301_v16, %s7855_s28 }
0x189d   :  { %v1353_v23 = vpop.permute.xlu1 %1352 }
0x189e   :  { %v8393_v61 = vmul.f32 %v7458_v9, %v1353_v23  ;;  %v1546_v23 = vld [vmem:[%s9539_s10 + $0x18] sm:$0xff] }
0x18a0   :  { %1357 = vrot.lane.b32.xlu0 %v8393_v61, %s7856_s11 }
0x18a1   :  { %v1361_v27 = vpop.permute.xlu1 %1360 }
0x1912   :  { %v1358_v25 = vpop.permute.xlu0 %1357 }
0x1913   :  { %v1363_v22 = vsel %vm66_vm1, %v1358_v25, %v1361_v27  ;;  %v8467_v27 = vpack.c.bf16 %v1546_v23, %v1545_v17  ;;  %v8474_v25 = vld [vmem:[%s9536_s7] sm:$0x1] }
0x1914   :  { %6412 = vmatmul.mubr.msk.f32.vlgmr.msra.gmra.mrb[12].mxu1 %vm68_vm2, %v1363_v22  ;;  %v8479_v22 = vld [vmem:[%s9538_s9] sm:$0x1] }
0x1915   :  { %6433 = vmatprep.mubr.msk.f32.mxu1 %vm7853_vm0, %v9552_v7  ;;  %7058 = vmatpush3.bf16.msra.mxu1 %v8457_v20 }
0x1916   :  { %7059 = vmatprep.subr.bf16.mxu1 %v9550_v4 }
0x1919   :  { %7061 = vmatpush3.bf16.msra.mxu1 %v8467_v27 }
0x191a   :  { %7068 = vmatprep.subr.bf16.mxu1 %v9550_v4 }
0x19e7   :  { %v1433_v35 = vpop.f32.mrb[12].mxu1 }
0x19e8   :  { %v1434_v37 = vadd.f32 %v8081_v48, %v1433_v35  ;;  %v6413_v40 = vpop.f32.mrb[13].mxu1  ;;  %v1461_v48 = vld [vmem:[%s9537_s8] sm:$0xff] }
0x19e9   :  { %v8417_v62 = vpack.c.bf16 %v1462_v59, %v1461_v48 }
0x19ea   :  { %7461 = vtanh.f32 %v1434_v37  ;;  %v5808_v41 = vmul.f32 -1.442695, %v1434_v37  ;;  %v784_v37 = vadd.f32 %v8292_v15, %v8474_v25  ;;  %v8499_v15 = vld [vmem:[#allocation2] sm:$0x1] }
0x19eb   :  { %7052 = vmatpush3.bf16.msra.mxu0 %v8417_v62 }
0x19ec   :  { %7463 = vpow2.f32 %v5808_v41  ;;  %7053 = vmatprep.subr.bf16.mxu0 %v9550_v4 }
0x19f4   :  { %v7462_v16 = vpop.eup %7461 }
0x19f5   :  { %1446 = vrot.lane.b32.xlu0 %v7462_v16, %s7855_s28 }
0x19f6   :  { %v7464_v13 = vpop.eup %7463 }
0x19f7   :  { %v1440_v42 = vadd.f32 1.0, %v7464_v13 }
0x19f9   :  { %7465 = vrcp.f32 %v1440_v42 }
0x1a03   :  { %v7466_v38 = vpop.eup %7465 }
0x1a04   :  { %v1444_v50 = vmul.f32 %v7466_v38, %v8297_v6  ;;  %v1464_v6 = vld [vmem:[%s9537_s8 + $0x18] sm:$0xff]  ;;  %s5740_s8 = sshll.u32 %s7871_s18, 4  ;;  %s5741_s8 = int_to_ptr.vmem [resolvable:$true] %s5740_s8 }
0x1a05   :  { %v8423_v63 = vpack.c.bf16 %v1464_v6, %v1463_v53  ;;  %s7782_s19 = scalar_lea.vmem %s5741_s8, 16  ;;  %p7787_p1 = scmp.lt.s32.totalorder %s5741_s8, %s5741_s8 }
0x1a06   :  { %p7783_p0 = scmp.ne.s32.totalorder %s5741_s8, %s7782_s19 }
0x1a07   :  { %7055 = vmatpush3.bf16.msra.mxu0 %v8423_v63 }
0x1a08   :  { %7062 = vmatprep.subr.bf16.mxu0 %v9550_v4 }
0x1a67   :  { %v1447_v57 = vpop.permute.xlu0 %1446 }
0x1a68   :  { %v1449_v49 = vmul.f32 %v7466_v38, %v1447_v57 }
0x1a6a   :  { %1451 = vrot.lane.b32.xlu1 %v1449_v49, %s7856_s11 }
0x1adc   :  { %v1452_v52 = vpop.permute.xlu1 %1451 }
0x1add   :  { %v8405_v55 = vadd.f32 %v1452_v52, %v1444_v50 }
0x1adf   :  { %7467 = vtanh.f32 %v8405_v55 }
0x1ae9   :  { %v7468_v0 = vpop.eup %7467 }
0x1aea   :  { %1457 = vrot.lane.b32.xlu0 %v7468_v0, %s7855_s28 }
0x1b5c   :  { %v1458_v2 = vpop.permute.xlu0 %1457 }
0x1b5d   :  { %v8429_v9 = vmul.f32 %v7466_v38, %v1458_v2 }
0x1b5f   :  { %1467 = vrot.lane.b32.xlu1 %v8429_v9, %s7856_s11 }
0x1bd1   :  { %v1468_v12 = vpop.permute.xlu1 %1467 }
0x1bd2   :  { %6423 = vmatmul.mubr.msk.f32.vlgmr.msra.gmra.mrb[12].mxu0 %vm66_vm1, %v1468_v12 }
0x1bd3   :  { %7064 = vmatpush3.bf16.msra.mxu0 %v8252_v28  ;;  %6444 = vmatprep.mubr.msk.f32.mxu0 %vm7853_vm0, %v9552_v7 }
0x1bd4   :  { %7065 = vmatprep.subr.bf16.mxu0 %v9550_v4 }
0x1bd7   :  { %7067 = vmatpush3.bf16.msra.mxu0 %v8258_v29 }
0x1bd8   :  { %7080 = vmatprep.subr.bf16.mxu0 %v9550_v4 }
0x1bda   :  { %6445 = vmatmul.mubr.msk.f32.vlgmr.msra.gmra.mrb[14].mxu0 %vm66_vm1, %v1468_v12 }
0x1bdb   :  { %7082 = vmatpush3.bf16.msra.mxu0 %v8038_v34  ;;  %6482 = vmatprep.mubr.msk.f32.mxu0 %vm7853_vm0, %v9552_v7 }
0x1bdc   :  { %7083 = vmatprep.subr.bf16.mxu0 %v9550_v4 }
0x1bdf   :  { %7085 = vmatpush3.bf16.msra.mxu0 %v8044_v36 }
0x1be0   :  { %7086 = vmatprep.subr.bf16.mxu0 %v9550_v4 }
0x1be3   :  { %7088 = vmatpush3.bf16.msra.mxu0 %v8054_v39 }
0x1be4   :  { %7089 = vmatprep.subr.bf16.mxu0 %v9550_v4 }
0x1be7   :  { %7091 = vmatpush3.bf16.msra.mxu0 %v8065_v43 }
0x1be8   :  { %6496 = vmatprep.subr.mxu0 %v9552_v7 }
0x1ca5   :  { %v1537_v35 = vpop.f32.mrb[12].mxu0 }
0x1ca6   :  { %v1538_v40 = vadd.f32 %v1537_v35, %v8479_v22  ;;  %v6424_v16 = vpop.f32.mrb[13].mxu0 }
0x1ca7   :  { %v1635_v16 = vld [vmem:[%s9542_s13] sm:$0x1] }
0x1ca8   :  { %v1541_v41 = vadd.f32 %v1538_v40, %v784_v37 }
0x1caa   :  { %7469 = vtanh.f32 %v1541_v41 }
0x1cad   :  { %v1761_v13 = vpop.f32.mrb[14].mxu0 }
0x1cae   :  { %v1762_v42 = vadd.f32 %v1761_v13, %v8474_v25  ;;  %v6446_v38 = vpop.f32.mrb[15].mxu0 }
0x1cb0   :  { %v2448_v57 = vrot.slane %v1762_v42, 7 }
0x1cb2   :  { %v8486_v49 = vsel %vm1644_vm4, %v784_v37, %v2448_v57 }
0x1cb4   :  { %v7470_v50 = vpop.eup %7469 }
0x1cb5   :  { %6434 = vmatmul.mubr.msk.f32.vlgmr.msra.gmra.mrb[14].mxu1 %vm66_vm1, %v7470_v50 }
0x1cb6   :  { %7070 = vmatpush3.bf16.msra.mxu1 %v7972_v5  ;;  %6463 = vmatprep.mubr.msk.f32.mxu1 %vm7853_vm0, %v9552_v7 }
0x1cb7   :  { %7071 = vmatprep.subr.bf16.mxu1 %v9550_v4 }
0x1cba   :  { %7073 = vmatpush3.bf16.msra.mxu1 %v7983_v8 }
0x1cbb   :  { %7074 = vmatprep.subr.bf16.mxu1 %v9550_v4 }
0x1cbe   :  { %7076 = vmatpush3.bf16.msra.mxu1 %v7993_v11 }
0x1cbf   :  { %7077 = vmatprep.subr.bf16.mxu1 %v9550_v4 }
0x1cc2   :  { %7079 = vmatpush3.bf16.msra.mxu1 %v8003_v14 }
0x1cc3   :  { %7092 = vmatprep.subr.bf16.mxu1 %v9550_v4 }
0x1d88   :  { %v1617_v52 = vpop.f32.mrb[14].mxu1 }
0x1d89   :  { %v1618_v48 = vadd.f32 %v1617_v52, %v8499_v15  ;;  %v6435_v59 = vpop.f32.mrb[15].mxu1 }
0x1d8b   :  { %v1621_v53 = vmul.f32 0.2, %v1618_v48 }
0x1d8d   :  { %7471 = vtanh.f32 %v1621_v53 }
0x1d97   :  { %v7472_v6 = vpop.eup %7471 }
0x1d98   :  { %v1623_v0 = vmul.f32 2.5, %v7472_v6 }
0x1d9a   :  { %7473 = vrcp.f32 %v1623_v0 }
0x1da4   :  { %v7474_v2 = vpop.eup %7473 }
0x1da5   :  { %v8502_v12 = vmul.f32 %v7474_v2, %v1621_v53 }
0x1da7   :  { %9582 = vst [vmem:[#allocation14_spill] sm:$0xff] %v8502_v12  ;;  %v5811_v19 = vmul.f32 -1.442695, %v8502_v12 }
0x1da9   :  { %7475 = vpow2.f32 %v5811_v19 }
0x1db3   :  { %v7476_v18 = vpop.eup %7475 }
0x1db4   :  { %v1629_v17 = vadd.f32 1.0, %v7476_v18 }
0x1db6   :  { %7477 = vrcp.f32 %v1629_v17 }
0x1dc0   :  { %v8505_v23 = vpop.eup %7477 }
0x1dc1   :  { %v1632_v35 = vadd.f32 %v8505_v23, %v8505_v23 }
0x1dc3   :  { %7479 = vrcp.f32 %v1632_v35 }
0x1dcd   :  { %v7480_v37 = vpop.eup %7479 }
0x1dce   :  { %v1634_v40 = vmul.f32 %v7480_v37, %v8505_v23 }
0x1dd0   :  { %1637 = vrot.lane.b32.xlu0 %v1634_v40, %s7861_s6 }
0x1e42   :  { %v1638_v41 = vpop.permute.xlu0 %1637 }
0x1e43   :  { %vm1640_vm5 = vcmp.ge.f32.partialorder %v1635_v16, %v1638_v41 }
0x1e44   :  { %v8515_v13 = vsel %vm1640_vm5, 1.0, %v9552_v7  ;;  %vm2683_vm5 = vcmask 17424  }
0x1e45   :  { %9583 = vst [vmem:[#allocation15_spill] sm:$0xff] %v8515_v13  ;;  %1682 = vperm.xlu0 %7376, %v8515_v13   ;;  %v1687_v42 = vadd.f32 1.0, %v8515_v13 }
0x1e47   :  { %1690 = vperm.xlu1 %7375, %v1687_v42  }
0x1ec4   :  { %v1683_v57 = vpop.permute.xlu0 %1682 }
0x1ec5   :  { %v1685_v50 = vmul.f32 %v1683_v57, %v8264_v30 }
0x1ec6   :  { %v1691_v38 = vpop.permute.xlu1 %1690 }
0x1ec7   :  { %7481 = vrcp.f32 %v1691_v38 }
0x1ed1   :  { %v7482_v52 = vpop.eup %7481 }
0x1ed2   :  { %v1694_v48 = vmul.f32 %v7482_v52, %v1685_v50 }
0x1ed4   :  { %1766 = vrot.lane.b32.xlu1 %v1694_v48, %s7856_s11 }
0x1ed8   :  { %1769 = vrot.lane.b32.xlu1 %v8393_v61, %s7855_s28  ;;  %v8534_v61 = vld [vmem:[%s9531_s2] sm:$0x1] }
0x1f46   :  { %v1767_v59 = vpop.permute.xlu1 %1766 }
0x1f4a   :  { %v1770_v53 = vpop.permute.xlu1 %1769 }
0x1f4b   :  { %v1772_v6 = vsel %vm66_vm1, %v1767_v59, %v1770_v53 }
0x1f4c   :  { %6464 = vmatmul.mubr.msk.f32.vlgmr.msra.gmra.mrb[16].mxu1 %vm68_vm2, %v1772_v6 }
0x1f4d   :  { %7094 = vmatpush3.bf16.msra.mxu1 %v8098_v1  ;;  %6493 = vmatprep.mubr.msk.f32.mxu1 %vm7853_vm0, %v9552_v7 }
0x1f4e   :  { %7095 = vmatprep.subr.bf16.mxu1 %v9550_v4 }
0x1f51   :  { %7097 = vmatpush3.bf16.msra.mxu1 %v8104_v3 }
0x1f52   :  { %7098 = vmatprep.subr.bf16.mxu1 %v9550_v4 }
0x201f   :  { %v1842_v0 = vpop.f32.mrb[16].mxu1 }
0x2020   :  { %v1843_v2 = vadd.f32 %v8534_v61, %v1842_v0  ;;  %v6465_v19 = vpop.f32.mrb[17].mxu1  ;;  %v8560_v0 = vld [vmem:[%s9531_s2 + $0x1] sm:$0x1] }
0x2022   :  { %7483 = vtanh.f32 %v1843_v2  ;;  %v5816_v17 = vmul.f32 -1.442695, %v1843_v2 }
0x2024   :  { %7485 = vpow2.f32 %v5816_v17 }
0x202c   :  { %v7484_v18 = vpop.eup %7483 }
0x202d   :  { %1855 = vrot.lane.b32.xlu0 %v7484_v18, %s7855_s28 }
0x202e   :  { %v7486_v35 = vpop.eup %7485 }
0x202f   :  { %v1849_v37 = vadd.f32 1.0, %v7486_v35 }
0x2031   :  { %7487 = vrcp.f32 %v1849_v37 }
0x203b   :  { %v7488_v40 = vpop.eup %7487 }
0x203c   :  { %v1853_v42 = vmul.f32 %v7488_v40, %v8387_v21 }
0x209f   :  { %v1856_v16 = vpop.permute.xlu0 %1855 }
0x20a0   :  { %v1858_v41 = vmul.f32 %v7488_v40, %v1856_v16 }
0x20a2   :  { %1860 = vrot.lane.b32.xlu1 %v1858_v41, %s7856_s11 }
0x2114   :  { %v1861_v38 = vpop.permute.xlu1 %1860 }
0x2115   :  { %v8540_v57 = vadd.f32 %v1861_v38, %v1853_v42 }
0x2117   :  { %7489 = vtanh.f32 %v8540_v57 }
0x2121   :  { %v7490_v50 = vpop.eup %7489 }
0x2122   :  { %1866 = vrot.lane.b32.xlu0 %v7490_v50, %s7855_s28 }
0x2126   :  { %1874 = vrot.lane.b32.xlu0 %v8429_v9, %s7855_s28 }
0x2194   :  { %v1867_v52 = vpop.permute.xlu0 %1866 }
0x2195   :  { %v8546_v48 = vmul.f32 %v7488_v40, %v1867_v52 }
0x2197   :  { %1871 = vrot.lane.b32.xlu1 %v8546_v48, %s7856_s11 }
0x2198   :  { %v1875_v59 = vpop.permute.xlu0 %1874 }
0x2209   :  { %v1872_v53 = vpop.permute.xlu1 %1871 }
0x220a   :  { %v1877_v21 = vsel %vm66_vm1, %v1872_v53, %v1875_v59 }
0x220b   :  { %6483 = vmatmul.mubr.msk.f32.vlgmr.msra.gmra.mrb[16].mxu0 %vm68_vm2, %v1877_v21  ;;  %v8588_v21 = vld [vmem:[%s9533_s4] sm:$0x1] }
0x220c   :  { %6497 = vmatpush3.msk.msra.mxu0 %vm417_vm7, %v8162_v51  ;;  %6498 = vmatprep.mubr.msk.f32.mxu0 %vm7853_vm0, %v9552_v7 }
0x220d   :  { %7110 = vmatprep.subr.bf16.mxu0 %v9550_v4 }
0x22de   :  { %v1947_v6 = vpop.f32.mrb[16].mxu0 }
0x22df   :  { %v1948_v2 = vadd.f32 %v8560_v0, %v1947_v6  ;;  %v6484_v19 = vpop.f32.mrb[17].mxu0 }
0x22e1   :  { %7491 = vtanh.f32 %v1948_v2  ;;  %v5818_v17 = vmul.f32 -1.442695, %v1948_v2 }
0x22e3   :  { %7493 = vpow2.f32 %v5818_v17 }
0x22eb   :  { %v7492_v18 = vpop.eup %7491 }
0x22ec   :  { %1960 = vrot.lane.b32.xlu1 %v7492_v18, %s7855_s28 }
0x22ed   :  { %v7494_v51 = vpop.eup %7493 }
0x22ee   :  { %v1954_v35 = vadd.f32 1.0, %v7494_v51 }
0x22f0   :  { %7495 = vrcp.f32 %v1954_v35 }
0x22fa   :  { %v7496_v37 = vpop.eup %7495 }
0x22fb   :  { %v1958_v41 = vmul.f32 %v7496_v37, %v8405_v55 }
0x235e   :  { %v1961_v40 = vpop.permute.xlu1 %1960 }
0x235f   :  { %v1963_v16 = vmul.f32 %v7496_v37, %v1961_v40 }
0x2361   :  { %1965 = vrot.lane.b32.xlu0 %v1963_v16, %s7856_s11 }
0x23d3   :  { %v1966_v42 = vpop.permute.xlu0 %1965 }
0x23d4   :  { %v8566_v38 = vadd.f32 %v1966_v42, %v1958_v41 }
0x23d6   :  { %7497 = vtanh.f32 %v8566_v38 }
0x23e0   :  { %v7498_v50 = vpop.eup %7497 }
0x23e1   :  { %1971 = vrot.lane.b32.xlu1 %v7498_v50, %s7855_s28 }
0x2453   :  { %v1972_v52 = vpop.permute.xlu1 %1971 }
0x2454   :  { %v8570_v59 = vmul.f32 %v7496_v37, %v1972_v52 }
0x2456   :  { %1976 = vrot.lane.b32.xlu0 %v8570_v59, %s7856_s11 }
0x24c8   :  { %v1977_v53 = vpop.permute.xlu0 %1976 }
0x24c9   :  { %6494 = vmatmul.mubr.msk.f32.vlgmr.msra.gmra.mrb[18].mxu1 %vm66_vm1, %v1977_v53 }
0x24ca   :  { %7100 = vmatpush3.bf16.msra.mxu1 %v7972_v5  ;;  %6517 = vmatprep.mubr.msk.f32.mxu1 %vm7853_vm0, %v9552_v7 }
0x24cb   :  { %7101 = vmatprep.subr.bf16.mxu1 %v9550_v4 }
0x24ce   :  { %7103 = vmatpush3.bf16.msra.mxu1 %v7983_v8 }
0x24cf   :  { %7104 = vmatprep.subr.bf16.mxu1 %v9550_v4 }
0x24d2   :  { %7106 = vmatpush3.bf16.msra.mxu1 %v7993_v11 }
0x24d3   :  { %7107 = vmatprep.subr.bf16.mxu1 %v9550_v4 }
0x24d6   :  { %7109 = vmatpush3.bf16.msra.mxu1 %v8003_v14 }
0x24d7   :  { %7122 = vmatprep.subr.bf16.mxu1 %v9550_v4 }
0x259c   :  { %v2046_v55 = vpop.f32.mrb[18].mxu1 }
0x259d   :  { %v2047_v6 = vadd.f32 %v8588_v21, %v2046_v55  ;;  %v6495_v2 = vpop.f32.mrb[19].mxu1 }
0x259f   :  { %v2050_v19 = vmul.f32 0.2, %v2047_v6 }
0x25a1   :  { %7499 = vtanh.f32 %v2050_v19 }
0x25ab   :  { %v7500_v18 = vpop.eup %7499 }
0x25ac   :  { %v2052_v17 = vmul.f32 2.5, %v7500_v18 }
0x25ae   :  { %7501 = vrcp.f32 %v2052_v17 }
0x25b8   :  { %v7502_v51 = vpop.eup %7501 }
0x25b9   :  { %v8591_v35 = vmul.f32 %v7502_v51, %v2050_v19  ;;  %v9546_v19 = vmov 2  }
0x25ba   :  { %7377 = vset.pattern.permute.xlu0 %v9546_v19  ;;  %7378 = vset.pattern.permute.xlu1 %v9546_v19 }
0x25bb   :  { %v2055_v37 = vsel %vm365_vm3, %v8591_v35, -inf }
0x25bc   :  { %2056 = vmax.xlane.f32.xlu1 %v2055_v37 }
0x2649   :  { %v8595_v40 = vpop.xlane.xlu1 %2056 }
0x264a   :  { %v2058_v16 = vsub.f32 %v8591_v35, %v8595_v40 }
0x264c   :  { %v2059_v41 = vmul.f32 1.442695, %v2058_v16 }
0x264e   :  { %7503 = vpow2.f32 %v2059_v41 }
0x2658   :  { %v7504_v42 = vpop.eup %7503 }
0x2659   :  { %v2061_v50 = vsel %vm365_vm3, %v7504_v42, 0.0 }
0x265a   :  { %2062 = vadd.xlane.f32.xlu0 %v2061_v50 }
0x26e7   :  { %v8600_v52 = vpop.xlane.xlu0 %2062 }
0x26e8   :  { %7505 = vrcp.f32 %v8600_v52 }
0x26f2   :  { %v7506_v53 = vpop.eup %7505 }
0x26f3   :  { %v2065_v55 = vmul.f32 %v7506_v53, %v7504_v42  ;;  %v2070_v53 = vld [vmem:[%s9541_s12] sm:$0x1] }
0x26f5   :  { %2076 = vrot.lane.b32.xlu1 %v2065_v55, %s7858_s26  ;;  %2072 = vrot.lane.b32.xlu0 %v2065_v55, %s7859_s27  ;;  %v2086_v6 = vrot.slane %v2065_v55, %v8330_v45 }
0x26f7   :  { %v2093_v2 = vrot.slane %v2086_v6, %v8330_v45 }
0x26f9   :  { %2094 = vrot.lane.b32.xlu1 %v2093_v2, %s7863_s22 }
0x2767   :  { %v2073_v18 = vpop.permute.xlu0 %2072  ;;  %v2077_v51 = vpop.permute.xlu1 %2076 }
0x2768   :  { %v2075_v17 = vadd.f32 %v2073_v18, %v2065_v55 }
0x276a   :  { %v2079_v37 = vadd.f32 %v2077_v51, %v2075_v17  ;;  %v2106_v16 = vrot.slane %v2075_v17, %v8330_v45 }
0x276b   :  { %v2095_v55 = vpop.permute.xlu1 %2094 }
0x276c   :  { %v2127_v41 = vrot.slane %v2079_v37, %v8330_v45  ;;  %v2113_v42 = vrot.slane %v2106_v16, %v8330_v45  ;;  %vm2097_vm6 = vcmp.ge.f32.partialorder %v2070_v53, %v2095_v55 }
0x276d   :  { %v2098_v2 = vsel %vm2097_vm6, 1, %v9548_v32 }
0x276e   :  { %2114 = vrot.lane.b32.xlu0 %v2113_v42, %s7863_s22  ;;  %v2134_v50 = vrot.slane %v2127_v41, %v8330_v45  ;;  %v2152_v41 = vsel %vm9575_vm11, 1, %v9548_v32  ;;  %vm5192_vm11 = vcmp.eq.s32.totalorder %v8172_v56, 5 }
0x2770   :  { %2135 = vrot.lane.b32.xlu1 %v2134_v50, %s7863_s22 }
0x2774   :  { %2238 = vrot.lane.b32.xlu1 %v8546_v48, %s7855_s28 }
0x27e0   :  { %v2115_v6 = vpop.permute.xlu0 %2114 }
0x27e1   :  { %vm2117_vm9 = vcmp.ge.f32.partialorder %v2070_v53, %v2115_v6 }
0x27e2   :  { %v2118_v18 = vsel %vm2117_vm9, 1, %v9548_v32  ;;  %v2136_v17 = vpop.permute.xlu1 %2135  ;;  %vm2697_vm9 = vcmask 1042176  }
0x27e3   :  { %v2119_v51 = vadd.s32 %v2118_v18, %v2098_v2  ;;  %vm2138_vm10 = vcmp.ge.f32.partialorder %v2070_v53, %v2136_v17 }
0x27e4   :  { %v2139_v37 = vsel %vm2138_vm10, 1, %v9548_v32 }
0x27e5   :  { %v2140_v16 = vadd.s32 %v2139_v37, %v2119_v51 }
0x27e7   :  { %2142 = vperm.xlu0 %7377, %v2140_v16  }
0x2866   :  { %v2143_v48 = vpop.permute.xlu0 %2142 }
0x2867   :  { %v2147_v42 = vrot.slane %v2143_v48, %v8170_v54 }
0x2869   :  { %vm2148_vm12 = vcmp.eq.s32.totalorder %v8172_v56, %v2147_v42  ;;  %v2153_v50 = vmul.u32 %v2152_v41, %v2147_v42 }
0x286a   :  { %v8631_v55 = vsel %vm2148_vm12, 1.0, %v9552_v7 }
0x286b   :  { %6499 = vmatmul.mubr.msk.f32.vlgmr.msra.gmra.mrb[18].mxu0 %vm413_vm8, %v8631_v55  ;;  %v8636_v53 = vadd.s32 %v2153_v50, %v8367_v47  ;;  %v2239_v47 = vpop.permute.xlu1 %2238 }
0x286c   :  { %7112 = vmatpush3.bf16.msra.mxu0 %v8038_v34  ;;  %6536 = vmatprep.mubr.msk.f32.mxu0 %vm7853_vm0, %v9552_v7 }
0x286d   :  { %7113 = vmatprep.subr.bf16.mxu0 %v9550_v4 }
0x2870   :  { %7115 = vmatpush3.bf16.msra.mxu0 %v8044_v36 }
0x2871   :  { %7116 = vmatprep.subr.bf16.mxu0 %v9550_v4 }
0x2874   :  { %7118 = vmatpush3.bf16.msra.mxu0 %v8054_v39 }
0x2875   :  { %7119 = vmatprep.subr.bf16.mxu0 %v9550_v4 }
0x2878   :  { %7121 = vmatpush3.bf16.msra.mxu0 %v8065_v43 }
0x2879   :  { %7128 = vmatprep.subr.bf16.mxu0 %v9550_v4 }
0x293e   :  { %v2224_v6 = vpop.f32.mrb[18].mxu0 }
0x293f   :  { %v2241_v2 = vsel %vm66_vm1, %v2224_v6, %v2239_v47  ;;  %v6500_v18 = vpop.f32.mrb[19].mxu0 }
0x2940   :  { %6518 = vmatmul.mubr.msk.f32.vlgmr.msra.gmra.mrb[20].mxu1 %vm68_vm2, %v2241_v2 }
0x2941   :  { %7124 = vmatpush3.bf16.msra.mxu1 %v8417_v62  ;;  %6547 = vmatprep.mubr.msk.f32.mxu1 %vm7853_vm0, %v9552_v7 }
0x2942   :  { %7125 = vmatprep.subr.bf16.mxu1 %v9550_v4 }
0x2945   :  { %7127 = vmatpush3.bf16.msra.mxu1 %v8423_v63 }
0x2946   :  { %7134 = vmatprep.subr.bf16.mxu1 %v9550_v4 }
0x2a13   :  { %v2311_v17 = vpop.f32.mrb[20].mxu1 }
0x2a14   :  { %v2312_v51 = vadd.f32 %v8534_v61, %v2311_v17  ;;  %v6519_v37 = vpop.f32.mrb[21].mxu1 }
0x2a16   :  { %7507 = vtanh.f32 %v2312_v51  ;;  %v5824_v48 = vmul.f32 -1.442695, %v2312_v51 }
0x2a18   :  { %7509 = vpow2.f32 %v5824_v48 }
0x2a20   :  { %v7508_v16 = vpop.eup %7507 }
0x2a21   :  { %2324 = vrot.lane.b32.xlu1 %v7508_v16, %s7855_s28 }
0x2a22   :  { %v7510_v41 = vpop.eup %7509 }
0x2a23   :  { %v2318_v42 = vadd.f32 1.0, %v7510_v41 }
0x2a25   :  { %7511 = vrcp.f32 %v2318_v42 }
0x2a2f   :  { %v7512_v50 = vpop.eup %7511 }
0x2a30   :  { %v2322_v2 = vmul.f32 %v7512_v50, %v8540_v57 }
0x2a93   :  { %v2325_v47 = vpop.permute.xlu1 %2324 }
0x2a94   :  { %v2327_v6 = vmul.f32 %v7512_v50, %v2325_v47 }
0x2a96   :  { %2329 = vrot.lane.b32.xlu0 %v2327_v6, %s7856_s11 }
0x2b08   :  { %v2330_v18 = vpop.permute.xlu0 %2329 }
0x2b09   :  { %v8660_v19 = vadd.f32 %v2330_v18, %v2322_v2 }
0x2b0b   :  { %7513 = vtanh.f32 %v8660_v19 }
0x2b15   :  { %v7514_v17 = vpop.eup %7513 }
0x2b16   :  { %2335 = vrot.lane.b32.xlu1 %v7514_v17, %s7855_s28 }
0x2b1a   :  { %2343 = vrot.lane.b32.xlu1 %v8570_v59, %s7855_s28 }
0x2b88   :  { %v2336_v51 = vpop.permute.xlu1 %2335 }
0x2b89   :  { %v8666_v37 = vmul.f32 %v7512_v50, %v2336_v51 }
0x2b8b   :  { %2340 = vrot.lane.b32.xlu0 %v8666_v37, %s7856_s11 }
0x2b8c   :  { %v2344_v16 = vpop.permute.xlu1 %2343 }
0x2bfd   :  { %v2341_v48 = vpop.permute.xlu0 %2340 }
0x2bfe   :  { %v2346_v57 = vsel %vm66_vm1, %v2341_v48, %v2344_v16 }
0x2bff   :  { %6537 = vmatmul.mubr.msk.f32.vlgmr.msra.gmra.mrb[20].mxu0 %vm68_vm2, %v2346_v57 }
0x2c00   :  { %7130 = vmatpush3.bf16.msra.mxu0 %v8457_v20  ;;  %6558 = vmatprep.mubr.msk.f32.mxu0 %vm7853_vm0, %v9552_v7 }
0x2c01   :  { %7131 = vmatprep.subr.bf16.mxu0 %v9550_v4 }
0x2c04   :  { %7133 = vmatpush3.bf16.msra.mxu0 %v8467_v27 }
0x2c05   :  { %7140 = vmatprep.subr.bf16.mxu0 %v9550_v4 }
0x2cd2   :  { %v2416_v59 = vpop.f32.mrb[20].mxu0 }
0x2cd3   :  { %v2417_v41 = vadd.f32 %v8560_v0, %v2416_v59  ;;  %v6538_v42 = vpop.f32.mrb[21].mxu0 }
0x2cd5   :  { %7515 = vtanh.f32 %v2417_v41  ;;  %v5826_v47 = vmul.f32 -1.442695, %v2417_v41 }
0x2cd7   :  { %7517 = vpow2.f32 %v5826_v47 }
0x2cdf   :  { %v7516_v50 = vpop.eup %7515 }
0x2ce0   :  { %2429 = vrot.lane.b32.xlu0 %v7516_v50, %s7855_s28 }
0x2ce1   :  { %v7518_v6 = vpop.eup %7517 }
0x2ce2   :  { %v2423_v2 = vadd.f32 1.0, %v7518_v6 }
0x2ce4   :  { %7519 = vrcp.f32 %v2423_v2 }
0x2cee   :  { %v7520_v18 = vpop.eup %7519 }
0x2cef   :  { %v2427_v16 = vmul.f32 %v7520_v18, %v8566_v38 }
0x2d52   :  { %v2430_v17 = vpop.permute.xlu0 %2429 }
0x2d53   :  { %v2432_v51 = vmul.f32 %v7520_v18, %v2430_v17 }
0x2d55   :  { %2434 = vrot.lane.b32.xlu1 %v2432_v51, %s7856_s11 }
0x2dc7   :  { %v2435_v48 = vpop.permute.xlu1 %2434 }
0x2dc8   :  { %v8682_v57 = vadd.f32 %v2435_v48, %v2427_v16 }
0x2dca   :  { %7521 = vtanh.f32 %v8682_v57 }
0x2dd4   :  { %v7522_v59 = vpop.eup %7521 }
0x2dd5   :  { %2440 = vrot.lane.b32.xlu0 %v7522_v59, %s7855_s28 }
0x2e47   :  { %v2441_v41 = vpop.permute.xlu0 %2440 }
0x2e48   :  { %v8686_v42 = vmul.f32 %v7520_v18, %v2441_v41 }
0x2e4a   :  { %2452 = vrot.lane.b32.xlu1 %v8686_v42, %s7856_s11 }
0x2ebc   :  { %v2453_v50 = vpop.permute.xlu1 %2452 }
0x2ebd   :  { %6548 = vmatmul.mubr.msk.f32.vlgmr.msra.gmra.mrb[22].mxu1 %vm66_vm1, %v2453_v50 }
0x2ebe   :  { %7136 = vmatpush3.bf16.msra.mxu1 %v8252_v28  ;;  %6569 = vmatprep.mubr.msk.f32.mxu1 %vm7853_vm0, %v9552_v7 }
0x2ebf   :  { %7137 = vmatprep.subr.bf16.mxu1 %v9550_v4 }
0x2ec2   :  { %7139 = vmatpush3.bf16.msra.mxu1 %v8258_v29 }
0x2ec3   :  { %7152 = vmatprep.subr.bf16.mxu1 %v9550_v4 }
0x2ec5   :  { %6570 = vmatmul.mubr.msk.f32.vlgmr.msra.gmra.mrb[24].mxu1 %vm66_vm1, %v2453_v50 }
0x2ec6   :  { %7154 = vmatpush3.bf16.msra.mxu1 %v8038_v34  ;;  %6607 = vmatprep.mubr.msk.f32.mxu1 %vm7853_vm0, %v9552_v7 }
0x2ec7   :  { %7155 = vmatprep.subr.bf16.mxu1 %v9550_v4 }
0x2eca   :  { %7157 = vmatpush3.bf16.msra.mxu1 %v8044_v36 }
0x2ecb   :  { %7158 = vmatprep.subr.bf16.mxu1 %v9550_v4 }
0x2ece   :  { %7160 = vmatpush3.bf16.msra.mxu1 %v8054_v39 }
0x2ecf   :  { %7161 = vmatprep.subr.bf16.mxu1 %v9550_v4 }
0x2ed2   :  { %7163 = vmatpush3.bf16.msra.mxu1 %v8065_v43 }
0x2ed3   :  { %6621 = vmatprep.subr.mxu1 %v9552_v7 }
0x2f90   :  { %v2522_v38 = vpop.f32.mrb[22].mxu1 }
0x2f91   :  { %v2523_v47 = vadd.f32 %v2522_v38, %v8479_v22  ;;  %v6549_v6 = vpop.f32.mrb[23].mxu1 }
0x2f93   :  { %v2529_v2 = vrot.slane %v2523_v47, %v8170_v54 }
0x2f95   :  { %v2530_v18 = vadd.f32 %v2529_v2, %v8486_v49 }
0x2f97   :  { %7523 = vtanh.f32 %v2530_v18 }
0x2f98   :  { %v2779_v17 = vpop.f32.mrb[24].mxu1 }
0x2f99   :  { %v2780_v51 = vadd.f32 %v2779_v17, %v8474_v25  ;;  %v6571_v16 = vpop.f32.mrb[25].mxu1  ;;  %v8729_v25 = vrot.slane %v8499_v15, %v8170_v54 }
0x2f9b   :  { %v3466_v48 = vrot.slane %v2780_v51, 6  ;;  %9584 = vst [vmem:[#allocation16_spill] sm:$0xff] %v8729_v25 }
0x2f9d   :  { %v8714_v59 = vsel %vm2634_vm13, %v8486_v49, %v3466_v48 }
0x2fa1   :  { %v7524_v41 = vpop.eup %7523 }
0x2fa2   :  { %6559 = vmatmul.mubr.msk.f32.vlgmr.msra.gmra.mrb[22].mxu0 %vm66_vm1, %v7524_v41 }
0x2fa3   :  { %7142 = vmatpush3.bf16.msra.mxu0 %v7972_v5  ;;  %6588 = vmatprep.mubr.msk.f32.mxu0 %vm7853_vm0, %v9552_v7 }
0x2fa4   :  { %7143 = vmatprep.subr.bf16.mxu0 %v9550_v4 }
0x2fa7   :  { %7145 = vmatpush3.bf16.msra.mxu0 %v7983_v8 }
0x2fa8   :  { %7146 = vmatprep.subr.bf16.mxu0 %v9550_v4 }
0x2fab   :  { %7148 = vmatpush3.bf16.msra.mxu0 %v7993_v11 }
0x2fac   :  { %7149 = vmatprep.subr.bf16.mxu0 %v9550_v4 }
0x2faf   :  { %7151 = vmatpush3.bf16.msra.mxu0 %v8003_v14 }
0x2fb0   :  { %7164 = vmatprep.subr.bf16.mxu0 %v9550_v4 }
0x3075   :  { %v2607_v22 = vpop.f32.mrb[22].mxu0 }
0x3076   :  { %v2608_v49 = vadd.f32 %v2607_v22, %v8729_v25  ;;  %v6560_v50 = vpop.f32.mrb[23].mxu0  ;;  %v1668_v22 = vmul.f32 1.6666666, %v8505_v23 }
0x3078   :  { %v2611_v38 = vmul.f32 0.2, %v2608_v49  ;;  %v1672_v49 = vmul.f32 2.5, %v8505_v23 }
0x307a   :  { %7525 = vtanh.f32 %v2611_v38 }
0x3084   :  { %v7526_v47 = vpop.eup %7525 }
0x3085   :  { %v2613_v6 = vmul.f32 2.5, %v7526_v47 }
0x3087   :  { %7527 = vrcp.f32 %v2613_v6 }
0x3091   :  { %v7528_v2 = vpop.eup %7527 }
0x3092   :  { %v8732_v18 = vmul.f32 %v7528_v2, %v2611_v38 }
0x3094   :  { %9585 = vst [vmem:[#allocation17_spill] sm:$0xff] %v8732_v18  ;;  %v5829_v17 = vmul.f32 -1.442695, %v8732_v18 }
0x3096   :  { %7529 = vpow2.f32 %v5829_v17 }
0x30a0   :  { %v7530_v51 = vpop.eup %7529 }
0x30a1   :  { %v2619_v16 = vadd.f32 1.0, %v7530_v51 }
0x30a3   :  { %7531 = vrcp.f32 %v2619_v16 }
0x30ad   :  { %v7532_v15 = vpop.eup %7531 }
0x30ae   :  { %v2666_v48 = vmul.f32 1.6666666, %v7532_v15  ;;  %v2670_v41 = vmul.f32 2.5, %v7532_v15  ;;  %v2622_v60 = vadd.f32 %v7532_v15, %v7532_v15 }
0x30b0   :  { %7533 = vlog2.f32 %v2666_v48 }
0x30b1   :  { %7535 = vlog2.f32 %v2670_v41 }
0x30b2   :  { %7537 = vrcp.f32 %v2622_v60 }
0x30b3   :  { %7539 = vlog2.f32 %v1668_v22 }
0x30b4   :  { %7541 = vlog2.f32 %v1672_v49 }
0x30ba   :  { %v7534_v50 = vpop.eup %7533 }
0x30bb   :  { %v7536_v38 = vpop.eup %7535  ;;  %v2668_v47 = vmul.f32 0.6931472, %v7534_v50 }
0x30bc   :  { %v7538_v6 = vpop.eup %7537  ;;  %v2672_v2 = vmul.f32 0.6931472, %v7536_v38 }
0x30bd   :  { %v2669_v17 = vmul.f32 %v7532_v15, %v2668_v47  ;;  %v2624_v51 = vmul.f32 %v7538_v6, %v7532_v15  ;;  %v7540_v48 = vpop.eup %7539 }
0x30be   :  { %v2673_v16 = vmul.f32 %v7532_v15, %v2672_v2  ;;  %v7542_v60 = vpop.eup %7541  ;;  %v1670_v22 = vmul.f32 0.6931472, %v7540_v48 }
0x30bf   :  { %2627 = vrot.lane.b32.xlu0 %v2624_v51, %s7863_s22  ;;  %v1674_v49 = vmul.f32 0.6931472, %v7542_v60 }
0x30c0   :  { %v2674_v32 = vadd.f32 %v2673_v16, %v2669_v17  ;;  %v1671_v50 = vmul.f32 %v8505_v23, %v1670_v22  ;;  %v2625_v17 = vld [vmem:[%s9542_s13] sm:$0x3] }
0x30c1   :  { %v1675_v38 = vmul.f32 %v8505_v23, %v1674_v49 }
0x30c2   :  { %v2675_v41 = vsel %vm2651_vm15, %v2674_v32, 0.0 }
0x30c3   :  { %v2676_v4 = vrot.slane %v2675_v41, 4  ;;  %v1676_v15 = vadd.f32 %v1675_v38, %v1671_v50  ;;  %v2444_v50 = vrot.slane %v8429_v9, 7 }
0x30c5   :  { %v2677_v7 = vadd.f32 %v2676_v4, %v2675_v41  ;;  %v9586_v4 = vmov 0.0   ;;  %v8756_v38 = vsel %vm1644_vm4, %v8264_v30, %v2444_v50 }
0x30c7   :  { %v2678_v12 = vrot.slane %v2677_v7, 2 }
0x30c9   :  { %v2679_v47 = vadd.f32 %v2678_v12, %v2677_v7 }
0x30cb   :  { %v2680_v6 = vrot.slane %v2679_v47, 1 }
0x30cd   :  { %v2681_v2 = vadd.f32 %v2680_v6, %v2679_v47 }
0x30cf   :  { %v8741_v51 = vadd.f32 %v2681_v2, %v1676_v15 }
0x3131   :  { %v2628_v32 = vpop.permute.xlu0 %2627 }
0x3132   :  { %vm2630_vm6 = vcmp.ge.f32.partialorder %v2625_v17, %v2628_v32 }
0x3133   :  { %v8747_v16 = vsel %vm2630_vm6, 1.0, %v9586_v4  ;;  %vm9568_vm6 = vcmp.eq.s32.totalorder %v8172_v56, 3 }
0x3134   :  { %9587 = vst [vmem:[#allocation18_spill] sm:$0xff] %v8747_v16  ;;  %2693 = vperm.xlu1 %7378, %v8747_v16   ;;  %v2684_v23 = vsel %vm2683_vm5, %v8747_v16, 0.0 }
0x3135   :  { %v2685_v7 = vrot.slane %v2684_v23, 4 }
0x3137   :  { %v2686_v12 = vadd.f32 %v2685_v7, %v2684_v23 }
0x3139   :  { %v2687_v48 = vrot.slane %v2686_v12, 2 }
0x313b   :  { %v2688_v60 = vadd.f32 %v2687_v48, %v2686_v12 }
0x313d   :  { %v2689_v41 = vrot.slane %v2688_v60, 1 }
0x313f   :  { %v2690_v22 = vadd.f32 %v2689_v41, %v2688_v60 }
0x3141   :  { %v2705_v49 = vadd.f32 1.0, %v2690_v22  ;;  %v9588_v22 = vmov 0.0|0.0  }
0x3143   :  { %2708 = vperm.xlu0 %7377, %v2705_v49  }
0x3147   :  { %2787 = vrot.lane.b32.xlu0 %v8666_v37, %s7855_s28 }
0x31b3   :  { %v2694_v47 = vpop.permute.xlu1 %2693 }
0x31b4   :  { %v2696_v6 = vmul.f32 %v2694_v47, %v8756_v38 }
0x31b6   :  { %v2698_v15 = vsel %vm2697_vm9, %v2696_v6, 0.0 }
0x31b7   :  { %v2699_v2 = vrot.slane %v2698_v15, 4 }
0x31b9   :  { %v2700_v17 = vadd.f32 %v2699_v2, %v2698_v15 }
0x31bb   :  { %v2701_v32 = vrot.slane %v2700_v17, 2 }
0x31bd   :  { %v2702_v7 = vadd.f32 %v2701_v32, %v2700_v17 }
0x31bf   :  { %v2703_v12 = vrot.slane %v2702_v7, 1 }
0x31c1   :  { %v2704_v48 = vadd.f32 %v2703_v12, %v2702_v7 }
0x31c2   :  { %v2709_v23 = vpop.permute.xlu0 %2708 }
0x31c3   :  { %7543 = vrcp.f32 %v2709_v23 }
0x31c6   :  { %v2788_v9 = vpop.permute.xlu0 %2787 }
0x31cd   :  { %v7544_v37 = vpop.eup %7543 }
0x31ce   :  { %v2712_v60 = vmul.f32 %v7544_v37, %v2704_v48 }
0x31d0   :  { %2784 = vrot.lane.b32.xlu1 %v2712_v60, %s7856_s11 }
0x3242   :  { %v2785_v30 = vpop.permute.xlu1 %2784 }
0x3243   :  { %v2790_v41 = vsel %vm66_vm1, %v2785_v30, %v2788_v9 }
0x3244   :  { %6589 = vmatmul.mubr.msk.f32.vlgmr.msra.gmra.mrb[24].mxu0 %vm68_vm2, %v2790_v41 }
0x3245   :  { %7166 = vmatpush3.bf16.msra.mxu0 %v8098_v1  ;;  %6618 = vmatprep.mubr.msk.f32.mxu0 %vm7853_vm0, %v9586_v4 }
0x3246   :  { %7167 = vmatprep.subr.bf16.mxu0 %v9588_v22 }
0x3249   :  { %7169 = vmatpush3.bf16.msra.mxu0 %v8104_v3 }
0x324a   :  { %7170 = vmatprep.subr.bf16.mxu0 %v9588_v22 }
0x3317   :  { %v2860_v49 = vpop.f32.mrb[24].mxu0 }
0x3318   :  { %v2861_v50 = vadd.f32 %v8534_v61, %v2860_v49  ;;  %v6590_v47 = vpop.f32.mrb[25].mxu0 }
0x331a   :  { %7545 = vtanh.f32 %v2861_v50  ;;  %v5834_v15 = vmul.f32 -1.442695, %v2861_v50  ;;  %v8787_v50 = vld [vmem:[%s9534_s5] sm:$0xf] }
0x331c   :  { %7547 = vpow2.f32 %v5834_v15 }
0x3324   :  { %v7546_v6 = vpop.eup %7545 }
0x3325   :  { %2873 = vrot.lane.b32.xlu1 %v7546_v6, %s7855_s28 }
0x3326   :  { %v7548_v2 = vpop.eup %7547 }
0x3327   :  { %v2867_v17 = vadd.f32 1.0, %v7548_v2 }
0x3329   :  { %7549 = vrcp.f32 %v2867_v17 }
0x3333   :  { %v7550_v32 = vpop.eup %7549 }
0x3334   :  { %v2871_v12 = vmul.f32 %v7550_v32, %v8660_v19 }
0x3397   :  { %v2874_v23 = vpop.permute.xlu1 %2873 }
0x3398   :  { %v2876_v7 = vmul.f32 %v7550_v32, %v2874_v23 }
0x339a   :  { %2878 = vrot.lane.b32.xlu0 %v2876_v7, %s7856_s11 }
0x340c   :  { %v2879_v48 = vpop.permute.xlu0 %2878 }
0x340d   :  { %v8772_v37 = vadd.f32 %v2879_v48, %v2871_v12 }
0x340f   :  { %7551 = vtanh.f32 %v8772_v37 }
0x3419   :  { %v7552_v60 = vpop.eup %7551 }
0x341a   :  { %2884 = vrot.lane.b32.xlu1 %v7552_v60, %s7855_s28 }
0x341e   :  { %2892 = vrot.lane.b32.xlu1 %v8686_v42, %s7855_s28 }
0x348c   :  { %v2885_v9 = vpop.permute.xlu1 %2884 }
0x348d   :  { %v8778_v30 = vmul.f32 %v7550_v32, %v2885_v9 }
0x348f   :  { %2889 = vrot.lane.b32.xlu0 %v8778_v30, %s7856_s11 }
0x3490   :  { %v2893_v41 = vpop.permute.xlu1 %2892 }
0x3501   :  { %v2890_v49 = vpop.permute.xlu0 %2889 }
0x3502   :  { %v2895_v19 = vsel %vm66_vm1, %v2890_v49, %v2893_v41 }
0x3503   :  { %6608 = vmatmul.mubr.msk.f32.vlgmr.msra.gmra.mrb[26].mxu1 %vm68_vm2, %v2895_v19 }
0x3504   :  { %6622 = vmatpush3.msk.msra.mxu1 %vm417_vm7, %v8787_v50  ;;  %6623 = vmatprep.mubr.msk.f32.mxu1 %vm7853_vm0, %v9586_v4 }
0x3505   :  { %7182 = vmatprep.subr.bf16.mxu1 %v9588_v22 }
0x35d6   :  { %v2965_v47 = vpop.f32.mrb[26].mxu1 }
0x35d7   :  { %v2966_v6 = vadd.f32 %v8560_v0, %v2965_v47  ;;  %v6609_v15 = vpop.f32.mrb[27].mxu1 }
0x35d9   :  { %7553 = vtanh.f32 %v2966_v6  ;;  %v5836_v17 = vmul.f32 -1.442695, %v2966_v6 }
0x35db   :  { %7555 = vpow2.f32 %v5836_v17 }
0x35e3   :  { %v7554_v2 = vpop.eup %7553 }
0x35e4   :  { %2978 = vrot.lane.b32.xlu0 %v7554_v2, %s7855_s28 }
0x35e5   :  { %v7556_v32 = vpop.eup %7555 }
0x35e6   :  { %v2972_v23 = vadd.f32 1.0, %v7556_v32 }
0x35e8   :  { %7557 = vrcp.f32 %v2972_v23 }
0x35f2   :  { %v7558_v7 = vpop.eup %7557 }
0x35f3   :  { %v2976_v60 = vmul.f32 %v7558_v7, %v8682_v57 }
0x3656   :  { %v2979_v12 = vpop.permute.xlu0 %2978 }
0x3657   :  { %v2981_v48 = vmul.f32 %v7558_v7, %v2979_v12 }
0x3659   :  { %2983 = vrot.lane.b32.xlu1 %v2981_v48, %s7856_s11 }
0x36cb   :  { %v2984_v9 = vpop.permute.xlu1 %2983 }
0x36cc   :  { %v8798_v41 = vadd.f32 %v2984_v9, %v2976_v60 }
0x36ce   :  { %7559 = vtanh.f32 %v8798_v41 }
0x36d8   :  { %v7560_v49 = vpop.eup %7559 }
0x36d9   :  { %2989 = vrot.lane.b32.xlu0 %v7560_v49, %s7855_s28 }
0x374b   :  { %v2990_v19 = vpop.permute.xlu0 %2989 }
0x374c   :  { %v8802_v47 = vmul.f32 %v7558_v7, %v2990_v19 }
0x374e   :  { %2994 = vrot.lane.b32.xlu1 %v8802_v47, %s7856_s11 }
0x37c0   :  { %v2995_v6 = vpop.permute.xlu1 %2994 }
0x37c1   :  { %6619 = vmatmul.mubr.msk.f32.vlgmr.msra.gmra.mrb[26].mxu0 %vm66_vm1, %v2995_v6 }
0x37c2   :  { %7172 = vmatpush3.bf16.msra.mxu0 %v7972_v5  ;;  %6642 = vmatprep.mubr.msk.f32.mxu0 %vm7853_vm0, %v9586_v4 }
0x37c3   :  { %7173 = vmatprep.subr.bf16.mxu0 %v9588_v22 }
0x37c6   :  { %7175 = vmatpush3.bf16.msra.mxu0 %v7983_v8 }
0x37c7   :  { %7176 = vmatprep.subr.bf16.mxu0 %v9588_v22 }
0x37ca   :  { %7178 = vmatpush3.bf16.msra.mxu0 %v7993_v11 }
0x37cb   :  { %7179 = vmatprep.subr.bf16.mxu0 %v9588_v22 }
0x37ce   :  { %7181 = vmatpush3.bf16.msra.mxu0 %v8003_v14 }
0x37cf   :  { %7194 = vmatprep.subr.bf16.mxu0 %v9588_v22 }
0x3894   :  { %v3064_v57 = vpop.f32.mrb[26].mxu0 }
0x3895   :  { %v3065_v15 = vadd.f32 %v8588_v21, %v3064_v57  ;;  %v6620_v2 = vpop.f32.mrb[27].mxu0 }
0x3897   :  { %v3068_v17 = vmul.f32 0.2, %v3065_v15 }
0x3899   :  { %7561 = vtanh.f32 %v3068_v17 }
0x38a3   :  { %v7562_v32 = vpop.eup %7561 }
0x38a4   :  { %v3070_v23 = vmul.f32 2.5, %v7562_v32  ;;  %v9556_v32 = vmov 3  }
0x38a5   :  { %7379 = vset.pattern.permute.xlu1 %v9556_v32  ;;  %7380 = vset.pattern.permute.xlu0 %v9556_v32 }
0x38a6   :  { %7563 = vrcp.f32 %v3070_v23 }
0x38b0   :  { %v7564_v7 = vpop.eup %7563 }
0x38b1   :  { %v8818_v12 = vmul.f32 %v7564_v7, %v3068_v17 }
0x38b3   :  { %v3073_v48 = vsel %vm365_vm3, %v8818_v12, -inf }
0x38b4   :  { %3074 = vmax.xlane.f32.xlu0 %v3073_v48 }
0x3941   :  { %v8822_v60 = vpop.xlane.xlu0 %3074 }
0x3942   :  { %v3076_v9 = vsub.f32 %v8818_v12, %v8822_v60 }
0x3944   :  { %v3077_v49 = vmul.f32 1.442695, %v3076_v9 }
0x3946   :  { %7565 = vpow2.f32 %v3077_v49 }
0x3950   :  { %v7566_v21 = vpop.eup %7565 }
0x3951   :  { %v3079_v19 = vsel %vm365_vm3, %v7566_v21, 0.0 }
0x3952   :  { %3080 = vadd.xlane.f32.xlu1 %v3079_v19 }
0x39df   :  { %v8827_v6 = vpop.xlane.xlu1 %3080 }
0x39e0   :  { %7567 = vrcp.f32 %v8827_v6 }
0x39ea   :  { %v7568_v57 = vpop.eup %7567 }
0x39eb   :  { %v3083_v15 = vmul.f32 %v7568_v57, %v7566_v21 }
0x39ed   :  { %3094 = vrot.lane.b32.xlu1 %v3083_v15, %s7858_s26  ;;  %3090 = vrot.lane.b32.xlu0 %v3083_v15, %s7859_s27  ;;  %v3104_v2 = vrot.slane %v3083_v15, %v8330_v45 }
0x39ef   :  { %v3111_v17 = vrot.slane %v3104_v2, %v8330_v45 }
0x39f1   :  { %3112 = vrot.lane.b32.xlu0 %v3111_v17, %s7865_s1 }
0x3a5f   :  { %v3091_v23 = vpop.permute.xlu0 %3090  ;;  %v3095_v48 = vpop.permute.xlu1 %3094 }
0x3a60   :  { %v3093_v7 = vadd.f32 %v3091_v23, %v3083_v15  ;;  %v3088_v15 = vld [vmem:[%s9541_s12] sm:$0x1]  ;;  %v9589_v23 = vmov 0  }
0x3a62   :  { %v3097_v9 = vadd.f32 %v3095_v48, %v3093_v7  ;;  %v3124_v49 = vrot.slane %v3093_v7, %v8330_v45 }
0x3a63   :  { %v3113_v2 = vpop.permute.xlu0 %3112 }
0x3a64   :  { %v3131_v21 = vrot.slane %v3124_v49, %v8330_v45  ;;  %v3145_v19 = vrot.slane %v3097_v9, %v8330_v45  ;;  %vm3115_vm10 = vcmp.ge.f32.partialorder %v3088_v15, %v3113_v2 }
0x3a65   :  { %v3116_v7 = vsel %vm3115_vm10, 1, %v9589_v23  ;;  %vm3646_vm10 = vcmask 1042432  }
0x3a66   :  { %v3152_v57 = vrot.slane %v3145_v19, %v8330_v45  ;;  %3132 = vrot.lane.b32.xlu1 %v3131_v21, %s7865_s1 }
0x3a68   :  { %3153 = vrot.lane.b32.xlu0 %v3152_v57, %s7865_s1 }
0x3a6c   :  { %3256 = vrot.lane.b32.xlu0 %v8778_v30, %s7855_s28  ;;  %v3170_v30 = vsel %vm9568_vm6, 1, %v9589_v23 }
0x3ad8   :  { %v3133_v17 = vpop.permute.xlu1 %3132 }
0x3ad9   :  { %vm3135_vm12 = vcmp.ge.f32.partialorder %v3088_v15, %v3133_v17 }
0x3ada   :  { %v3136_v48 = vsel %vm3135_vm12, 1, %v9589_v23  ;;  %v3154_v9 = vpop.permute.xlu0 %3153  ;;  %vm3663_vm12 = vcmask 2048  }
0x3adb   :  { %v3137_v49 = vadd.s32 %v3136_v48, %v3116_v7  ;;  %vm3156_vm5 = vcmp.ge.f32.partialorder %v3088_v15, %v3154_v9 }
0x3adc   :  { %v3157_v21 = vsel %vm3156_vm5, 1, %v9589_v23  ;;  %vm3695_vm5 = vcmask 26648  }
0x3add   :  { %v3158_v19 = vadd.s32 %v3157_v21, %v3137_v49 }
0x3adf   :  { %3160 = vperm.xlu1 %7379, %v3158_v19  }
0x3b5e   :  { %v3161_v57 = vpop.permute.xlu1 %3160 }
0x3b5f   :  { %v3165_v2 = vrot.slane %v3161_v57, %v8170_v54 }
0x3b61   :  { %vm3166_vm9 = vcmp.eq.s32.totalorder %v8172_v56, %v3165_v2  ;;  %v3171_v17 = vmul.u32 %v3170_v30, %v3165_v2 }
0x3b62   :  { %v8858_v32 = vsel %vm3166_vm9, 1.0, %v9586_v4 }
0x3b63   :  { %9590 = vst [vmem:[#allocation19_spill] sm:$0xff] %v8858_v32  ;;  %6624 = vmatmul.mubr.msk.f32.vlgmr.msra.gmra.mrb[28].mxu1 %vm413_vm8, %v8858_v32  ;;  %v8863_v15 = vadd.s32 %v3171_v17, %v8636_v53  ;;  %v3257_v53 = vpop.permute.xlu0 %3256 }
0x3b64   :  { %7184 = vmatpush3.bf16.msra.mxu1 %v8038_v34  ;;  %6661 = vmatprep.mubr.msk.f32.mxu1 %vm7853_vm0, %v9586_v4 }
0x3b65   :  { %7185 = vmatprep.subr.bf16.mxu1 %v9588_v22 }
0x3b68   :  { %7187 = vmatpush3.bf16.msra.mxu1 %v8044_v36 }
0x3b69   :  { %7188 = vmatprep.subr.bf16.mxu1 %v9588_v22 }
0x3b6c   :  { %7190 = vmatpush3.bf16.msra.mxu1 %v8054_v39 }
0x3b6d   :  { %7191 = vmatprep.subr.bf16.mxu1 %v9588_v22 }
0x3b70   :  { %7193 = vmatpush3.bf16.msra.mxu1 %v8065_v43 }
0x3b71   :  { %7200 = vmatprep.subr.bf16.mxu1 %v9588_v22 }
0x3c36   :  { %v3242_v7 = vpop.f32.mrb[28].mxu1 }
0x3c37   :  { %v3259_v48 = vsel %vm66_vm1, %v3242_v7, %v3257_v53  ;;  %v6625_v9 = vpop.f32.mrb[29].mxu1 }
0x3c38   :  { %6643 = vmatmul.mubr.msk.f32.vlgmr.msra.gmra.mrb[28].mxu0 %vm68_vm2, %v3259_v48 }
0x3c39   :  { %7196 = vmatpush3.bf16.msra.mxu0 %v8417_v62  ;;  %6672 = vmatprep.mubr.msk.f32.mxu0 %vm7853_vm0, %v9586_v4 }
0x3c3a   :  { %7197 = vmatprep.subr.bf16.mxu0 %v9588_v22 }
0x3c3d   :  { %7199 = vmatpush3.bf16.msra.mxu0 %v8423_v63 }
0x3c3e   :  { %7206 = vmatprep.subr.bf16.mxu0 %v9588_v22 }
0x3d0b   :  { %v3329_v49 = vpop.f32.mrb[28].mxu0 }
0x3d0c   :  { %v3330_v21 = vadd.f32 %v8534_v61, %v3329_v49  ;;  %v6644_v19 = vpop.f32.mrb[29].mxu0 }
0x3d0e   :  { %7569 = vtanh.f32 %v3330_v21  ;;  %v5842_v57 = vmul.f32 -1.442695, %v3330_v21 }
0x3d10   :  { %7571 = vpow2.f32 %v5842_v57 }
0x3d18   :  { %v7570_v30 = vpop.eup %7569 }
0x3d19   :  { %3342 = vrot.lane.b32.xlu1 %v7570_v30, %s7855_s28 }
0x3d1a   :  { %v7572_v2 = vpop.eup %7571 }
0x3d1b   :  { %v3336_v17 = vadd.f32 1.0, %v7572_v2 }
0x3d1d   :  { %7573 = vrcp.f32 %v3336_v17 }
0x3d27   :  { %v7574_v53 = vpop.eup %7573 }
0x3d28   :  { %v3340_v9 = vmul.f32 %v7574_v53, %v8772_v37 }
0x3d8b   :  { %v3343_v7 = vpop.permute.xlu1 %3342 }
0x3d8c   :  { %v3345_v48 = vmul.f32 %v7574_v53, %v3343_v7 }
0x3d8e   :  { %3347 = vrot.lane.b32.xlu0 %v3345_v48, %s7856_s11 }
0x3e00   :  { %v3348_v18 = vpop.permute.xlu0 %3347 }
0x3e01   :  { %v8887_v16 = vadd.f32 %v3348_v18, %v3340_v9 }
0x3e03   :  { %7575 = vtanh.f32 %v8887_v16 }
0x3e0d   :  { %v7576_v61 = vpop.eup %7575 }
0x3e0e   :  { %3353 = vrot.lane.b32.xlu1 %v7576_v61, %s7855_s28 }
0x3e12   :  { %3361 = vrot.lane.b32.xlu1 %v8802_v47, %s7855_s28 }
0x3e80   :  { %v3354_v49 = vpop.permute.xlu1 %3353 }
0x3e81   :  { %v8893_v21 = vmul.f32 %v7574_v53, %v3354_v49 }
0x3e83   :  { %3358 = vrot.lane.b32.xlu0 %v8893_v21, %s7856_s11 }
0x3e84   :  { %v3362_v19 = vpop.permute.xlu1 %3361 }
0x3ef5   :  { %v3359_v30 = vpop.permute.xlu0 %3358 }
0x3ef6   :  { %v3364_v37 = vsel %vm66_vm1, %v3359_v30, %v3362_v19 }
0x3ef7   :  { %6662 = vmatmul.mubr.msk.f32.vlgmr.msra.gmra.mrb[30].mxu1 %vm68_vm2, %v3364_v37 }
0x3ef8   :  { %7202 = vmatpush3.bf16.msra.mxu1 %v8457_v20  ;;  %6683 = vmatprep.mubr.msk.f32.mxu1 %vm7853_vm0, %v9586_v4 }
0x3ef9   :  { %7203 = vmatprep.subr.bf16.mxu1 %v9588_v22 }
0x3efc   :  { %7205 = vmatpush3.bf16.msra.mxu1 %v8467_v27 }
0x3efd   :  { %7212 = vmatprep.subr.bf16.mxu1 %v9588_v22 }
0x3fca   :  { %v3434_v18 = vpop.f32.mrb[30].mxu1 }
0x3fcb   :  { %v3435_v47 = vadd.f32 %v8560_v0, %v3434_v18  ;;  %v6663_v57 = vpop.f32.mrb[31].mxu1 }
0x3fcc   :  { %v8938_v57 = vld [vmem:[%s9538_s9] sm:$0x1] }
0x3fcd   :  { %7577 = vtanh.f32 %v3435_v47  ;;  %v5844_v17 = vmul.f32 -1.442695, %v3435_v47 }
0x3fcf   :  { %7579 = vpow2.f32 %v5844_v17 }
0x3fd7   :  { %v7578_v2 = vpop.eup %7577 }
0x3fd8   :  { %3447 = vrot.lane.b32.xlu0 %v7578_v2, %s7855_s28 }
0x3fd9   :  { %v7580_v53 = vpop.eup %7579 }
0x3fda   :  { %v3441_v7 = vadd.f32 1.0, %v7580_v53 }
0x3fdc   :  { %7581 = vrcp.f32 %v3441_v7 }
0x3fe6   :  { %v7582_v48 = vpop.eup %7581 }
0x3fe7   :  { %v3445_v49 = vmul.f32 %v7582_v48, %v8798_v41 }
0x404a   :  { %v3448_v9 = vpop.permute.xlu0 %3447 }
0x404b   :  { %v3450_v61 = vmul.f32 %v7582_v48, %v3448_v9  ;;  %v8946_v9 = vld [vmem:[%s9536_s7] sm:$0x1]  ;;  %s7786_s7 = scalar_lea.vmem %s5741_s8, 32 }
0x404c   :  { %p7788_p2 = scmp.lt.s32.totalorder %s7786_s7, %s7782_s19 }
0x404d   :  { %3452 = vrot.lane.b32.xlu1 %v3450_v61, %s7856_s11 }
0x404e   :  { %p7789_p3 = por %p7788_p2, %p7787_p1 }
0x4050   :  { %p7790_p4 = pnand %p7789_p3, %p7783_p0 }
0x40bf   :  { %v3453_v19 = vpop.permute.xlu1 %3452 }
0x40c0   :  { %v8909_v30 = vadd.f32 %v3453_v19, %v3445_v49 }
0x40c2   :  { %7583 = vtanh.f32 %v8909_v30 }
0x40cc   :  { %v7584_v0 = vpop.eup %7583 }
0x40cd   :  { %3458 = vrot.lane.b32.xlu0 %v7584_v0, %s7855_s28 }
0x413f   :  { %v3459_v37 = vpop.permute.xlu0 %3458 }
0x4140   :  { %v8913_v18 = vmul.f32 %v7582_v48, %v3459_v37 }
0x4142   :  { %3470 = vrot.lane.b32.xlu1 %v8913_v18, %s7856_s11 }
0x41b4   :  { %v3471_v47 = vpop.permute.xlu1 %3470 }
0x41b5   :  { %6673 = vmatmul.mubr.msk.f32.vlgmr.msra.gmra.mrb[30].mxu0 %vm66_vm1, %v3471_v47 }
0x41b6   :  { %7208 = vmatpush3.bf16.msra.mxu0 %v8252_v28  ;;  %6694 = vmatprep.mubr.msk.f32.mxu0 %vm7853_vm0, %v9586_v4 }
0x41b7   :  { %7209 = vmatprep.subr.bf16.mxu0 %v9588_v22 }
0x41ba   :  { %7211 = vmatpush3.bf16.msra.mxu0 %v8258_v29 }
0x41bb   :  { %7224 = vmatprep.subr.bf16.mxu0 %v9588_v22 }
0x41bd   :  { %6695 = vmatmul.mubr.msk.f32.vlgmr.msra.gmra.mrb[32].mxu0 %vm66_vm1, %v3471_v47 }
0x41be   :  { %7226 = vmatpush3.bf16.msra.mxu0 %v8038_v34  ;;  %6732 = vmatprep.mubr.msk.f32.mxu0 %vm7853_vm0, %v9586_v4 }
0x41bf   :  { %7227 = vmatprep.subr.bf16.mxu0 %v9588_v22 }
0x41c2   :  { %7229 = vmatpush3.bf16.msra.mxu0 %v8044_v36 }
0x41c3   :  { %7230 = vmatprep.subr.bf16.mxu0 %v9588_v22 }
0x41c6   :  { %7232 = vmatpush3.bf16.msra.mxu0 %v8054_v39 }
0x41c7   :  { %7233 = vmatprep.subr.bf16.mxu0 %v9588_v22 }
0x41ca   :  { %7235 = vmatpush3.bf16.msra.mxu0 %v8065_v43 }
0x41cb   :  { %6746 = vmatprep.subr.mxu0 %v9586_v4 }
0x4288   :  { %v3540_v41 = vpop.f32.mrb[30].mxu0 }
0x4289   :  { %v3541_v2 = vadd.f32 %v8938_v57, %v3540_v41  ;;  %v6674_v17 = vpop.f32.mrb[31].mxu0 }
0x428b   :  { %v3547_v53 = vrot.slane %v3541_v2, %v8170_v54 }
0x428d   :  { %v3548_v7 = vadd.f32 %v3547_v53, %v8714_v59 }
0x428f   :  { %7585 = vtanh.f32 %v3548_v7 }
0x4290   :  { %v3791_v48 = vpop.f32.mrb[32].mxu0 }
0x4291   :  { %v3792_v61 = vadd.f32 %v8946_v9, %v3791_v48  ;;  %v6696_v49 = vpop.f32.mrb[33].mxu0 }
0x4293   :  { %v4478_v19 = vrot.slane %v3792_v61, 5 }
0x4295   :  { %v8951_v0 = vsel %vm3646_vm10, %v8714_v59, %v4478_v19 }
0x4299   :  { %v7586_v37 = vpop.eup %7585 }
0x429a   :  { %6684 = vmatmul.mubr.msk.f32.vlgmr.msra.gmra.mrb[32].mxu1 %vm66_vm1, %v7586_v37 }
0x429b   :  { %7214 = vmatpush3.bf16.msra.mxu1 %v7972_v5  ;;  %6713 = vmatprep.mubr.msk.f32.mxu1 %vm7853_vm0, %v9586_v4 }
0x429c   :  { %7215 = vmatprep.subr.bf16.mxu1 %v9588_v22 }
0x429f   :  { %7217 = vmatpush3.bf16.msra.mxu1 %v7983_v8 }
0x42a0   :  { %7218 = vmatprep.subr.bf16.mxu1 %v9588_v22 }
0x42a3   :  { %7220 = vmatpush3.bf16.msra.mxu1 %v7993_v11 }
0x42a4   :  { %7221 = vmatprep.subr.bf16.mxu1 %v9588_v22 }
0x42a7   :  { %7223 = vmatpush3.bf16.msra.mxu1 %v8003_v14 }
0x42a8   :  { %7236 = vmatprep.subr.bf16.mxu1 %v9588_v22 }
0x436d   :  { %v3619_v59 = vpop.f32.mrb[32].mxu1 }
0x436e   :  { %v3620_v47 = vadd.f32 %v3619_v59, %v8729_v25  ;;  %v6685_v41 = vpop.f32.mrb[33].mxu1 }
0x4370   :  { %v3623_v2 = vmul.f32 0.2, %v3620_v47 }
0x4372   :  { %7587 = vtanh.f32 %v3623_v2 }
0x437c   :  { %v7588_v17 = vpop.eup %7587 }
0x437d   :  { %v3625_v53 = vmul.f32 2.5, %v7588_v17 }
0x437f   :  { %7589 = vrcp.f32 %v3625_v53 }
0x4389   :  { %v7590_v7 = vpop.eup %7589 }
0x438a   :  { %v8965_v48 = vmul.f32 %v7590_v7, %v3623_v2 }
0x438c   :  { %9591 = vst [vmem:[#allocation20_spill] sm:$0xff] %v8965_v48  ;;  %v5847_v61 = vmul.f32 -1.442695, %v8965_v48 }
0x438e   :  { %7591 = vpow2.f32 %v5847_v61 }
0x4398   :  { %v7592_v49 = vpop.eup %7591 }
0x4399   :  { %v3631_v19 = vadd.f32 1.0, %v7592_v49 }
0x439b   :  { %7593 = vrcp.f32 %v3631_v19 }
0x43a5   :  { %v7594_v37 = vpop.eup %7593 }
0x43a6   :  { %v3678_v13 = vmul.f32 1.6666666, %v7594_v37  ;;  %v3682_v46 = vmul.f32 2.5, %v7594_v37  ;;  %v3634_v31 = vadd.f32 %v7594_v37, %v7594_v37 }
0x43a8   :  { %7595 = vlog2.f32 %v3678_v13 }
0x43a9   :  { %7597 = vlog2.f32 %v3682_v46 }
0x43aa   :  { %7599 = vrcp.f32 %v3634_v31 }
0x43b2   :  { %v7596_v59 = vpop.eup %7595 }
0x43b3   :  { %v7598_v47 = vpop.eup %7597  ;;  %v3680_v41 = vmul.f32 0.6931472, %v7596_v59  ;;  %v3637_v59 = vld [vmem:[%s9542_s13] sm:$0x7] }
0x43b4   :  { %v7600_v17 = vpop.eup %7599  ;;  %v3684_v53 = vmul.f32 0.6931472, %v7598_v47 }
0x43b5   :  { %v3681_v2 = vmul.f32 %v7594_v37, %v3680_v41  ;;  %v3636_v7 = vmul.f32 %v7600_v17, %v7594_v37 }
0x43b6   :  { %v3685_v10 = vmul.f32 %v7594_v37, %v3684_v53 }
0x43b7   :  { %3639 = vrot.lane.b32.xlu0 %v3636_v7, %s7865_s1  ;;  %v3462_v7 = vrot.slane %v8686_v42, 6 }
0x43b8   :  { %v3686_v61 = vadd.f32 %v3685_v10, %v3681_v2 }
0x43ba   :  { %v3687_v49 = vsel %vm3663_vm12, %v3686_v61, 0.0  ;;  %v8984_v61 = vsel %vm2634_vm13, %v8756_v38, %v3462_v7 }
0x43bb   :  { %v3688_v19 = vrot.slane %v3687_v49, 4 }
0x43bd   :  { %v3689_v48 = vadd.f32 %v3688_v19, %v3687_v49 }
0x43bf   :  { %v3690_v44 = vrot.slane %v3689_v48, 2 }
0x43c1   :  { %v3691_v13 = vadd.f32 %v3690_v44, %v3689_v48 }
0x43c3   :  { %v3692_v46 = vrot.slane %v3691_v13, 1 }
0x43c5   :  { %v3693_v31 = vadd.f32 %v3692_v46, %v3691_v13 }
0x43c7   :  { %v8971_v32 = vadd.f32 %v3693_v31, %v8741_v51 }
0x4429   :  { %v3640_v37 = vpop.permute.xlu0 %3639 }
0x442a   :  { %vm3642_vm9 = vcmp.ge.f32.partialorder %v3637_v59, %v3640_v37 }
0x442b   :  { %v8977_v10 = vsel %vm3642_vm9, 1.0, %v9586_v4  ;;  %vm3709_vm9 = vcmask 1043200  }
0x442c   :  { %9592 = vst [vmem:[#allocation21_spill] sm:$0xff] %v8977_v10  ;;  %v3696_v47 = vsel %vm3695_vm5, %v8977_v10, 0.0  ;;  %3705 = vperm.xlu1 %7379, %v8977_v10  }
0x442d   :  { %v3697_v44 = vrot.slane %v3696_v47, 4 }
0x442f   :  { %v3698_v48 = vadd.f32 %v3697_v44, %v3696_v47 }
0x4431   :  { %v3699_v41 = vrot.slane %v3698_v48, 2 }
0x4433   :  { %v3700_v17 = vadd.f32 %v3699_v41, %v3698_v48 }
0x4435   :  { %v3701_v51 = vrot.slane %v3700_v17, 1 }
0x4437   :  { %v3702_v53 = vadd.f32 %v3701_v51, %v3700_v17 }
0x4439   :  { %v3717_v2 = vadd.f32 1.0, %v3702_v53 }
0x443b   :  { %3720 = vperm.xlu0 %7380, %v3717_v2  }
0x44ab   :  { %v3706_v49 = vpop.permute.xlu1 %3705 }
0x44ac   :  { %v3708_v19 = vmul.f32 %v3706_v49, %v8984_v61 }
0x44ae   :  { %v3710_v13 = vsel %vm3709_vm9, %v3708_v19, 0.0 }
0x44af   :  { %v3711_v46 = vrot.slane %v3710_v13, 4 }
0x44b1   :  { %v3712_v31 = vadd.f32 %v3711_v46, %v3710_v13 }
0x44b3   :  { %v3713_v59 = vrot.slane %v3712_v31, 2 }
0x44b5   :  { %v3714_v47 = vadd.f32 %v3713_v59, %v3712_v31 }
0x44b7   :  { %v3715_v44 = vrot.slane %v3714_v47, 1 }
0x44b9   :  { %v3716_v48 = vadd.f32 %v3715_v44, %v3714_v47 }
0x44ba   :  { %v3721_v37 = vpop.permute.xlu0 %3720 }
0x44bb   :  { %7601 = vrcp.f32 %v3721_v37 }
0x44c5   :  { %v7602_v41 = vpop.eup %7601 }
0x44c6   :  { %v3724_v17 = vmul.f32 %v7602_v41, %v3716_v48 }
0x44c8   :  { %3796 = vrot.lane.b32.xlu1 %v3724_v17, %s7856_s11 }
0x44cc   :  { %3799 = vrot.lane.b32.xlu1 %v8893_v21, %s7855_s28  ;;  %v9001_v21 = vld [vmem:[%s9531_s2] sm:$0x1] }
0x453a   :  { %v3797_v42 = vpop.permute.xlu1 %3796 }
0x453e   :  { %v3800_v38 = vpop.permute.xlu1 %3799 }
0x453f   :  { %v3802_v51 = vsel %vm66_vm1, %v3797_v42, %v3800_v38 }
0x4540   :  { %6714 = vmatmul.mubr.msk.f32.vlgmr.msra.gmra.mrb[34].mxu1 %vm68_vm2, %v3802_v51 }
0x4541   :  { %7238 = vmatpush3.bf16.msra.mxu1 %v8098_v1  ;;  %6743 = vmatprep.mubr.msk.f32.mxu1 %vm7853_vm0, %v9586_v4 }
0x4542   :  { %7239 = vmatprep.subr.bf16.mxu1 %v9588_v22 }
0x4545   :  { %7241 = vmatpush3.bf16.msra.mxu1 %v8104_v3 }
0x4546   :  { %7242 = vmatprep.subr.bf16.mxu1 %v9588_v22 }
0x4613   :  { %v3872_v53 = vpop.f32.mrb[34].mxu1 }
0x4614   :  { %v3873_v2 = vadd.f32 %v9001_v21, %v3872_v53  ;;  %v6715_v7 = vpop.f32.mrb[35].mxu1 }
0x4616   :  { %7603 = vtanh.f32 %v3873_v2  ;;  %v5852_v19 = vmul.f32 -1.442695, %v3873_v2  ;;  %v9027_v2 = vld [vmem:[%s9531_s2 + $0x1] sm:$0x1] }
0x4618   :  { %7605 = vpow2.f32 %v5852_v19 }
0x4620   :  { %v7604_v49 = vpop.eup %7603 }
0x4621   :  { %3885 = vrot.lane.b32.xlu0 %v7604_v49, %s7855_s28 }
0x4622   :  { %v7606_v13 = vpop.eup %7605 }
0x4623   :  { %v3879_v46 = vadd.f32 1.0, %v7606_v13 }
0x4625   :  { %7607 = vrcp.f32 %v3879_v46 }
0x462f   :  { %v7608_v31 = vpop.eup %7607 }
0x4630   :  { %v3883_v47 = vmul.f32 %v7608_v31, %v8887_v16 }
0x4693   :  { %v3886_v59 = vpop.permute.xlu0 %3885 }
0x4694   :  { %v3888_v37 = vmul.f32 %v7608_v31, %v3886_v59 }
0x4696   :  { %3890 = vrot.lane.b32.xlu1 %v3888_v37, %s7856_s11 }
0x4708   :  { %v3891_v44 = vpop.permute.xlu1 %3890 }
0x4709   :  { %v9007_v48 = vadd.f32 %v3891_v44, %v3883_v47 }
0x470b   :  { %7609 = vtanh.f32 %v9007_v48 }
0x4715   :  { %v7610_v41 = vpop.eup %7609 }
0x4716   :  { %3896 = vrot.lane.b32.xlu0 %v7610_v41, %s7855_s28 }
0x471a   :  { %3904 = vrot.lane.b32.xlu0 %v8913_v18, %s7855_s28 }
0x4788   :  { %v3897_v17 = vpop.permute.xlu0 %3896 }
0x4789   :  { %v9013_v42 = vmul.f32 %v7608_v31, %v3897_v17 }
0x478b   :  { %3901 = vrot.lane.b32.xlu1 %v9013_v42, %s7856_s11 }
0x478c   :  { %v3905_v38 = vpop.permute.xlu0 %3904 }
0x47fd   :  { %v3902_v51 = vpop.permute.xlu1 %3901 }
0x47fe   :  { %v3907_v16 = vsel %vm66_vm1, %v3902_v51, %v3905_v38 }
0x47ff   :  { %6733 = vmatmul.mubr.msk.f32.vlgmr.msra.gmra.mrb[34].mxu0 %vm68_vm2, %v3907_v16 }
0x4800   :  { %6747 = vmatpush3.msk.msra.mxu0 %vm417_vm7, %v8787_v50  ;;  %6748 = vmatprep.mubr.msk.f32.mxu0 %vm7853_vm0, %v9586_v4 }
0x4801   :  { %7254 = vmatprep.subr.bf16.mxu0 %v9588_v22 }
0x48d2   :  { %v3977_v53 = vpop.f32.mrb[34].mxu0 }
0x48d3   :  { %v3978_v7 = vadd.f32 %v9027_v2, %v3977_v53  ;;  %v6734_v49 = vpop.f32.mrb[35].mxu0  ;;  %v9055_v53 = vld [vmem:[%s9533_s4] sm:$0x1]  ;;  %s7867_s4 = smov 4  }
0x48d5   :  { %7611 = vtanh.f32 %v3978_v7  ;;  %v5854_v13 = vmul.f32 -1.442695, %v3978_v7 }
0x48d7   :  { %7613 = vpow2.f32 %v5854_v13 }
0x48df   :  { %v7612_v19 = vpop.eup %7611 }
0x48e0   :  { %3990 = vrot.lane.b32.xlu1 %v7612_v19, %s7855_s28 }
0x48e1   :  { %v7614_v50 = vpop.eup %7613 }
0x48e2   :  { %v3984_v46 = vadd.f32 1.0, %v7614_v50 }
0x48e4   :  { %7615 = vrcp.f32 %v3984_v46 }
0x48ee   :  { %v7616_v31 = vpop.eup %7615 }
0x48ef   :  { %v3988_v47 = vmul.f32 %v7616_v31, %v8909_v30 }
0x4952   :  { %v3991_v59 = vpop.permute.xlu1 %3990 }
0x4953   :  { %v3993_v37 = vmul.f32 %v7616_v31, %v3991_v59 }
0x4955   :  { %3995 = vrot.lane.b32.xlu0 %v3993_v37, %s7856_s11 }
0x49c7   :  { %v3996_v44 = vpop.permute.xlu0 %3995 }
0x49c8   :  { %v9033_v41 = vadd.f32 %v3996_v44, %v3988_v47 }
0x49ca   :  { %7617 = vtanh.f32 %v9033_v41 }
0x49d4   :  { %v7618_v17 = vpop.eup %7617 }
0x49d5   :  { %4001 = vrot.lane.b32.xlu1 %v7618_v17, %s7855_s28 }
0x4a47   :  { %v4002_v38 = vpop.permute.xlu1 %4001 }
0x4a48   :  { %v9037_v51 = vmul.f32 %v7616_v31, %v4002_v38 }
0x4a4a   :  { %4006 = vrot.lane.b32.xlu0 %v9037_v51, %s7856_s11 }
0x4abc   :  { %v4007_v16 = vpop.permute.xlu0 %4006 }
0x4abd   :  { %6744 = vmatmul.mubr.msk.f32.vlgmr.msra.gmra.mrb[36].mxu1 %vm66_vm1, %v4007_v16 }
0x4abe   :  { %7244 = vmatpush3.bf16.msra.mxu1 %v7972_v5  ;;  %6767 = vmatprep.mubr.msk.f32.mxu1 %vm7853_vm0, %v9586_v4 }
0x4abf   :  { %7245 = vmatprep.subr.bf16.mxu1 %v9588_v22 }
0x4ac2   :  { %7247 = vmatpush3.bf16.msra.mxu1 %v7983_v8 }
0x4ac3   :  { %7248 = vmatprep.subr.bf16.mxu1 %v9588_v22 }
0x4ac6   :  { %7250 = vmatpush3.bf16.msra.mxu1 %v7993_v11 }
0x4ac7   :  { %7251 = vmatprep.subr.bf16.mxu1 %v9588_v22 }
0x4aca   :  { %7253 = vmatpush3.bf16.msra.mxu1 %v8003_v14 }
0x4acb   :  { %7266 = vmatprep.subr.bf16.mxu1 %v9588_v22 }
0x4b90   :  { %v4076_v30 = vpop.f32.mrb[36].mxu1 }
0x4b91   :  { %v4077_v7 = vadd.f32 %v9055_v53, %v4076_v30  ;;  %v6745_v49 = vpop.f32.mrb[37].mxu1 }
0x4b93   :  { %v4080_v19 = vmul.f32 0.2, %v4077_v7 }
0x4b95   :  { %7619 = vtanh.f32 %v4080_v19 }
0x4b9f   :  { %v7620_v13 = vpop.eup %7619 }
0x4ba0   :  { %v4082_v50 = vmul.f32 2.5, %v7620_v13  ;;  %v7868_v13 = vmov 4  }
0x4ba1   :  { %7381 = vset.pattern.permute.xlu0 %v7868_v13  ;;  %7382 = vset.pattern.permute.xlu1 %v7868_v13 }
0x4ba2   :  { %7621 = vrcp.f32 %v4082_v50 }
0x4bac   :  { %v7622_v46 = vpop.eup %7621 }
0x4bad   :  { %v9058_v31 = vmul.f32 %v7622_v46, %v4080_v19 }
0x4baf   :  { %v4085_v59 = vsel %vm365_vm3, %v9058_v31, -inf }
0x4bb0   :  { %4086 = vmax.xlane.f32.xlu1 %v4085_v59 }
0x4c3d   :  { %v9062_v37 = vpop.xlane.xlu1 %4086 }
0x4c3e   :  { %v4088_v47 = vsub.f32 %v9058_v31, %v9062_v37 }
0x4c40   :  { %v4089_v44 = vmul.f32 1.442695, %v4088_v47 }
0x4c42   :  { %7623 = vpow2.f32 %v4089_v44 }
0x4c4c   :  { %v7624_v17 = vpop.eup %7623 }
0x4c4d   :  { %v4091_v38 = vsel %vm365_vm3, %v7624_v17, 0.0 }
0x4c4e   :  { %4092 = vadd.xlane.f32.xlu0 %v4091_v38 }
0x4cdb   :  { %v9067_v16 = vpop.xlane.xlu0 %4092 }
0x4cdc   :  { %7625 = vrcp.f32 %v9067_v16 }
0x4ce6   :  { %v7626_v30 = vpop.eup %7625 }
0x4ce7   :  { %v4095_v7 = vmul.f32 %v7626_v30, %v7624_v17 }
0x4ce9   :  { %4106 = vrot.lane.b32.xlu1 %v4095_v7, %s7858_s26  ;;  %4102 = vrot.lane.b32.xlu0 %v4095_v7, %s7859_s27  ;;  %v4116_v49 = vrot.slane %v4095_v7, %v8330_v45 }
0x4ceb   :  { %v4123_v19 = vrot.slane %v4116_v49, %v8330_v45 }
0x4ced   :  { %4124 = vrot.lane.b32.xlu1 %v4123_v19, %s7867_s4 }
0x4d5b   :  { %v4103_v50 = vpop.permute.xlu0 %4102  ;;  %v4107_v59 = vpop.permute.xlu1 %4106 }
0x4d5c   :  { %v4105_v46 = vadd.f32 %v4103_v50, %v4095_v7  ;;  %v4100_v7 = vld [vmem:[%s9541_s12] sm:$0x1] }
0x4d5e   :  { %v4109_v47 = vadd.f32 %v4107_v59, %v4105_v46  ;;  %v4136_v44 = vrot.slane %v4105_v46, %v8330_v45 }
0x4d5f   :  { %v4125_v49 = vpop.permute.xlu1 %4124 }
0x4d60   :  { %v4143_v17 = vrot.slane %v4136_v44, %v8330_v45  ;;  %v4157_v38 = vrot.slane %v4109_v47, %v8330_v45  ;;  %vm4127_vm5 = vcmp.ge.f32.partialorder %v4100_v7, %v4125_v49 }
0x4d61   :  { %v4128_v13 = vsel %vm4127_vm5, 1, %v9589_v23 }
0x4d62   :  { %v4164_v30 = vrot.slane %v4157_v38, %v8330_v45  ;;  %4144 = vrot.lane.b32.xlu0 %v4143_v17, %s7867_s4 }
0x4d64   :  { %4165 = vrot.lane.b32.xlu1 %v4164_v30, %s7867_s4 }
0x4d68   :  { %4268 = vrot.lane.b32.xlu1 %v9013_v42, %s7855_s28  ;;  %v4182_v42 = vsel %vm9574_vm14, 1, %v9589_v23 }
0x4dd4   :  { %v4145_v19 = vpop.permute.xlu0 %4144 }
0x4dd5   :  { %vm4147_vm9 = vcmp.ge.f32.partialorder %v4100_v7, %v4145_v19 }
0x4dd6   :  { %v4148_v50 = vsel %vm4147_vm9, 1, %v9589_v23  ;;  %v4166_v46 = vpop.permute.xlu1 %4165  ;;  %vm4706_vm9 = vcmask 35872  }
0x4dd7   :  { %v4149_v59 = vadd.s32 %v4148_v50, %v4128_v13  ;;  %vm4168_vm6 = vcmp.ge.f32.partialorder %v4100_v7, %v4166_v46 }
0x4dd8   :  { %v4169_v47 = vsel %vm4168_vm6, 1, %v9589_v23  ;;  %vm4674_vm6 = vcmask 3072  }
0x4dd9   :  { %v4170_v44 = vadd.s32 %v4169_v47, %v4149_v59 }
0x4ddb   :  { %4172 = vperm.xlu0 %7381, %v4170_v44  }
0x4e5a   :  { %v4173_v17 = vpop.permute.xlu0 %4172 }
0x4e5b   :  { %v4177_v38 = vrot.slane %v4173_v17, %v8170_v54 }
0x4e5d   :  { %vm4178_vm5 = vcmp.eq.s32.totalorder %v8172_v56, %v4177_v38  ;;  %v4183_v30 = vmul.u32 %v4182_v42, %v4177_v38 }
0x4e5e   :  { %v9096_v49 = vsel %vm4178_vm5, 1.0, %v9586_v4 }
0x4e5f   :  { %6749 = vmatmul.mubr.msk.f32.vlgmr.msra.gmra.mrb[36].mxu0 %vm413_vm8, %v9096_v49  ;;  %v9101_v7 = vadd.s32 %v4183_v30, %v8863_v15  ;;  %v4269_v15 = vpop.permute.xlu1 %4268 }
0x4e60   :  { %7256 = vmatpush3.bf16.msra.mxu0 %v8038_v34  ;;  %6786 = vmatprep.mubr.msk.f32.mxu0 %vm7853_vm0, %v9586_v4 }
0x4e61   :  { %7257 = vmatprep.subr.bf16.mxu0 %v9588_v22 }
0x4e64   :  { %7259 = vmatpush3.bf16.msra.mxu0 %v8044_v36 }
0x4e65   :  { %7260 = vmatprep.subr.bf16.mxu0 %v9588_v22 }
0x4e68   :  { %7262 = vmatpush3.bf16.msra.mxu0 %v8054_v39 }
0x4e69   :  { %7263 = vmatprep.subr.bf16.mxu0 %v9588_v22 }
0x4e6c   :  { %7265 = vmatpush3.bf16.msra.mxu0 %v8065_v43 }
0x4e6d   :  { %7272 = vmatprep.subr.bf16.mxu0 %v9588_v22 }
0x4f32   :  { %v4254_v19 = vpop.f32.mrb[36].mxu0 }
0x4f33   :  { %v4271_v13 = vsel %vm66_vm1, %v4254_v19, %v4269_v15  ;;  %v6750_v50 = vpop.f32.mrb[37].mxu0 }
0x4f34   :  { %6768 = vmatmul.mubr.msk.f32.vlgmr.msra.gmra.mrb[38].mxu1 %vm68_vm2, %v4271_v13 }
0x4f35   :  { %7268 = vmatpush3.bf16.msra.mxu1 %v8417_v62  ;;  %6797 = vmatprep.mubr.msk.f32.mxu1 %vm7853_vm0, %v9586_v4 }
0x4f36   :  { %7269 = vmatprep.subr.bf16.mxu1 %v9588_v22 }
0x4f39   :  { %7271 = vmatpush3.bf16.msra.mxu1 %v8423_v63 }
0x4f3a   :  { %7278 = vmatprep.subr.bf16.mxu1 %v9588_v22 }
0x5007   :  { %v4341_v46 = vpop.f32.mrb[38].mxu1 }
0x5008   :  { %v4342_v59 = vadd.f32 %v9001_v21, %v4341_v46  ;;  %v6769_v47 = vpop.f32.mrb[39].mxu1 }
0x500a   :  { %7627 = vtanh.f32 %v4342_v59  ;;  %v5860_v42 = vmul.f32 -1.442695, %v4342_v59 }
0x500c   :  { %7629 = vpow2.f32 %v5860_v42 }
0x5014   :  { %v7628_v44 = vpop.eup %7627 }
0x5015   :  { %4354 = vrot.lane.b32.xlu1 %v7628_v44, %s7855_s28 }
0x5016   :  { %v7630_v17 = vpop.eup %7629 }
0x5017   :  { %v4348_v38 = vadd.f32 1.0, %v7630_v17 }
0x5019   :  { %7631 = vrcp.f32 %v4348_v38 }
0x5023   :  { %v7632_v30 = vpop.eup %7631 }
0x5024   :  { %v4352_v13 = vmul.f32 %v7632_v30, %v9007_v48 }
0x5087   :  { %v4355_v15 = vpop.permute.xlu1 %4354 }
0x5088   :  { %v4357_v19 = vmul.f32 %v7632_v30, %v4355_v15 }
0x508a   :  { %4359 = vrot.lane.b32.xlu0 %v4357_v19, %s7856_s11 }
0x50fc   :  { %v4360_v50 = vpop.permute.xlu0 %4359 }
0x50fd   :  { %v9125_v10 = vadd.f32 %v4360_v50, %v4352_v13 }
0x50ff   :  { %7633 = vtanh.f32 %v9125_v10 }
0x5109   :  { %v7634_v46 = vpop.eup %7633 }
0x510a   :  { %4365 = vrot.lane.b32.xlu1 %v7634_v46, %s7855_s28 }
0x510e   :  { %4373 = vrot.lane.b32.xlu1 %v9037_v51, %s7855_s28 }
0x517c   :  { %v4366_v59 = vpop.permute.xlu1 %4365 }
0x517d   :  { %v9131_v47 = vmul.f32 %v7632_v30, %v4366_v59 }
0x517f   :  { %4370 = vrot.lane.b32.xlu0 %v9131_v47, %s7856_s11 }
0x5180   :  { %v4374_v44 = vpop.permute.xlu1 %4373 }
0x51f1   :  { %v4371_v42 = vpop.permute.xlu0 %4370 }
0x51f2   :  { %v4376_v48 = vsel %vm66_vm1, %v4371_v42, %v4374_v44 }
0x51f3   :  { %6787 = vmatmul.mubr.msk.f32.vlgmr.msra.gmra.mrb[38].mxu0 %vm68_vm2, %v4376_v48 }
0x51f4   :  { %7274 = vmatpush3.bf16.msra.mxu0 %v8457_v20  ;;  %6808 = vmatprep.mubr.msk.f32.mxu0 %vm7853_vm0, %v9586_v4 }
0x51f5   :  { %7275 = vmatprep.subr.bf16.mxu0 %v9588_v22 }
0x51f8   :  { %7277 = vmatpush3.bf16.msra.mxu0 %v8467_v27 }
0x51f9   :  { %7284 = vmatprep.subr.bf16.mxu0 %v9588_v22 }
0x52c6   :  { %v4446_v51 = vpop.f32.mrb[38].mxu0 }
0x52c7   :  { %v4447_v17 = vadd.f32 %v9027_v2, %v4446_v51  ;;  %v6788_v38 = vpop.f32.mrb[39].mxu0 }
0x52c9   :  { %7635 = vtanh.f32 %v4447_v17  ;;  %v5862_v15 = vmul.f32 -1.442695, %v4447_v17 }
0x52cb   :  { %7637 = vpow2.f32 %v5862_v15 }
0x52d3   :  { %v7636_v30 = vpop.eup %7635 }
0x52d4   :  { %4459 = vrot.lane.b32.xlu0 %v7636_v30, %s7855_s28 }
0x52d5   :  { %v7638_v19 = vpop.eup %7637 }
0x52d6   :  { %v4453_v13 = vadd.f32 1.0, %v7638_v19 }
0x52d8   :  { %7639 = vrcp.f32 %v4453_v13 }
0x52e2   :  { %v7640_v50 = vpop.eup %7639 }
0x52e3   :  { %v4457_v44 = vmul.f32 %v7640_v50, %v9033_v41 }
0x5346   :  { %v4460_v46 = vpop.permute.xlu0 %4459 }
0x5347   :  { %v4462_v59 = vmul.f32 %v7640_v50, %v4460_v46 }
0x5349   :  { %4464 = vrot.lane.b32.xlu1 %v4462_v59, %s7856_s11 }
0x53bb   :  { %v4465_v42 = vpop.permute.xlu1 %4464 }
0x53bc   :  { %v9147_v48 = vadd.f32 %v4465_v42, %v4457_v44 }
0x53be   :  { %7641 = vtanh.f32 %v9147_v48 }
0x53c8   :  { %v7642_v51 = vpop.eup %7641 }
0x53c9   :  { %4470 = vrot.lane.b32.xlu0 %v7642_v51, %s7855_s28 }
0x543b   :  { %v4471_v17 = vpop.permute.xlu0 %4470 }
0x543c   :  { %v9151_v38 = vmul.f32 %v7640_v50, %v4471_v17 }
0x543e   :  { %4482 = vrot.lane.b32.xlu1 %v9151_v38, %s7856_s11 }
0x54b0   :  { %v4483_v30 = vpop.permute.xlu1 %4482 }
0x54b1   :  { %6798 = vmatmul.mubr.msk.f32.vlgmr.msra.gmra.mrb[40].mxu1 %vm66_vm1, %v4483_v30 }
0x54b2   :  { %7280 = vmatpush3.bf16.msra.mxu1 %v8252_v28  ;;  %6819 = vmatprep.mubr.msk.f32.mxu1 %vm7853_vm0, %v9586_v4 }
0x54b3   :  { %7281 = vmatprep.subr.bf16.mxu1 %v9588_v22 }
0x54b6   :  { %7283 = vmatpush3.bf16.msra.mxu1 %v8258_v29 }
0x54b7   :  { %7296 = vmatprep.subr.bf16.mxu1 %v9588_v22 }
0x54b9   :  { %6820 = vmatmul.mubr.msk.f32.vlgmr.msra.gmra.mrb[42].mxu1 %vm66_vm1, %v4483_v30 }
0x54ba   :  { %7298 = vmatpush3.bf16.msra.mxu1 %v8038_v34  ;;  %6857 = vmatprep.mubr.msk.f32.mxu1 %vm7853_vm0, %v9586_v4 }
0x54bb   :  { %7299 = vmatprep.subr.bf16.mxu1 %v9588_v22 }
0x54be   :  { %7301 = vmatpush3.bf16.msra.mxu1 %v8044_v36 }
0x54bf   :  { %7302 = vmatprep.subr.bf16.mxu1 %v9588_v22 }
0x54c2   :  { %7304 = vmatpush3.bf16.msra.mxu1 %v8054_v39 }
0x54c3   :  { %7305 = vmatprep.subr.bf16.mxu1 %v9588_v22 }
0x54c6   :  { %7307 = vmatpush3.bf16.msra.mxu1 %v8065_v43 }
0x54c7   :  { %6871 = vmatprep.subr.mxu1 %v9586_v4 }
0x5584   :  { %v4552_v28 = vpop.f32.mrb[40].mxu1 }
0x5585   :  { %v4553_v29 = vadd.f32 %v8938_v57, %v4552_v28  ;;  %v6799_v41 = vpop.f32.mrb[41].mxu1 }
0x5587   :  { %v4559_v15 = vrot.slane %v4553_v29, %v8170_v54 }
0x5589   :  { %v4560_v19 = vadd.f32 %v4559_v15, %v8951_v0 }
0x558b   :  { %7643 = vtanh.f32 %v4560_v19 }
0x558c   :  { %v4802_v13 = vpop.f32.mrb[42].mxu1 }
0x558d   :  { %v4803_v50 = vadd.f32 %v8946_v9, %v4802_v13  ;;  %v6821_v46 = vpop.f32.mrb[43].mxu1 }
0x558f   :  { %v5486_v59 = vrot.slane %v4803_v50, 4 }
0x5591   :  { %v9179_v44 = vsel %vm417_vm7, %v8951_v0, %v5486_v59 }
0x5592   :  { %9593 = vst [vmem:[#allocation22_spill] sm:$0xff] %v9179_v44 }
0x5595   :  { %v7644_v42 = vpop.eup %7643 }
0x5596   :  { %6809 = vmatmul.mubr.msk.f32.vlgmr.msra.gmra.mrb[40].mxu0 %vm66_vm1, %v7644_v42 }
0x5597   :  { %7286 = vmatpush3.bf16.msra.mxu0 %v7972_v5  ;;  %6838 = vmatprep.mubr.msk.f32.mxu0 %vm7853_vm0, %v9586_v4 }
0x5598   :  { %7287 = vmatprep.subr.bf16.mxu0 %v9588_v22 }
0x559b   :  { %7289 = vmatpush3.bf16.msra.mxu0 %v7983_v8 }
0x559c   :  { %7290 = vmatprep.subr.bf16.mxu0 %v9588_v22 }
0x559f   :  { %7292 = vmatpush3.bf16.msra.mxu0 %v7993_v11 }
0x55a0   :  { %7293 = vmatprep.subr.bf16.mxu0 %v9588_v22 }
0x55a3   :  { %7295 = vmatpush3.bf16.msra.mxu0 %v8003_v14 }
0x55a4   :  { %7308 = vmatprep.subr.bf16.mxu0 %v9588_v22 }
0x5669   :  { %v4631_v57 = vpop.f32.mrb[40].mxu0 }
0x566a   :  { %v4632_v9 = vadd.f32 %v4631_v57, %v8729_v25  ;;  %v6810_v0 = vpop.f32.mrb[41].mxu0 }
0x566c   :  { %v4635_v51 = vmul.f32 0.2, %v4632_v9 }
0x566e   :  { %7645 = vtanh.f32 %v4635_v51 }
0x5678   :  { %v7646_v17 = vpop.eup %7645 }
0x5679   :  { %v4637_v30 = vmul.f32 2.5, %v7646_v17 }
0x567b   :  { %7647 = vrcp.f32 %v4637_v30 }
0x5685   :  { %v7648_v28 = vpop.eup %7647 }
0x5686   :  { %v9193_v29 = vmul.f32 %v7648_v28, %v4635_v51 }
0x5688   :  { %9594 = vst [vmem:[#allocation23_spill] sm:$0xff] %v9193_v29  ;;  %v5865_v41 = vmul.f32 -1.442695, %v9193_v29 }
0x568a   :  { %7649 = vpow2.f32 %v5865_v41 }
0x5694   :  { %v7650_v15 = vpop.eup %7649 }
0x5695   :  { %v4643_v19 = vadd.f32 1.0, %v7650_v15 }
0x5697   :  { %7651 = vrcp.f32 %v4643_v19 }
0x56a1   :  { %v7652_v13 = vpop.eup %7651 }
0x56a2   :  { %v4689_v50 = vmul.f32 1.6666666, %v7652_v13  ;;  %v4693_v46 = vmul.f32 2.5, %v7652_v13  ;;  %v4646_v59 = vadd.f32 %v7652_v13, %v7652_v13 }
0x56a4   :  { %7653 = vlog2.f32 %v4689_v50 }
0x56a5   :  { %7655 = vlog2.f32 %v4693_v46 }
0x56a6   :  { %7657 = vrcp.f32 %v4646_v59 }
0x56ae   :  { %v7654_v42 = vpop.eup %7653 }
0x56af   :  { %v7656_v57 = vpop.eup %7655  ;;  %v4691_v9 = vmul.f32 0.6931472, %v7654_v42  ;;  %v4649_v42 = vld [vmem:[%s9542_s13] sm:$0xf] }
0x56b0   :  { %v7658_v0 = vpop.eup %7657  ;;  %v4695_v17 = vmul.f32 0.6931472, %v7656_v57 }
0x56b1   :  { %v4692_v51 = vmul.f32 %v7652_v13, %v4691_v9  ;;  %v4648_v30 = vmul.f32 %v7658_v0, %v7652_v13 }
0x56b2   :  { %v4696_v28 = vmul.f32 %v7652_v13, %v4695_v17 }
0x56b3   :  { %4651 = vrot.lane.b32.xlu0 %v4648_v30, %s7867_s4 }
0x56b4   :  { %v4697_v41 = vadd.f32 %v4696_v28, %v4692_v51  ;;  %v4474_v28 = vrot.slane %v8913_v18, 5 }
0x56b6   :  { %v4698_v15 = vsel %vm4674_vm6, %v4697_v41, 0.0  ;;  %v4476_v41 = vsel %vm3646_vm10, %v8984_v61, %v4474_v28 }
0x56b7   :  { %v4699_v19 = vrot.slane %v4698_v15, 4 }
0x56b9   :  { %v4700_v25 = vadd.f32 %v4699_v19, %v4698_v15 }
0x56bb   :  { %v4701_v29 = vrot.slane %v4700_v25, 2 }
0x56bd   :  { %v4702_v50 = vadd.f32 %v4701_v29, %v4700_v25 }
0x56bf   :  { %v4703_v46 = vrot.slane %v4702_v50, 1 }
0x56c1   :  { %v4704_v59 = vadd.f32 %v4703_v46, %v4702_v50 }
0x56c3   :  { %v9199_v44 = vadd.f32 %v4704_v59, %v8971_v32 }
0x5725   :  { %v4652_v13 = vpop.permute.xlu0 %4651 }
0x5726   :  { %vm4654_vm5 = vcmp.ge.f32.partialorder %v4649_v42, %v4652_v13 }
0x5727   :  { %v9205_v57 = vsel %vm4654_vm5, 1.0, %v9586_v4  ;;  %vm4720_vm5 = vcmask 1044224  }
0x5728   :  { %v4707_v9 = vsel %vm4706_vm9, %v9205_v57, 0.0  ;;  %4716 = vperm.xlu1 %7382, %v9205_v57  }
0x5729   :  { %v4708_v25 = vrot.slane %v4707_v9, 4 }
0x572b   :  { %v4709_v29 = vadd.f32 %v4708_v25, %v4707_v9 }
0x572d   :  { %v4710_v0 = vrot.slane %v4709_v29, 2 }
0x572f   :  { %v4711_v17 = vadd.f32 %v4710_v0, %v4709_v29 }
0x5731   :  { %v4712_v32 = vrot.slane %v4711_v17, 1 }
0x5733   :  { %v4713_v51 = vadd.f32 %v4712_v32, %v4711_v17 }
0x5735   :  { %v4728_v30 = vadd.f32 1.0, %v4713_v51 }
0x5737   :  { %4731 = vperm.xlu0 %7381, %v4728_v30  }
0x573b   :  { %4810 = vrot.lane.b32.xlu0 %v9131_v47, %s7855_s28 }
0x57a7   :  { %v4717_v15 = vpop.permute.xlu1 %4716 }
0x57a8   :  { %v4719_v19 = vmul.f32 %v4717_v15, %v4476_v41 }
0x57aa   :  { %v4721_v50 = vsel %vm4720_vm5, %v4719_v19, 0.0 }
0x57ab   :  { %v4722_v46 = vrot.slane %v4721_v50, 4 }
0x57ad   :  { %v4723_v59 = vadd.f32 %v4722_v46, %v4721_v50 }
0x57af   :  { %v4724_v42 = vrot.slane %v4723_v59, 2 }
0x57b1   :  { %v4725_v9 = vadd.f32 %v4724_v42, %v4723_v59 }
0x57b3   :  { %v4726_v25 = vrot.slane %v4725_v9, 1 }
0x57b5   :  { %v4727_v29 = vadd.f32 %v4726_v25, %v4725_v9 }
0x57b6   :  { %v4732_v13 = vpop.permute.xlu0 %4731 }
0x57b7   :  { %7659 = vrcp.f32 %v4732_v13 }
0x57ba   :  { %v4811_v18 = vpop.permute.xlu0 %4810 }
0x57c1   :  { %v7660_v0 = vpop.eup %7659 }
0x57c2   :  { %v4735_v17 = vmul.f32 %v7660_v0, %v4727_v29 }
0x57c4   :  { %4807 = vrot.lane.b32.xlu1 %v4735_v17, %s7856_s11  ;;  %v7780_v17 = vld [vmem:[%s9534_s5] sm:$0xf]  ;;  %s7869_s5 = smov 5  }
0x5836   :  { %v4808_v47 = vpop.permute.xlu1 %4807 }
0x5837   :  { %v4813_v61 = vsel %vm66_vm1, %v4808_v47, %v4811_v18 }
0x5838   :  { %6839 = vmatmul.mubr.msk.f32.vlgmr.msra.gmra.mrb[42].mxu0 %vm68_vm2, %v4813_v61 }
0x5839   :  { %7310 = vmatpush3.bf16.msra.mxu0 %v8098_v1  ;;  %6868 = vmatprep.mubr.msk.f32.mxu0 %vm7853_vm0, %v9586_v4 }
0x583a   :  { %7311 = vmatprep.subr.bf16.mxu0 %v9588_v22 }
0x583d   :  { %7313 = vmatpush3.bf16.msra.mxu0 %v8104_v3 }
0x583e   :  { %7314 = vmatprep.subr.bf16.mxu0 %v9588_v22 }
0x590b   :  { %v4883_v32 = vpop.f32.mrb[42].mxu0 }
0x590c   :  { %v4884_v51 = vadd.f32 %v9001_v21, %v4883_v32  ;;  %v6840_v30 = vpop.f32.mrb[43].mxu0 }
0x590e   :  { %7661 = vtanh.f32 %v4884_v51  ;;  %v5870_v41 = vmul.f32 -1.442695, %v4884_v51 }
0x5910   :  { %7663 = vpow2.f32 %v5870_v41 }
0x5918   :  { %v7662_v28 = vpop.eup %7661 }
0x5919   :  { %4896 = vrot.lane.b32.xlu1 %v7662_v28, %s7855_s28 }
0x591a   :  { %v7664_v1 = vpop.eup %7663 }
0x591b   :  { %v4890_v15 = vadd.f32 1.0, %v7664_v1 }
0x591d   :  { %7665 = vrcp.f32 %v4890_v15 }
0x5927   :  { %v7666_v19 = vpop.eup %7665 }
0x5928   :  { %v4894_v3 = vmul.f32 %v7666_v19, %v9125_v10 }
0x598b   :  { %v4897_v50 = vpop.permute.xlu1 %4896 }
0x598c   :  { %v4899_v46 = vmul.f32 %v7666_v19, %v4897_v50 }
0x598e   :  { %4901 = vrot.lane.b32.xlu0 %v4899_v46, %s7856_s11 }
0x5a00   :  { %v4902_v59 = vpop.permute.xlu0 %4901 }
0x5a01   :  { %v9227_v42 = vadd.f32 %v4902_v59, %v4894_v3 }
0x5a03   :  { %7667 = vtanh.f32 %v9227_v42 }
0x5a0d   :  { %v7668_v13 = vpop.eup %7667 }
0x5a0e   :  { %4907 = vrot.lane.b32.xlu1 %v7668_v13, %s7855_s28 }
0x5a12   :  { %4915 = vrot.lane.b32.xlu1 %v9151_v38, %s7855_s28 }
0x5a80   :  { %v4908_v9 = vpop.permute.xlu1 %4907 }
0x5a81   :  { %v9233_v25 = vmul.f32 %v7666_v19, %v4908_v9 }
0x5a83   :  { %4912 = vrot.lane.b32.xlu0 %v9233_v25, %s7856_s11 }
0x5a84   :  { %v4916_v29 = vpop.permute.xlu1 %4915 }
0x5af5   :  { %v4913_v0 = vpop.permute.xlu0 %4912 }
0x5af6   :  { %v4918_v10 = vsel %vm66_vm1, %v4913_v0, %v4916_v29 }
0x5af7   :  { %6858 = vmatmul.mubr.msk.f32.vlgmr.msra.gmra.mrb[44].mxu1 %vm68_vm2, %v4918_v10 }
0x5af8   :  { %6872 = vmatpush3.msk.msra.mxu1 %vm417_vm7, %v7780_v17  ;;  %6873 = vmatprep.mubr.msk.f32.mxu1 %vm7853_vm0, %v9586_v4 }
0x5af9   :  { %7326 = vmatprep.subr.bf16.mxu1 %v9588_v22 }
0x5bca   :  { %v4988_v38 = vpop.f32.mrb[44].mxu1 }
0x5bcb   :  { %v4989_v18 = vadd.f32 %v9027_v2, %v4988_v38  ;;  %v6859_v47 = vpop.f32.mrb[45].mxu1 }
0x5bcd   :  { %7669 = vtanh.f32 %v4989_v18  ;;  %v5872_v32 = vmul.f32 -1.442695, %v4989_v18 }
0x5bcf   :  { %7671 = vpow2.f32 %v5872_v32 }
0x5bd7   :  { %v7670_v61 = vpop.eup %7669 }
0x5bd8   :  { %5001 = vrot.lane.b32.xlu0 %v7670_v61, %s7855_s28 }
0x5bd9   :  { %v7672_v51 = vpop.eup %7671 }
0x5bda   :  { %v4995_v30 = vadd.f32 1.0, %v7672_v51 }
0x5bdc   :  { %7673 = vrcp.f32 %v4995_v30 }
0x5be6   :  { %v7674_v28 = vpop.eup %7673 }
0x5be7   :  { %v4999_v15 = vmul.f32 %v7674_v28, %v9147_v48 }
0x5c4a   :  { %v5002_v41 = vpop.permute.xlu0 %5001 }
0x5c4b   :  { %v5004_v1 = vmul.f32 %v7674_v28, %v5002_v41  ;;  %v7870_v41 = vmov 5  }
0x5c4c   :  { %7383 = vset.pattern.permute.xlu1 %v7870_v41 }
0x5c4d   :  { %5006 = vrot.lane.b32.xlu1 %v5004_v1, %s7856_s11 }
0x5cbf   :  { %v5007_v19 = vpop.permute.xlu1 %5006 }
0x5cc0   :  { %v9250_v50 = vadd.f32 %v5007_v19, %v4999_v15 }
0x5cc2   :  { %7675 = vtanh.f32 %v9250_v50 }
0x5ccc   :  { %v7676_v46 = vpop.eup %7675 }
0x5ccd   :  { %5012 = vrot.lane.b32.xlu0 %v7676_v46, %s7855_s28 }
0x5d3f   :  { %v5013_v3 = vpop.permute.xlu0 %5012 }
0x5d40   :  { %v9254_v59 = vmul.f32 %v7674_v28, %v5013_v3 }
0x5d42   :  { %5017 = vrot.lane.b32.xlu1 %v9254_v59, %s7856_s11 }
0x5db4   :  { %v5018_v13 = vpop.permute.xlu1 %5017 }
0x5db5   :  { %6869 = vmatmul.mubr.msk.f32.vlgmr.msra.gmra.mrb[44].mxu0 %vm66_vm1, %v5018_v13 }
0x5db6   :  { %7316 = vmatpush3.bf16.msra.mxu0 %v7972_v5  ;;  %6892 = vmatprep.mubr.msk.f32.mxu0 %vm7853_vm0, %v9586_v4 }
0x5db7   :  { %7317 = vmatprep.subr.bf16.mxu0 %v9588_v22 }
0x5dba   :  { %7319 = vmatpush3.bf16.msra.mxu0 %v7983_v8 }
0x5dbb   :  { %7320 = vmatprep.subr.bf16.mxu0 %v9588_v22 }
0x5dbe   :  { %7322 = vmatpush3.bf16.msra.mxu0 %v7993_v11 }
0x5dbf   :  { %7323 = vmatprep.subr.bf16.mxu0 %v9588_v22 }
0x5dc2   :  { %7325 = vmatpush3.bf16.msra.mxu0 %v8003_v14 }
0x5dc3   :  { %7338 = vmatprep.subr.bf16.mxu0 %v9588_v22 }
0x5e88   :  { %v5087_v48 = vpop.f32.mrb[44].mxu0 }
0x5e89   :  { %v5088_v5 = vadd.f32 %v9055_v53, %v5087_v48  ;;  %v6870_v9 = vpop.f32.mrb[45].mxu0 }
0x5e8a   :  { %v5111_v9 = vld [vmem:[%s9541_s12] sm:$0x1] }
0x5e8b   :  { %v5091_v29 = vmul.f32 0.2, %v5088_v5 }
0x5e8d   :  { %7677 = vtanh.f32 %v5091_v29 }
0x5e97   :  { %v7678_v0 = vpop.eup %7677 }
0x5e98   :  { %v5093_v10 = vmul.f32 2.5, %v7678_v0 }
0x5e9a   :  { %7679 = vrcp.f32 %v5093_v10 }
0x5ea4   :  { %v7680_v8 = vpop.eup %7679 }
0x5ea5   :  { %v9270_v17 = vmul.f32 %v7680_v8, %v5091_v29 }
0x5ea7   :  { %v5096_v11 = vsel %vm365_vm3, %v9270_v17, -inf }
0x5ea8   :  { %5097 = vmax.xlane.f32.xlu0 %v5096_v11 }
0x5f35   :  { %v9274_v38 = vpop.xlane.xlu0 %5097 }
0x5f36   :  { %v5099_v14 = vsub.f32 %v9270_v17, %v9274_v38 }
0x5f38   :  { %v5100_v18 = vmul.f32 1.442695, %v5099_v14 }
0x5f3a   :  { %7681 = vpow2.f32 %v5100_v18 }
0x5f44   :  { %v7682_v53 = vpop.eup %7681 }
0x5f45   :  { %v5102_v47 = vsel %vm365_vm3, %v7682_v53, 0.0 }
0x5f46   :  { %5103 = vadd.xlane.f32.xlu1 %v5102_v47 }
0x5fd3   :  { %v9279_v61 = vpop.xlane.xlu1 %5103 }
0x5fd4   :  { %7683 = vrcp.f32 %v9279_v61 }
0x5fde   :  { %v7684_v32 = vpop.eup %7683 }
0x5fdf   :  { %v5106_v51 = vmul.f32 %v7684_v32, %v7682_v53  ;;  %v5193_v53 = vsel %vm5192_vm11, 1, %v9589_v23 }
0x5fe1   :  { %5117 = vrot.lane.b32.xlu1 %v5106_v51, %s7858_s26  ;;  %5113 = vrot.lane.b32.xlu0 %v5106_v51, %s7859_s27  ;;  %v5127_v30 = vrot.slane %v5106_v51, %v8330_v45 }
0x5fe3   :  { %v5134_v28 = vrot.slane %v5127_v30, %v8330_v45 }
0x5fe5   :  { %5135 = vrot.lane.b32.xlu0 %v5134_v28, %s7869_s5 }
0x6053   :  { %v5114_v1 = vpop.permute.xlu0 %5113  ;;  %v5118_v19 = vpop.permute.xlu1 %5117 }
0x6054   :  { %v5116_v15 = vadd.f32 %v5114_v1, %v5106_v51 }
0x6056   :  { %v5120_v46 = vadd.f32 %v5118_v19, %v5116_v15  ;;  %v5147_v3 = vrot.slane %v5116_v15, %v8330_v45 }
0x6057   :  { %v5136_v29 = vpop.permute.xlu0 %5135 }
0x6058   :  { %v5154_v13 = vrot.slane %v5147_v3, %v8330_v45  ;;  %v5168_v48 = vrot.slane %v5120_v46, %v8330_v45  ;;  %vm5138_vm9 = vcmp.ge.f32.partialorder %v5111_v9, %v5136_v29 }
0x6059   :  { %v5139_v10 = vsel %vm5138_vm9, 1, %v9589_v23 }
0x605a   :  { %v5175_v5 = vrot.slane %v5168_v48, %v8330_v45  ;;  %5155 = vrot.lane.b32.xlu1 %v5154_v13, %s7869_s5 }
0x605c   :  { %5176 = vrot.lane.b32.xlu0 %v5175_v5, %s7869_s5 }
0x6060   :  { %5279 = vrot.lane.b32.xlu0 %v9233_v25, %s7855_s28  ;;  %v9595_v25 = vmov 1  }
0x60cc   :  { %v5156_v0 = vpop.permute.xlu1 %5155 }
0x60cd   :  { %vm5158_vm5 = vcmp.ge.f32.partialorder %v5111_v9, %v5156_v0 }
0x60ce   :  { %v5159_v8 = vsel %vm5158_vm5, 1, %v9589_v23  ;;  %v5177_v45 = vpop.permute.xlu0 %5176 }
0x60cf   :  { %v5160_v11 = vadd.s32 %v5159_v8, %v5139_v10  ;;  %vm5179_vm14 = vcmp.ge.f32.partialorder %v5111_v9, %v5177_v45 }
0x60d0   :  { %v5180_v14 = vsel %vm5179_vm14, 1, %v9589_v23  ;;  %vm5715_vm14 = vcmask 40960  }
0x60d1   :  { %v5181_v18 = vadd.s32 %v5180_v14, %v5160_v11 }
0x60d2   :  { %v5280_v23 = vpop.permute.xlu0 %5279 }
0x60d3   :  { %5183 = vperm.xlu1 %7383, %v5181_v18  }
0x60d7   :  { %7384 = vset.pattern.permute.xlu1 %v9595_v25 }
0x6152   :  { %v5184_v47 = vpop.permute.xlu1 %5183 }
0x6153   :  { %v5188_v32 = vrot.slane %v5184_v47, %v8170_v54 }
0x6155   :  { %vm5189_vm9 = vcmp.eq.s32.totalorder %v8172_v56, %v5188_v32  ;;  %v5194_v51 = vmul.u32 %v5193_v53, %v5188_v32 }
0x6156   :  { %v9310_v30 = vsel %vm5189_vm9, 1.0, %v9586_v4 }
0x6157   :  { %6874 = vmatmul.mubr.msk.f32.vlgmr.msra.gmra.mrb[46].mxu1 %vm413_vm8, %v9310_v30  ;;  %v5195_v28 = vadd.s32 %v5194_v51, %v9101_v7 }
0x6158   :  { %7328 = vmatpush3.bf16.msra.mxu1 %v8038_v34  ;;  %6911 = vmatprep.mubr.msk.f32.mxu1 %vm7853_vm0, %v9586_v4 }
0x6159   :  { %7329 = vmatprep.subr.bf16.mxu1 %v9588_v22  ;;  %5716 = vst.msk [vmem:[#allocation3] sm:$0x1] %vm5715_vm14, %v5195_v28 }
0x615c   :  { %7331 = vmatpush3.bf16.msra.mxu1 %v8044_v36 }
0x615d   :  { %7332 = vmatprep.subr.bf16.mxu1 %v9588_v22 }
0x6160   :  { %7334 = vmatpush3.bf16.msra.mxu1 %v8054_v39 }
0x6161   :  { %7335 = vmatprep.subr.bf16.mxu1 %v9588_v22 }
0x6164   :  { %7337 = vmatpush3.bf16.msra.mxu1 %v8065_v43 }
0x6165   :  { %7344 = vmatprep.subr.bf16.mxu1 %v9588_v22 }
0x622a   :  { %v5265_v34 = vpop.f32.mrb[46].mxu1 }
0x622b   :  { %v5282_v7 = vsel %vm66_vm1, %v5265_v34, %v5280_v23  ;;  %v6875_v1 = vpop.f32.mrb[47].mxu1 }
0x622c   :  { %6893 = vmatmul.mubr.msk.f32.vlgmr.msra.gmra.mrb[46].mxu0 %vm68_vm2, %v5282_v7 }
0x622d   :  { %7340 = vmatpush3.bf16.msra.mxu0 %v8417_v62  ;;  %6922 = vmatprep.mubr.msk.f32.mxu0 %vm7853_vm0, %v9586_v4 }
0x622e   :  { %7341 = vmatprep.subr.bf16.mxu0 %v9588_v22 }
0x6231   :  { %7343 = vmatpush3.bf16.msra.mxu0 %v8423_v63 }
0x62ff   :  { %v5352_v36 = vpop.f32.mrb[46].mxu0 }
0x6300   :  { %v5353_v39 = vadd.f32 %v9001_v21, %v5352_v36  ;;  %v6894_v43 = vpop.f32.mrb[47].mxu0 }
0x6302   :  { %7685 = vtanh.f32 %v5353_v39  ;;  %v5878_v19 = vmul.f32 -1.442695, %v5353_v39 }
0x6304   :  { %7687 = vpow2.f32 %v5878_v19 }
0x630c   :  { %v7686_v15 = vpop.eup %7685 }
0x630d   :  { %5365 = vrot.lane.b32.xlu1 %v7686_v15, %s7855_s28 }
0x630e   :  { %v7688_v46 = vpop.eup %7687 }
0x630f   :  { %v5359_v3 = vadd.f32 1.0, %v7688_v46 }
0x6311   :  { %7689 = vrcp.f32 %v5359_v3 }
0x631b   :  { %v7690_v62 = vpop.eup %7689 }
0x631c   :  { %v5363_v63 = vmul.f32 %v7690_v62, %v9227_v42 }
0x637f   :  { %v5366_v13 = vpop.permute.xlu1 %5365 }
0x6380   :  { %v5368_v48 = vmul.f32 %v7690_v62, %v5366_v13 }
0x6382   :  { %5370 = vrot.lane.b32.xlu0 %v5368_v48, %s7856_s11 }
0x63f4   :  { %v5371_v5 = vpop.permute.xlu0 %5370 }
0x63f5   :  { %v5373_v9 = vadd.f32 %v5371_v5, %v5363_v63 }
0x63f7   :  { %7691 = vtanh.f32 %v5373_v9  ;;  %v9598_v9 = vld [vmem:[#allocation11_spill] sm:$0xff] }
0x6401   :  { %v7692_v21 = vpop.eup %7691 }
0x6402   :  { %5376 = vrot.lane.b32.xlu1 %v7692_v21, %s7855_s28 }
0x6406   :  { %5384 = vrot.lane.b32.xlu1 %v9254_v59, %s7855_s28 }
0x6474   :  { %v5377_v29 = vpop.permute.xlu1 %5376 }
0x6475   :  { %v5379_v0 = vmul.f32 %v7690_v62, %v5377_v29  ;;  %v9599_v29 = vld [vmem:[#allocation10_spill] sm:$0xff] }
0x6477   :  { %5381 = vrot.lane.b32.xlu0 %v5379_v0, %s7856_s11 }
0x6478   :  { %v5385_v10 = vpop.permute.xlu1 %5384 }
0x64e9   :  { %v5382_v8 = vpop.permute.xlu0 %5381 }
0x64ea   :  { %v5387_v45 = vsel %vm66_vm1, %v5382_v8, %v5385_v10  ;;  %v9600_v10 = vld [vmem:[#allocation13_spill] sm:$0xff] }
0x64eb   :  { %6912 = vmatmul.mubr.msk.f32.vlgmr.msra.gmra.mrb[48].mxu1 %vm68_vm2, %v5387_v45 }
0x64ec   :  { %7346 = vmatpush3.bf16.msra.mxu1 %v8457_v20  ;;  %6933 = vmatprep.mubr.msk.f32.mxu1 %vm7853_vm0, %v9586_v4  ;;  %vm5683_vm0 = vcmask 4096  }
0x64ed   :  { %7347 = vmatprep.subr.bf16.mxu1 %v9588_v22 }
0x64f0   :  { %7349 = vmatpush3.bf16.msra.mxu1 %v8467_v27 }
0x65be   :  { %v5457_v42 = vpop.f32.mrb[48].mxu1 }
0x65bf   :  { %v5458_v59 = vadd.f32 %v9027_v2, %v5457_v42  ;;  %v6913_v11 = vpop.f32.mrb[49].mxu1 }
0x65c0   :  { %v9601_v11 = vld [vmem:[#allocation15_spill] sm:$0xff] }
0x65c1   :  { %7693 = vtanh.f32 %v5458_v59  ;;  %v5880_v18 = vmul.f32 -1.442695, %v5458_v59 }
0x65c3   :  { %7695 = vpow2.f32 %v5880_v18  ;;  %v9602_v18 = vmov 2  }
0x65cb   :  { %v7694_v14 = vpop.eup %7693 }
0x65cc   :  { %5470 = vrot.lane.b32.xlu0 %v7694_v14, %s7855_s28  ;;  %v1645_v14 = vsel %vm1644_vm4, %v9601_v11, 0.0 }
0x65cd   :  { %v7696_v25 = vpop.eup %7695 }
0x65ce   :  { %v5464_v53 = vadd.f32 1.0, %v7696_v25 }
0x65d0   :  { %7697 = vrcp.f32 %v5464_v53  ;;  %v9604_v53 = vmov 3  }
0x65da   :  { %v7698_v20 = vpop.eup %7697 }
0x65db   :  { %v5468_v27 = vmul.f32 %v7698_v20, %v9250_v50 }
0x663e   :  { %v5471_v47 = vpop.permute.xlu0 %5470 }
0x663f   :  { %v5473_v32 = vmul.f32 %v7698_v20, %v5471_v47 }
0x6641   :  { %5475 = vrot.lane.b32.xlu1 %v5473_v32, %s7856_s11 }
0x66b3   :  { %v5476_v22 = vpop.permute.xlu1 %5475 }
0x66b4   :  { %v5478_v51 = vadd.f32 %v5476_v22, %v5468_v27  ;;  %v9607_v27 = vld [vmem:[#allocation20_spill] sm:$0xff] }
0x66b5   :  { %v3655_v22 = vsub.f32 %v9607_v27, %v9607_v27 }
0x66b6   :  { %7699 = vtanh.f32 %v5478_v51 }
0x66b7   :  { %7701 = vlog2.f32 %v8141_v33  ;;  %v3656_v51 = vmul.f32 1.442695, %v3655_v22 }
0x66b8   :  { %7703 = vlog2.f32 %v8600_v52 }
0x66b9   :  { %7705 = vlog2.f32 %v8827_v6 }
0x66ba   :  { %7707 = vlog2.f32 %v9279_v61 }
0x66c0   :  { %v7700_v2 = vpop.eup %7699 }
0x66c1   :  { %5481 = vrot.lane.b32.xlu0 %v7700_v2, %s7855_s28  ;;  %v7702_v28 = vpop.eup %7701 }
0x66c2   :  { %v378_v23 = vmul.f32 0.6931472, %v7702_v28  ;;  %v7704_v34 = vpop.eup %7703 }
0x66c3   :  { %v2067_v7 = vmul.f32 0.6931472, %v7704_v34  ;;  %v7706_v1 = vpop.eup %7705 }
0x66c4   :  { %v379_v50 = vadd.f32 %v378_v23, %v8135_v26  ;;  %v3085_v36 = vmul.f32 0.6931472, %v7706_v1  ;;  %v7708_v15 = vpop.eup %7707 }
0x66c5   :  { %v2068_v43 = vadd.f32 %v2067_v7, %v8595_v40  ;;  %v5108_v6 = vmul.f32 0.6931472, %v7708_v15  ;;  %v9596_v40 = vld [vmem:[#allocation19_spill] sm:$0xff] }
0x66c6   :  { %v380_v39 = vsub.f32 %v8131_v24, %v379_v50  ;;  %v3086_v52 = vadd.f32 %v3085_v36, %v8822_v60  ;;  %v9608_v50 = vld [vmem:[#allocation14_spill] sm:$0xff] }
0x66c7   :  { %v2069_v19 = vsub.f32 %v8591_v35, %v2068_v43  ;;  %v5109_v26 = vadd.f32 %v5108_v6, %v9274_v38  ;;  %v1653_v1 = vsub.f32 %v9608_v50, %v9608_v50 }
0x66c8   :  { %v491_v33 = vmul.f32 %v8180_v58, %v380_v39  ;;  %v3087_v3 = vsub.f32 %v8818_v12, %v3086_v52  ;;  %v9597_v12 = vld [vmem:[#allocation12_spill] sm:$0xff] }
0x66c9   :  { %v2228_v46 = vmul.f32 %v8631_v55, %v2069_v19  ;;  %v5110_v58 = vsub.f32 %v9270_v17, %v5109_v26  ;;  %7709 = vlog2.f32 %v9597_v12  ;;  %v1654_v36 = vmul.f32 1.442695, %v1653_v1 }
0x66ca   :  { %v492_v61 = vsel %vm365_vm3, %v491_v33, 0.0  ;;  %v3246_v62 = vmul.f32 %v9596_v40, %v3087_v3  ;;  %7711 = vlog2.f32 %v9067_v16 }
0x66cb   :  { %v2229_v24 = vsel %vm365_vm3, %v2228_v46, 0.0  ;;  %v5269_v35 = vmul.f32 %v9310_v30, %v5110_v58 }
0x66cc   :  { %v3247_v60 = vsel %vm365_vm3, %v3246_v62, 0.0 }
0x66cd   :  { %v5270_v13 = vsel %vm365_vm3, %v5269_v35, 0.0 }
0x66d3   :  { %v7710_v38 = vpop.eup %7709 }
0x66d4   :  { %v1085_v63 = vmul.f32 0.6931472, %v7710_v38  ;;  %v7712_v5 = vpop.eup %7711 }
0x66d5   :  { %v4097_v17 = vmul.f32 0.6931472, %v7712_v5 }
0x66d6   :  { %v1086_v21 = vadd.f32 %v1085_v63, %v9598_v9 }
0x66d7   :  { %v4098_v30 = vadd.f32 %v4097_v17, %v9062_v37  ;;  %v9603_v37 = vld [vmem:[#allocation18_spill] sm:$0xff] }
0x66d8   :  { %v1087_v0 = vsub.f32 %v9599_v29, %v1086_v21  ;;  %v2635_v25 = vsel %vm2634_vm13, %v9603_v37, 0.0 }
0x66d9   :  { %v4099_v45 = vsub.f32 %v9058_v31, %v4098_v30  ;;  %v9605_v31 = vld [vmem:[#allocation21_spill] sm:$0xff] }
0x66da   :  { %v1245_v8 = vmul.f32 %v9600_v10, %v1087_v0 }
0x66db   :  { %v4258_v59 = vmul.f32 %v9096_v49, %v4099_v45  ;;  %v9606_v49 = vld [vmem:[#allocation17_spill] sm:$0xff] }
0x66dc   :  { %v1246_v42 = vsel %vm365_vm3, %v1245_v8, 0.0  ;;  %v2643_v47 = vsub.f32 %v9606_v49, %v9606_v49 }
0x66dd   :  { %v4259_v16 = vsel %vm365_vm3, %v4258_v59, 0.0 }
0x66de   :  { %v2644_v32 = vmul.f32 1.442695, %v2643_v47 }
0x66e0   :  { %493 = vadd.xlane.f32.xlu0 %v492_v61  ;;  %7713 = vpow2.f32 %v2644_v32 }
0x66e1   :  { %7715 = vpow2.f32 %v3656_v51 }
0x66e4   :  { %2230 = vadd.xlane.f32.xlu0 %v2229_v24 }
0x66e8   :  { %3248 = vadd.xlane.f32.xlu0 %v3247_v60 }
0x66ea   :  { %v7714_v28 = vpop.eup %7713 }
0x66eb   :  { %v2646_v23 = vadd.f32 %v7714_v28, %v7714_v28  ;;  %v7716_v34 = vpop.eup %7715  ;;  %v7781_v28 = vld [vmem:[%s9538_s9] sm:$0x1] }
0x66ec   :  { %5271 = vadd.xlane.f32.xlu0 %v5270_v13  ;;  %v3658_v7 = vadd.f32 %v7716_v34, %v7716_v34 }
0x66ed   :  { %7717 = vlog2.f32 %v2646_v23 }
0x66ee   :  { %7719 = vlog2.f32 %v3658_v7 }
0x66ef   :  { %7721 = vpow2.f32 %v1654_v36 }
0x66f7   :  { %v7718_v39 = vpop.eup %7717 }
0x66f8   :  { %v2648_v43 = vmul.f32 0.6931472, %v7718_v39  ;;  %v7720_v15 = vpop.eup %7719  ;;  %v9610_v39 = vld [vmem:[#allocation23_spill] sm:$0xff] }
0x66f9   :  { %v3660_v52 = vmul.f32 0.6931472, %v7720_v15  ;;  %v7722_v6 = vpop.eup %7721 }
0x66fa   :  { %v2649_v33 = vadd.f32 %v2648_v43, %v9606_v49  ;;  %v1656_v46 = vadd.f32 %v7722_v6, %v7722_v6  ;;  %v4666_v43 = vsub.f32 %v9610_v39, %v9610_v39 }
0x66fb   :  { %v3661_v61 = vadd.f32 %v3660_v52, %v9607_v27  ;;  %v9611_v52 = vld [vmem:[#allocation16_spill] sm:$0xff] }
0x66fc   :  { %v2650_v19 = vsub.f32 %v9606_v49, %v2649_v33  ;;  %7723 = vlog2.f32 %v1656_v46  ;;  %v4667_v15 = vmul.f32 1.442695, %v4666_v43 }
0x66fd   :  { %v3662_v3 = vsub.f32 %v9607_v27, %v3661_v61 }
0x66fe   :  { %v2652_v26 = vsel %vm2651_vm15, %v2650_v19, 0.0 }
0x66ff   :  { %v2653_v24 = vrot.slane %v2652_v26, 4  ;;  %v3664_v40 = vsel %vm3663_vm12, %v3662_v3, 0.0 }
0x6700   :  { %v3665_v58 = vrot.slane %v3664_v40, 4 }
0x6701   :  { %v2654_v62 = vadd.f32 %v2653_v24, %v2652_v26 }
0x6702   :  { %v3666_v35 = vadd.f32 %v3665_v58, %v3664_v40 }
0x6703   :  { %v2655_v60 = vrot.slane %v2654_v62, 2 }
0x6704   :  { %v3667_v12 = vrot.slane %v3666_v35, 2 }
0x6706   :  { %v7724_v13 = vpop.eup %7723  ;;  %v3668_v17 = vadd.f32 %v3667_v12, %v3666_v35 }
0x6708   :  { %v3669_v30 = vrot.slane %v3668_v17, 1 }
0x6733   :  { %v5482_v55 = vpop.permute.xlu0 %5481 }
0x6734   :  { %v5484_v48 = vmul.f32 %v7698_v20, %v5482_v55  ;;  %v3647_v20 = vsel %vm3646_vm10, %v9605_v31, 0.0  ;;  %v1658_v55 = vmul.f32 0.6931472, %v7724_v13 }
0x6736   :  { %5490 = vrot.lane.b32.xlu1 %v5484_v48, %s7856_s11  ;;  %v2656_v48 = vadd.f32 %v2655_v60, %v2654_v62  ;;  %v1659_v63 = vadd.f32 %v1658_v55, %v9608_v50 }
0x6738   :  { %v2657_v5 = vrot.slane %v2656_v48, 1  ;;  %v1660_v9 = vsub.f32 %v9608_v50, %v1659_v63  ;;  %v9609_v50 = vld [vmem:[#allocation22_spill] sm:$0xff] }
0x673a   :  { %v2658_v21 = vadd.f32 %v2657_v5, %v2656_v48  ;;  %v9411_v45 = vsub.f32 0.0, %v1660_v9 }
0x673c   :  { %v2659_v59 = vsub.f32 0.0, %v2658_v21 }
0x675a   :  { %1247 = vadd.xlane.f32.xlu1 %v1246_v42 }
0x675e   :  { %4260 = vadd.xlane.f32.xlu1 %v4259_v16  ;;  %v3670_v16 = vadd.f32 %v3669_v30, %v3668_v17 }
0x676d   :  { %v494_v38 = vpop.xlane.xlu0 %493 }
0x676e   :  { %v9407_v10 = vsub.f32 0.0, %v494_v38 }
0x676f   :  { %1648 = vperm.xlu1 %7384, %v1645_v14  }
0x6770   :  { %v497_v9 = vmul.f32 1.442695, %v9407_v10 }
0x6771   :  { %v2231_v29 = vpop.xlane.xlu0 %2230 }
0x6772   :  { %v9415_v11 = vsub.f32 0.0, %v2231_v29 }
0x6773   :  { %7385 = vset.pattern.permute.xlu1 %v9602_v18 }
0x6774   :  { %2638 = vperm.xlu1 %7385, %v2635_v25   ;;  %v9419_v25 = vmul.f32 0.5, %v2659_v59 }
0x6775   :  { %v3249_v18 = vpop.xlane.xlu0 %3248 }
0x6776   :  { %v9421_v31 = vsub.f32 0.0, %v3249_v18 }
0x6778   :  { %7386 = vset.pattern.permute.xlu1 %v9604_v53  ;;  %v3671_v53 = vsub.f32 0.0, %v3670_v16  ;;  %v2234_v16 = vmul.f32 1.442695, %v9415_v11 }
0x6779   :  { %3650 = vperm.xlu1 %7386, %v3647_v20  }
0x677a   :  { %v9424_v47 = vmul.f32 0.33333334, %v3671_v53 }
0x677d   :  { %7387 = vset.pattern.permute.xlu1 %v7870_v41 }
0x67a8   :  { %v5491_v2 = vpop.permute.xlu1 %5490 }
0x67a9   :  { %6923 = vmatmul.mubr.msk.f32.vlgmr.msra.gmra.mrb[48].mxu0 %vm66_vm1, %v5491_v2 }
0x67e7   :  { %v1248_v0 = vpop.xlane.xlu1 %1247 }
0x67e8   :  { %v9409_v8 = vsub.f32 0.0, %v1248_v0 }
0x67ea   :  { %v1250_v42 = vadd.f32 %v9409_v8, %v9407_v10  ;;  %v1251_v63 = vmul.f32 1.442695, %v9409_v8 }
0x67eb   :  { %v4261_v49 = vpop.xlane.xlu1 %4260 }
0x67ec   :  { %v1663_v14 = vadd.f32 %v9411_v45, %v1250_v42  ;;  %v9428_v22 = vsub.f32 0.0, %v4261_v49  ;;  %v1664_v42 = vmul.f32 1.442695, %v9411_v45 }
0x67ee   :  { %v2233_v37 = vadd.f32 %v9415_v11, %v1663_v14  ;;  %v2662_v14 = vmul.f32 1.442695, %v9419_v25 }
0x67f0   :  { %v2661_v20 = vadd.f32 %v9419_v25, %v2233_v37 }
0x67f2   :  { %v3251_v32 = vadd.f32 %v9421_v31, %v2661_v20 }
0x67f4   :  { %v3673_v27 = vadd.f32 %v9424_v47, %v3251_v32 }
0x67f6   :  { %v9431_v51 = vadd.f32 %v9428_v22, %v3673_v27 }
0x687c   :  { %v5560_v2 = vpop.f32.mrb[48].mxu0 }
0x687d   :  { %v5561_v23 = vadd.f32 %v7781_v28, %v5560_v2  ;;  %v6924_v34 = vpop.f32.mrb[49].mxu0 }
0x687f   :  { %v5567_v7 = vrot.slane %v5561_v23, %v8170_v54 }
0x6881   :  { %v5568_v1 = vadd.f32 %v5567_v7, %v9609_v50  ;;  %v3252_v7 = vmul.f32 1.442695, %v9421_v31 }
0x6883   :  { %7725 = vtanh.f32 %v5568_v1 }
0x6884   :  { %7727 = vpow2.f32 %v4667_v15 }
0x688d   :  { %v7726_v36 = vpop.eup %7725 }
0x688e   :  { %6934 = vmatmul.mubr.msk.f32.vlgmr.msra.gmra.mrb[50].mxu1 %vm66_vm1, %v7726_v36  ;;  %v7728_v46 = vpop.eup %7727  ;;  %vm5666_vm1 = vcmask 1044480  }
0x688f   :  { %v4669_v26 = vadd.f32 %v7728_v46, %v7728_v46 }
0x6961   :  { %v5639_v33 = vpop.f32.mrb[50].mxu1 }
0x6962   :  { %v5640_v6 = vadd.f32 %v5639_v33, %v9611_v52  ;;  %v6935_v19 = vpop.f32.mrb[51].mxu1  ;;  %v3674_v33 = vmul.f32 1.442695, %v9424_v47 }
0x6964   :  { %v5643_v61 = vmul.f32 0.2, %v5640_v6 }
0x6966   :  { %7729 = vtanh.f32 %v5643_v61 }
0x6967   :  { %7731 = vlog2.f32 %v4669_v26 }
0x6970   :  { %v7730_v54 = vpop.eup %7729 }
0x6971   :  { %v5645_v3 = vmul.f32 2.5, %v7730_v54  ;;  %v7732_v24 = vpop.eup %7731 }
0x6972   :  { %v4671_v40 = vmul.f32 0.6931472, %v7732_v24 }
0x6973   :  { %7733 = vrcp.f32 %v5645_v3 }
0x6974   :  { %v4672_v58 = vadd.f32 %v4671_v40, %v9610_v39  ;;  %v5272_v40 = vpop.xlane.xlu0 %5271 }
0x6976   :  { %v4673_v55 = vsub.f32 %v9610_v39, %v4672_v58 }
0x6978   :  { %v4675_v12 = vsel %vm4674_vm6, %v4673_v55, 0.0 }
0x6979   :  { %v4676_v38 = vrot.slane %v4675_v12, 4 }
0x697b   :  { %v4677_v17 = vadd.f32 %v4676_v38, %v4675_v12 }
0x697d   :  { %v7734_v62 = vpop.eup %7733  ;;  %v4678_v0 = vrot.slane %v4677_v17, 2 }
0x697e   :  { %v5647_v60 = vmul.f32 %v7734_v62, %v5643_v61 }
0x697f   :  { %v4679_v59 = vadd.f32 %v4678_v0, %v4677_v17 }
0x6980   :  { %v5883_v35 = vmul.f32 -1.442695, %v5647_v60  ;;  %v5675_v13 = vsub.f32 %v5647_v60, %v5647_v60 }
0x6981   :  { %v4680_v37 = vrot.slane %v4679_v59, 1 }
0x6982   :  { %7735 = vpow2.f32 %v5883_v35  ;;  %v5676_v48 = vmul.f32 1.442695, %v5675_v13 }
0x6983   :  { %v4681_v23 = vadd.f32 %v4680_v37, %v4679_v59 }
0x6984   :  { %7737 = vpow2.f32 %v5676_v48  ;;  %v5273_v48 = vsub.f32 0.0, %v5272_v40 }
0x6985   :  { %7739 = vpow2.f32 %v1251_v63  ;;  %v4682_v43 = vsub.f32 0.0, %v4681_v23 }
0x6987   :  { %v4683_v46 = vmul.f32 0.25, %v4682_v43 }
0x6989   :  { %v4685_v13 = vmul.f32 1.442695, %v4683_v46  ;;  %v4684_v0 = vadd.f32 %v4683_v46, %v9431_v51 }
0x698c   :  { %v7736_v5 = vpop.eup %7735 }
0x698d   :  { %v5651_v21 = vadd.f32 1.0, %v7736_v5 }
0x698e   :  { %v7738_v30 = vpop.eup %7737 }
0x698f   :  { %7741 = vrcp.f32 %v5651_v21  ;;  %v5678_v29 = vadd.f32 %v7738_v30, %v7738_v30  ;;  %v7740_v18 = vpop.eup %7739  ;;  %v4658_v30 = vsel %vm417_vm7, %v9205_v57, 0.0 }
0x6990   :  { %7743 = vpow2.f32 %v497_v9  ;;  %v1253_v28 = vmul.f32 %v7740_v18, %v9409_v8 }
0x6991   :  { %7745 = vlog2.f32 %v5678_v29  ;;  %v5275_v29 = vmul.f32 1.442695, %v5273_v48 }
0x6992   :  { %7747 = vpow2.f32 %v1664_v42 }
0x6993   :  { %7749 = vpow2.f32 %v2234_v16 }
0x6994   :  { %7751 = vpow2.f32 %v2662_v14 }
0x6999   :  { %v7742_v53 = vpop.eup %7741 }
0x699a   :  { %v7744_v20 = vpop.eup %7743  ;;  %v5654_v49 = vadd.f32 %v7742_v53, %v7742_v53  ;;  %v5698_v32 = vmul.f32 1.6666666, %v7742_v53  ;;  %v5702_v27 = vmul.f32 2.5, %v7742_v53 }
0x699b   :  { %v7746_v2 = vpop.eup %7745  ;;  %v499_v50 = vmul.f32 %v7744_v20, %v9407_v10  ;;  %v4264_v10 = vmul.f32 1.442695, %v9428_v22 }
0x699c   :  { %v5680_v34 = vmul.f32 0.6931472, %v7746_v2  ;;  %7753 = vrcp.f32 %v5654_v49  ;;  %v7748_v36 = vpop.eup %7747  ;;  %v5274_v49 = vadd.f32 %v5273_v48, %v4684_v0 }
0x699d   :  { %7755 = vlog2.f32 %v5698_v32  ;;  %v1254_v39 = vadd.f32 %v1253_v28, %v499_v50  ;;  %v1666_v8 = vmul.f32 %v7748_v36, %v9411_v45  ;;  %v7750_v6 = vpop.eup %7749 }
0x699e   :  { %v5681_v1 = vadd.f32 %v5680_v34, %v5647_v60  ;;  %7757 = vlog2.f32 %v5702_v27  ;;  %v7752_v26 = vpop.eup %7751  ;;  %v2236_v24 = vmul.f32 %v7750_v6, %v9415_v11 }
0x699f   :  { %7759 = vpow2.f32 %v3252_v7  ;;  %v1667_v61 = vadd.f32 %v1666_v8, %v1254_v39  ;;  %v2664_v63 = vmul.f32 %v7752_v26, %v9419_v25 }
0x69a0   :  { %v5682_v15 = vsub.f32 %v5647_v60, %v5681_v1  ;;  %7761 = vpow2.f32 %v3674_v33 }
0x69a1   :  { %v2237_v45 = vadd.f32 %v2236_v24, %v1667_v61  ;;  %7763 = vpow2.f32 %v4264_v10 }
0x69a2   :  { %v5684_v52 = vsel %vm5683_vm0, %v5682_v15, 0.0  ;;  %7765 = vpow2.f32 %v4685_v13 }
0x69a3   :  { %v5685_v19 = vrot.slane %v5684_v52, 4  ;;  %v2665_v21 = vadd.f32 %v2664_v63, %v2237_v45  ;;  %7767 = vpow2.f32 %v5275_v29 }
0x69a5   :  { %v5686_v54 = vadd.f32 %v5685_v19, %v5684_v52 }
0x69a6   :  { %v7754_v3 = vpop.eup %7753 }
0x69a7   :  { %v7756_v62 = vpop.eup %7755  ;;  %v5687_v58 = vrot.slane %v5686_v54, 2  ;;  %v5656_v60 = vmul.f32 %v7754_v3, %v7742_v53 }
0x69a8   :  { %v7758_v35 = vpop.eup %7757  ;;  %v5700_v55 = vmul.f32 0.6931472, %v7756_v62 }
0x69a9   :  { %v5688_v12 = vadd.f32 %v5687_v58, %v5686_v54  ;;  %5659 = vrot.lane.b32.xlu0 %v5656_v60, %s7869_s5  ;;  %v5704_v38 = vmul.f32 0.6931472, %v7758_v35  ;;  %v7760_v17 = vpop.eup %7759 }
0x69aa   :  { %v5701_v5 = vmul.f32 %v7742_v53, %v5700_v55  ;;  %v3254_v16 = vmul.f32 %v7760_v17, %v9421_v31  ;;  %v7762_v14 = vpop.eup %7761 }
0x69ab   :  { %v5689_v9 = vrot.slane %v5688_v12, 1  ;;  %v5705_v11 = vmul.f32 %v7742_v53, %v5704_v38  ;;  %v3676_v57 = vmul.f32 %v7762_v14, %v9424_v47  ;;  %v7764_v51 = vpop.eup %7763 }
0x69ac   :  { %v3255_v37 = vadd.f32 %v3254_v16, %v2665_v21  ;;  %v7766_v23 = vpop.eup %7765  ;;  %v4266_v34 = vmul.f32 %v7764_v51, %v9428_v22  ;;  %v5657_v22 = vld [vmem:[%s9542_s13] sm:$0x1f] }
0x69ad   :  { %4661 = vperm.xlu0 %7381, %v4658_v30   ;;  %v5690_v42 = vadd.f32 %v5689_v9, %v5688_v12  ;;  %v5706_v59 = vadd.f32 %v5705_v11, %v5701_v5  ;;  %v4687_v36 = vmul.f32 %v7766_v23, %v4683_v46  ;;  %v7768_v43 = vpop.eup %7767 }
0x69ae   :  { %v3677_v28 = vadd.f32 %v3676_v57, %v3255_v37  ;;  %v5277_v15 = vmul.f32 %v7768_v43, %v5273_v48 }
0x69af   :  { %v5691_v18 = vsub.f32 0.0, %v5690_v42  ;;  %v5707_v25 = vsel %vm5683_vm0, %v5706_v59, 0.0 }
0x69b0   :  { %v5708_v20 = vrot.slane %v5707_v25, 4  ;;  %v4267_v50 = vadd.f32 %v4266_v34, %v3677_v28 }
0x69b1   :  { %v5692_v53 = vmul.f32 0.2, %v5691_v18  ;;  %7388 = vset.pattern.permute.xlu0 %v7870_v41 }
0x69b2   :  { %v5709_v32 = vadd.f32 %v5708_v20, %v5707_v25  ;;  %v4688_v41 = vadd.f32 %v4687_v36, %v4267_v50 }
0x69b3   :  { %v5694_v27 = vmul.f32 1.442695, %v5692_v53  ;;  %v9467_v2 = vadd.f32 %v5692_v53, %v5274_v49 }
0x69b4   :  { %v5710_v31 = vrot.slane %v5709_v32, 2  ;;  %v5278_v8 = vadd.f32 %v5277_v15, %v4688_v41 }
0x69b5   :  { %7769 = vpow2.f32 %v5694_v27 }
0x69b6   :  { %v5711_v7 = vadd.f32 %v5710_v31, %v5709_v32 }
0x69b8   :  { %v5712_v1 = vrot.slane %v5711_v7, 1 }
0x69ba   :  { %v5713_v39 = vadd.f32 %v5712_v1, %v5711_v7 }
0x69bc   :  { %v5714_v47 = vadd.f32 %v5713_v39, %v9199_v44 }
0x69bf   :  { %v7770_v33 = vpop.eup %7769 }
0x69c0   :  { %v5696_v52 = vmul.f32 %v7770_v33, %v5692_v53 }
0x69c2   :  { %v5697_v6 = vadd.f32 %v5696_v52, %v5278_v8 }
0x69c4   :  { %5721 = vrot.lane.b32.xlu0 %v5697_v6, %s7861_s6 }
0x6a1b   :  { %v5660_v19 = vpop.permute.xlu0 %5659 }
0x6a1c   :  { %vm5662_vm2 = vcmp.ge.f32.partialorder %v5657_v22, %v5660_v19 }
0x6a1d   :  { %v5884_v61 = vsel %vm5662_vm2, 1.0, %v9586_v4 }
0x6a1e   :  { %v5667_v46 = vsel %vm5666_vm1, %v5884_v61, 0.0 }
0x6a1f   :  { %5670 = vperm.xlu1 %7387, %v5667_v46  }
0x6a23   :  { %5725 = vrot.lane.b32.xlu1 %v5714_v47, %s7863_s22 }
0x6a24   :  { %7793 = shalt.err (!%p7790_p4)
}
0x6a25   :  { %s7794_s20 = scalar_lea.hbm %s9543_s14, 16 }
0x6a26   :  { %p7795_p5 = scmp.ne.s32.totalorder %s9543_s14, %s7794_s20  ;;  %p7798_p6 = scmp.lt.u32.totalorder %s7794_s20, %s9543_s14 }
0x6a28   :  { %p7800_p7 = pnand %p7798_p6, %p7795_p5 }
0x6a2a   :  { %7803 = shalt.err (!%p7800_p7)
}
0x6a2b   :  { %5743 = dma.vmem_to_hbm [thread:$0]  %s5741_s8, 16, %s9543_s14, [#allocation4]   ;;  %v1649_v44 = vpop.permute.xlu1 %1648  ;;  %vm9612_vm3 = vcmp.eq.s32.totalorder %v8172_v56, 2  ;;  %vm9613_vm7 = vcmp.eq.s32.totalorder %v8172_v56, 1  ;;  %vm9614_vm8 = vcmp.eq.s32.totalorder %v8172_v56, 3  ;;  %vm9615_vm4 = vcmp.eq.s32.totalorder %v8172_v56, 4 }
0x6a2c   :  { %v5831_v10 = vsel %vm9612_vm3, 1.0, %v9586_v4  ;;  %v5813_v54 = vsel %vm9613_vm7, 1.0, %v9586_v4  ;;  %v5849_v3 = vsel %vm9614_vm8, 1.0, %v9586_v4  ;;  %v5867_v62 = vsel %vm9615_vm4, 1.0, %v9586_v4  ;;  %v4662_v58 = vpop.permute.xlu0 %4661  ;;  %s7872_s14 = smov [#allocation5]   ;;  %s7873_s4 = smov [#allocation7]  }
0x6a2d   :  { %v1651_v60 = vmul.f32 %v5813_v54, %v1649_v44  ;;  %v4664_v13 = vmul.f32 %v5867_v62, %v4662_v58  ;;  %v5885_v55 = vsel %vm5192_vm11, 1.0, %v9586_v4  ;;  %vm5728_vm13 = vcmask 7168   ;;  %s5750_s25 = sshll.u32 %s7872_s14, 4  ;;  %s5760_s29 = sshll.u32 %s7873_s4, 4  ;;  %s5751_s25 = int_to_ptr.vmem [resolvable:$true] %s5750_s25  ;;  %s5761_s29 = int_to_ptr.vmem [resolvable:$true] %s5760_s29 }
0x6a2e   :  { %vm5730_vm15 = vcmask 15360   ;;  %vm5732_vm10 = vcmask 16384   ;;  %vm5718_vm12 = vcmask 46080   ;;  %s7804_s30 = scalar_lea.vmem %s5751_s25, 128  ;;  %p7809_p9 = scmp.lt.s32.totalorder %s5751_s25, %s5751_s25 }
0x6a2f   :  { %v2639_v26 = vpop.permute.xlu1 %2638  ;;  %p7805_p8 = scmp.ne.s32.totalorder %s5751_s25, %s7804_s30  ;;  %p7810_p10 = scmp.lt.s32.totalorder %s7804_s30, %s7804_s30 }
0x6a30   :  { %v2641_v40 = vmul.f32 %v5831_v10, %v2639_v26 }
0x6a31   :  { %p7811_p11 = por %p7810_p10, %p7809_p9 }
0x6a32   :  { %v2642_v45 = vadd.f32 %v2641_v40, %v1651_v60 }
0x6a33   :  { %v3651_v24 = vpop.permute.xlu1 %3650  ;;  %p7812_p12 = pnand %p7811_p11, %p7805_p8 }
0x6a34   :  { %v3653_v35 = vmul.f32 %v5849_v3, %v3651_v24 }
0x6a36   :  { %v3654_v48 = vadd.f32 %v3653_v35, %v2642_v45  ;;  %v5722_v63 = vpop.permute.xlu0 %5721 }
0x6a37   :  { %v5729_v9 = vsel %vm5728_vm13, %v9467_v2, %v5722_v63 }
0x6a38   :  { %v4665_v38 = vadd.f32 %v4664_v13, %v3654_v48 }
0x6a9e   :  { %v5671_v12 = vpop.permute.xlu1 %5670 }
0x6a9f   :  { %v5673_v5 = vmul.f32 %v5885_v55, %v5671_v12 }
0x6aa1   :  { %v5674_v17 = vadd.f32 %v5673_v5, %v4665_v38 }
0x6aa2   :  { %v5726_v11 = vpop.permute.xlu1 %5725 }
0x6aa3   :  { %v7350_v21 = vtrunc.f32 %v5674_v17  ;;  %v5731_v30 = vsel %vm5730_vm15, %v5729_v9, %v5726_v11 }
0x6aa4   :  { %5733 = vst.msk [vmem:[#allocation7] sm:$0x1] %vm5732_vm10, %v5731_v30 }
0x6aa5   :  { %v7351_v56 = vcvt.f32.s32 %v7350_v21 }
0x6aa7   :  { %5719 = vst.msk [vmem:[#allocation5] sm:$0x3f] %vm5718_vm12, %v7351_v56 }
0x6aa8   :  { %7815 = shalt.err (!%p7812_p12)
}
0x6aa9   :  { %s7816_s0 = scalar_lea.hbm %s9544_s15, 128 }
0x6aaa   :  { %p7817_p13 = scmp.ne.s32.totalorder %s9544_s15, %s7816_s0  ;;  %p7820_p0 = scmp.lt.u32.totalorder %s7816_s0, %s9544_s15 }
0x6aac   :  { %p7822_p1 = pnand %p7820_p0, %p7817_p13 }
0x6aae   :  { %7825 = shalt.err (!%p7822_p1)
}
0x6aaf   :  { %5753 = dma.vmem_to_hbm [thread:$0]  %s5751_s25, 128, %s9544_s15, [#allocation6]  }
0x6ab0   :  { %s7826_s9 = scalar_lea.vmem %s5761_s29, 16  ;;  %s7830_s11 = scalar_lea.vmem %s5761_s29, 32 }
0x6ab1   :  { %p7827_p2 = scmp.ne.s32.totalorder %s5761_s29, %s7826_s9  ;;  %p7831_p3 = scmp.lt.s32.totalorder %s5761_s29, %s5761_s29 }
0x6ab2   :  { %p7832_p4 = scmp.lt.s32.totalorder %s7830_s11, %s7826_s9 }
0x6ab4   :  { %p7833_p5 = por %p7832_p4, %p7831_p3 }
0x6ab6   :  { %p7834_p6 = pnand %p7833_p5, %p7827_p2 }
0x6ab8   :  { %7837 = shalt.err (!%p7834_p6)
}
0x6ab9   :  { %s7838_s19 = scalar_lea.hbm %s9545_s16, 16 }
0x6aba   :  { %p7839_p7 = scmp.ne.s32.totalorder %s9545_s16, %s7838_s19  ;;  %p7842_p8 = scmp.lt.u32.totalorder %s7838_s19, %s9545_s16 }
0x6abc   :  { %p7844_p9 = pnand %p7842_p8, %p7839_p7 }
0x6abe   :  { %7847 = shalt.err (!%p7844_p9)
}
0x6abf   :  { %5763 = dma.vmem_to_hbm [thread:$0]  %s5761_s29, 16, %s9545_s16, [#allocation6]  }
0x6ac0   :  { %7848 = dma.done.wait [#allocation4], 16  }
0x6ac1   :  { %7849 = vsyncadd [#allocation4], 4294967280 }
0x6ac2   :  { %7850 = dma.done.wait [#allocation6], 144  }
0x6ac3   :  { %7851 = vsyncadd [#allocation6], 4294967152 }
0x6ac4   :  { %5773 = vsyncpa [#allocation4], 1 }
0x6ac5   :  { %5774 = vsyncpa [#allocation6], 1 }

</bundles_post_ra>
